<compile_context>
chip_gen: v6e
topology: v6e:2x2x1
jax: 0.10.0
libtpu: 0.0.40
codegen_flags: <defaults>
</compile_context>

<pallas_src>
import functools
import math

import jax
import jax.numpy as jnp
from jax.experimental import pallas as pl
from jax.experimental.pallas import tpu as pltpu


# Per-encoder parameter names (unfused, f32) as produced by init_encoder_params.
PARAM_NAMES = (
    "ln0_g", "ln0_b",
    "wq", "bq", "wk", "bk", "wv", "bv", "wo", "bo",
    "ln1_g", "ln1_b",
    "w1", "b1", "w2", "b2",
    "ln2_g", "ln2_b",
    "wp", "bp",
)


def _round_up(x, m):
    return (x + m - 1) // m * m


def _ln(x, g, b, eps=1e-12):
    # x is f32; keep LayerNorm statistics in f32 on all generations.
    mu = jnp.mean(x, axis=-1, keepdims=True)
    var = jnp.mean((x - mu) ** 2, axis=-1, keepdims=True)
    return (x - mu) * jax.lax.rsqrt(var + eps) * g + b


def _gelu(x):
    # tanh approximation of GELU (EUP-friendly).
    # TODO(synk): HF/PyTorch BERT default is exact erf-GELU; outputs differ slightly.
    return 0.5 * x * (1.0 + jnp.tanh(0.7978845608028654 * (x + 0.044715 * x * x * x)))


def encoder_kernel(
    x_ref, mask_ref,
    ln0_g, ln0_b, wkv, bkv, wq, bq, wo, bo,
    ln1_g, ln1_b, w1, b1, w2, b2, ln2_g, ln2_b, wp, bp,
    pooled_ref,
    *, rep_pos: int,
):
    # Blocks: x_ref (1, TB, S, H) bf16, mask_ref (1, TB, 1, S) bf16 (additive:
    # 0 = attend, -1e9 = masked), matmul weights bf16 / LN params + biases f32,
    # pooled_ref (1, TB, H) f32.
    f32 = jnp.float32
    bf16 = jnp.bfloat16

    x = x_ref[0]                                    # (TB, S, H) bf16
    TB, S, H = x.shape
    neg_mask = mask_ref[0][:, 0, :].astype(f32)     # (TB, S) additive mask

    g0, b0 = ln0_g[0], ln0_b[0]
    # Embedding LayerNorm.  The full sequence only feeds K/V, so keep that copy
    # in bf16; recompute the rep-token row in f32 for the residual path
    # (identical values, avoids holding a f32 (TB,S,H) intermediate).
    h_kv = _ln(x.astype(f32), g0, b0).astype(bf16)                 # (TB, S, H) bf16
    h_rep = _ln(x[:, rep_pos, :].astype(f32), g0, b0)              # (TB, H)   f32

    # ---- Fused K|V projection over all TB*S rows (bf16 MXU, f32 accum) ------
    kv = (jnp.dot(h_kv.reshape(TB * S, H), wkv[0],
                  preferred_element_type=f32) + bkv[0]).astype(bf16)   # (TB*S, 2H) bf16
    kv = kv.reshape(TB, S, 2 * H)
    k = kv[:, :, :H]                                # (TB, S, H) bf16
    v = kv[:, :, H:]                                # (TB, S, H) bf16

    # ---- Representation-token path only (everything downstream of K/V) ------
    q = jnp.dot(h_rep.astype(bf16), wq[0], preferred_element_type=f32) + bq[0]   # (TB, H)

    scale = 1.0 / jnp.sqrt(f32(H))
    # One query row per example: broadcast-multiply + lane reduce (VPU/XLU)
    # instead of TB heavily padded M=1 MXU pushes.
    scores = jnp.sum(q[:, None, :] * k, axis=-1) * scale + neg_mask              # (TB, S)
    scores = scores - jnp.max(scores, axis=-1, keepdims=True)
    e = jnp.exp(scores)
    attn = e * pl.reciprocal(jnp.sum(e, axis=-1, keepdims=True), approx=True)

    # attn @ V: broadcast-multiply + sublane reduce (keeps the MXU free).
    ctx = jnp.sum(attn[:, :, None] * v, axis=1)                                  # (TB, H)

    attn_out = jnp.dot(ctx.astype(bf16), wo[0], preferred_element_type=f32) + bo[0]
    h1 = _ln(h_rep + attn_out, ln1_g[0], ln1_b[0])                               # (TB, H)

    # ---- Feed-forward (rep-token rows only) ---------------------------------
    f = _gelu(jnp.dot(h1.astype(bf16), w1[0], preferred_element_type=f32) + b1[0])
    f = jnp.dot(f.astype(bf16), w2[0], preferred_element_type=f32) + b2[0]
    h2 = _ln(h1 + f, ln2_g[0], ln2_b[0])                                         # (TB, H)

    # ---- Pooler: dense + tanh -----------------------------------------------
    pooled = jnp.tanh(jnp.dot(h2.astype(bf16), wp[0], preferred_element_type=f32) + bp[0])
    pooled_ref[0] = pooled


def _prepare_encoder_weights(params):
    """Fuse wk|wv, cast matmul weights to bf16, return list in kernel order."""
    f32 = lambda a: a.astype(jnp.float32)
    b16 = lambda a: a.astype(jnp.bfloat16)
    wkv = jnp.concatenate([params["wk"], params["wv"]], axis=-1)   # (H, 2H)
    bkv = jnp.concatenate([params["bk"], params["bv"]], axis=-1)   # (1, 2H)
    return [
        f32(params["ln0_g"]), f32(params["ln0_b"]),
        b16(wkv), f32(bkv),
        b16(params["wq"]), f32(params["bq"]),
        b16(params["wo"]), f32(params["bo"]),
        f32(params["ln1_g"]), f32(params["ln1_b"]),
        b16(params["w1"]), f32(params["b1"]),
        b16(params["w2"]), f32(params["b2"]),
        f32(params["ln2_g"]), f32(params["ln2_b"]),
        b16(params["wp"]), f32(params["bp"]),
    ]


def _vmem_budget_bytes():
    """Generation-aware usable-VMEM budget (~80% of physical capacity)."""
    try:
        cap = int(pltpu.get_tpu_info().vmem_capacity_bytes)
    except Exception:
        cap = 64 << 20   # conservative default (v7x per-core VMEM)
    return max(32 << 20, min(int(cap * 0.8), cap - (8 << 20)))


def _pick_batch_tile(B, S, H, F, wblock_bytes, vmem_budget, E):
    """VMEM-budget-driven batch tile: multiple of 8, capped at 256."""
    # Dominant per-batch-row residents: bf16 x block (2-deep pipeline), h_kv
    # bf16, kv bf16, f32 VPU temps for q.K^T / attn.V, plus small rep-row
    # tensors.  Estimate, not an exact accounting.
    per_row = 18 * S * H + 4 * S + 16 * (H + F) + 4096
    fixed = 2 * wblock_bytes + (4 << 20)   # weights (worst case double-buffered) + slack
    avail = vmem_budget - fixed
    tb = max(8, (min(avail // per_row, 256) // 8) * 8)
    tb = min(tb, _round_up(B, 8))
    # v7x has 2 TensorCores: with a single encoder make sure the batch axis has
    # at least 2 grid steps so both cores get work.
    if E == 1 and tb >= _round_up(B, 8) and tb >= 16:
        tb = max(8, (tb // 2 // 8) * 8)
    return tb


def _embed(params, ids, segments, attn_mask):
    B, S = ids.shape
    # TODO(synk): fuse the embedding gather into the kernel (scalar-prefetch ids
    # + per-row DMA) to avoid an HBM round trip of the (B,S,H) embedding tensor.
    emb = (
        params["tok_emb"][ids]
        + params["seg_emb"][segments]
        + params["pos_emb"][None, :S, :]
    ).astype(jnp.bfloat16)                                           # (B, S, H) bf16
    # Precompute the additive attention mask: 0 where attended, -1e9 where masked.
    add_mask = ((attn_mask.astype(jnp.float32) - 1.0) * 1e9
                ).astype(jnp.bfloat16).reshape(B, 1, S)              # (B, 1, S) bf16
    return emb, add_mask


def encoders_forward(param_sets, embs, masks, representation_token_pos=0):
    """Run E encoders (stacked weight sets) over embs (E,B,S,H) -> pooled (E,B,H)."""
    # TODO(synk): per-sample tensor representation_token_pos (DPR supports it) is
    # not handled; only a static int position is supported here.
    # TODO(synk): S-chunked K/V + online softmax path for very long sequences
    # (keeps TB large under v7x's 64 MiB VMEM) not implemented.
    rep_pos = int(representation_token_pos)

    E, B, S, H = embs.shape

    prepared = [_prepare_encoder_weights(p) for p in param_sets]
    weights = [jnp.stack(ws, axis=0) for ws in zip(*prepared)]       # each (E, r, c)
    wblock_bytes = sum(math.prod(w.shape[1:]) * w.dtype.itemsize for w in weights)
    F = weights[10].shape[-1]                                        # w1: (E, H, F)

    budget = _vmem_budget_bytes()
    TB = _pick_batch_tile(B, S, H, F, wblock_bytes, budget, E)

    # Pad the batch up to a TB multiple (padded rows are sliced off afterwards).
    Bp = _round_up(B, TB)
    if Bp != B:
        embs = jnp.pad(embs, ((0, 0), (0, Bp - B), (0, 0), (0, 0)))
        masks = jnp.pad(masks, ((0, 0), (0, Bp - B), (0, 0), (0, 0)))
    n_b = Bp // TB

    def call(single_buffer_weights):
        # Weight blocks are indexed only by the encoder axis -> re-DMA'd only
        # when the grid moves to the next encoder.  Single-buffer them to
        # reclaim VMEM for activations when supported.
        if single_buffer_weights:
            weight_specs = [
                pl.BlockSpec((1,) + w.shape[1:], lambda ei, bi: (ei, 0, 0),
                             pipeline_mode=pl.Buffered(1))
                for w in weights
            ]
        else:
            weight_specs = [
                pl.BlockSpec((1,) + w.shape[1:], lambda ei, bi: (ei, 0, 0))
                for w in weights
            ]
        return pl.pallas_call(
            functools.partial(encoder_kernel, rep_pos=rep_pos),
            out_shape=jax.ShapeDtypeStruct((E, Bp, H), jnp.float32),
            grid=(E, n_b),   # encoder axis outermost: weights stay resident across bi
            in_specs=[
                pl.BlockSpec((1, TB, S, H), lambda ei, bi: (ei, bi, 0, 0)),
                pl.BlockSpec((1, TB, 1, S), lambda ei, bi: (ei, bi, 0, 0)),
            ] + weight_specs,
            out_specs=pl.BlockSpec((1, TB, H), lambda ei, bi: (ei, bi, 0)),
            compiler_params=pltpu.CompilerParams(
                dimension_semantics=("parallel", "parallel"),
                vmem_limit_bytes=int(budget),
            ),
        )(embs, masks, *weights)

    try:
        pooled = call(True)
    except Exception:
        # TODO(synk): pl.Buffered(1) rejected by this JAX build; fall back to
        # default double-buffered weight blocks.
        pooled = call(False)

    return pooled[:, :B]


def encoder_forward(params, ids, segments, attn_mask, representation_token_pos=0):
    """Single sub-encoder (mirrors get_representation): returns (None, pooled, None)."""
    emb, mask = _embed(params, ids, segments, attn_mask)
    pooled = encoders_forward([params], emb[None], mask[None], representation_token_pos)[0]
    # TODO(synk): sequence_output / hidden_states not materialized (BiEncoder.forward discards them).
    return None, pooled, None


def _same_weight_shapes(p1, p2):
    return all(p1[k].shape == p2[k].shape for k in PARAM_NAMES)


def biencoder_forward(
    q_params, c_params,
    query_ids, query_segments, query_attn_mask,
    ctx_ids, ctx_segments, ctx_attn_mask,
    encoder_type=None, representation_token_pos=0,
):
    # fix_q_encoder / fix_ctx_encoder only gate gradients; no-op for inference.
    q_enc = q_params if (encoder_type is None or encoder_type == "query") else c_params
    c_enc = c_params if (encoder_type is None or encoder_type == "ctx") else q_params

    q_emb, q_mask = _embed(q_enc, query_ids, query_segments, query_attn_mask)
    c_emb, c_mask = _embed(c_enc, ctx_ids, ctx_segments, ctx_attn_mask)

    if q_emb.shape == c_emb.shape and _same_weight_shapes(q_enc, c_enc):
        # Fused path: one pallas_call, encoder axis = leading grid dim.
        pooled = encoders_forward(
            [q_enc, c_enc],
            jnp.stack([q_emb, c_emb], axis=0),
            jnp.stack([q_mask, c_mask], axis=0),
            representation_token_pos,
        )
        return pooled[0], pooled[1]

    # Fallback (different batch / seq lengths): two calls with E=1.
    q_out = encoders_forward([q_enc], q_emb[None], q_mask[None], representation_token_pos)[0]
    c_out = encoders_forward([c_enc], c_emb[None], c_mask[None], representation_token_pos)[0]
    return q_out, c_out


def init_encoder_params(key, vocab, max_pos, H, F):
    ks = jax.random.split(key, 10)

    def w(k, shape, scale=0.02):
        return (scale * jax.random.normal(k, shape)).astype(jnp.float32)

    ones = lambda s: jnp.ones(s, jnp.float32)
    zeros = lambda s: jnp.zeros(s, jnp.float32)
    return dict(
        tok_emb=w(ks[0], (vocab, H)),
        seg_emb=w(ks[1], (2, H)),
        pos_emb=w(ks[2], (max_pos, H)),
        ln0_g=ones((1, H)), ln0_b=zeros((1, H)),
        wq=w(ks[3], (H, H)), bq=zeros((1, H)),
        wk=w(ks[4], (H, H)), bk=zeros((1, H)),
        wv=w(ks[5], (H, H)), bv=zeros((1, H)),
        wo=w(ks[6], (H, H)), bo=zeros((1, H)),
        ln1_g=ones((1, H)), ln1_b=zeros((1, H)),
        w1=w(ks[7], (H, F)), b1=zeros((1, F)),
        w2=w(ks[8], (F, H)), b2=zeros((1, H)),
        ln2_g=ones((1, H)), ln2_b=zeros((1, H)),
        wp=w(ks[9], (H, H)), bp=zeros((1, H)),
    )


if __name__ == "__main__":
    # Small but lane-aligned shapes: H multiple of 128.
    B, S, H, F, V = 4, 8, 128, 256, 64

    key = jax.random.PRNGKey(0)
    kq, kc, kd1, kd2 = jax.random.split(key, 4)

    q_params = init_encoder_params(kq, V, S, H, F)   # query_model weights
    c_params = init_encoder_params(kc, V, S, H, F)   # ctx_model weights

    query_ids = jax.random.randint(kd1, (B, S), 0, V, dtype=jnp.int32)
    ctx_ids = jax.random.randint(kd2, (B, S), 0, V, dtype=jnp.int32)
    query_segments = jnp.zeros((B, S), jnp.int32)
    ctx_segments = jnp.zeros((B, S), jnp.int32)
    query_attn_mask = jnp.ones((B, S), jnp.int32)
    ctx_attn_mask = jnp.ones((B, S), jnp.int32)

    query_out, ctx_out = biencoder_forward(
        q_params, c_params,
        query_ids, query_segments, query_attn_mask,
        ctx_ids, ctx_segments, ctx_attn_mask,
        encoder_type=None, representation_token_pos=0,
    )
    jax.block_until_ready((query_out, ctx_out))

    assert query_out.shape == (B, H) and ctx_out.shape == (B, H)
    assert query_out.dtype == jnp.float32 and ctx_out.dtype == jnp.float32
    assert bool(jnp.all(jnp.isfinite(query_out))) and bool(jnp.all(jnp.isfinite(ctx_out)))
    print("KERNEL_OK")
</pallas_src>

<mosaic_0001>
module attributes {stable_mosaic.version = 11 : i64} {
  func.func @encoder_kernel(%arg0: i32, %arg1: i32, %arg2: memref<1x8x8x128xbf16, #tpu.memory_space<vmem>>, %arg3: memref<1x8x1x8xbf16, #tpu.memory_space<vmem>>, %arg4: memref<1x1x128xf32, #tpu.memory_space<vmem>>, %arg5: memref<1x1x128xf32, #tpu.memory_space<vmem>>, %arg6: memref<1x128x256xbf16, #tpu.memory_space<vmem>>, %arg7: memref<1x1x256xf32, #tpu.memory_space<vmem>>, %arg8: memref<1x128x128xbf16, #tpu.memory_space<vmem>>, %arg9: memref<1x1x128xf32, #tpu.memory_space<vmem>>, %arg10: memref<1x128x128xbf16, #tpu.memory_space<vmem>>, %arg11: memref<1x1x128xf32, #tpu.memory_space<vmem>>, %arg12: memref<1x1x128xf32, #tpu.memory_space<vmem>>, %arg13: memref<1x1x128xf32, #tpu.memory_space<vmem>>, %arg14: memref<1x128x256xbf16, #tpu.memory_space<vmem>>, %arg15: memref<1x1x256xf32, #tpu.memory_space<vmem>>, %arg16: memref<1x256x128xbf16, #tpu.memory_space<vmem>>, %arg17: memref<1x1x128xf32, #tpu.memory_space<vmem>>, %arg18: memref<1x1x128xf32, #tpu.memory_space<vmem>>, %arg19: memref<1x1x128xf32, #tpu.memory_space<vmem>>, %arg20: memref<1x128x128xbf16, #tpu.memory_space<vmem>>, %arg21: memref<1x1x128xf32, #tpu.memory_space<vmem>>, %arg22: memref<1x8x128xf32, #tpu.memory_space<vmem>>) attributes {dimension_semantics = [#tpu.dimension_semantics<parallel>, #tpu.dimension_semantics<parallel>], iteration_bounds = array<i64: 2, 1>, scalar_prefetch = 0 : i64, scratch_operands = 0 : i64, tpu.core_type = #tpu.core_type<tc>, window_params = [{transform_indices = @transform_0, window_bounds = array<i64: 1, 8, 8, 128>}, {transform_indices = @transform_1, window_bounds = array<i64: 1, 8, 1, 8>}, {pipeline_mode = #tpu.pipeline_mode<synchronous>, transform_indices = @transform_2, window_bounds = array<i64: 1, 1, 128>}, {pipeline_mode = #tpu.pipeline_mode<synchronous>, transform_indices = @transform_3, window_bounds = array<i64: 1, 1, 128>}, {pipeline_mode = #tpu.pipeline_mode<synchronous>, transform_indices = @transform_4, window_bounds = array<i64: 1, 128, 256>}, {pipeline_mode = #tpu.pipeline_mode<synchronous>, transform_indices = @transform_5, window_bounds = array<i64: 1, 1, 256>}, {pipeline_mode = #tpu.pipeline_mode<synchronous>, transform_indices = @transform_6, window_bounds = array<i64: 1, 128, 128>}, {pipeline_mode = #tpu.pipeline_mode<synchronous>, transform_indices = @transform_7, window_bounds = array<i64: 1, 1, 128>}, {pipeline_mode = #tpu.pipeline_mode<synchronous>, transform_indices = @transform_8, window_bounds = array<i64: 1, 128, 128>}, {pipeline_mode = #tpu.pipeline_mode<synchronous>, transform_indices = @transform_9, window_bounds = array<i64: 1, 1, 128>}, {pipeline_mode = #tpu.pipeline_mode<synchronous>, transform_indices = @transform_10, window_bounds = array<i64: 1, 1, 128>}, {pipeline_mode = #tpu.pipeline_mode<synchronous>, transform_indices = @transform_11, window_bounds = array<i64: 1, 1, 128>}, {pipeline_mode = #tpu.pipeline_mode<synchronous>, transform_indices = @transform_12, window_bounds = array<i64: 1, 128, 256>}, {pipeline_mode = #tpu.pipeline_mode<synchronous>, transform_indices = @transform_13, window_bounds = array<i64: 1, 1, 256>}, {pipeline_mode = #tpu.pipeline_mode<synchronous>, transform_indices = @transform_14, window_bounds = array<i64: 1, 256, 128>}, {pipeline_mode = #tpu.pipeline_mode<synchronous>, transform_indices = @transform_15, window_bounds = array<i64: 1, 1, 128>}, {pipeline_mode = #tpu.pipeline_mode<synchronous>, transform_indices = @transform_16, window_bounds = array<i64: 1, 1, 128>}, {pipeline_mode = #tpu.pipeline_mode<synchronous>, transform_indices = @transform_17, window_bounds = array<i64: 1, 1, 128>}, {pipeline_mode = #tpu.pipeline_mode<synchronous>, transform_indices = @transform_18, window_bounds = array<i64: 1, 128, 128>}, {pipeline_mode = #tpu.pipeline_mode<synchronous>, transform_indices = @transform_19, window_bounds = array<i64: 1, 1, 128>}, {transform_indices = @transform_20, window_bounds = array<i64: 1, 8, 128>}]} {
    %c0 = arith.constant 0 : index
    %c0_0 = arith.constant 0 : index
    %c0_1 = arith.constant 0 : index
    %c0_2 = arith.constant 0 : index
    %0 = vector.load %arg2[%c0, %c0_0, %c0_1, %c0_2] : memref<1x8x8x128xbf16, #tpu.memory_space<vmem>>, vector<1x8x8x128xbf16>
    %1 = vector.shape_cast %0 : vector<1x8x8x128xbf16> to vector<8x8x128xbf16>
    %c0_3 = arith.constant 0 : index
    %c0_4 = arith.constant 0 : index
    %c0_5 = arith.constant 0 : index
    %c0_6 = arith.constant 0 : index
    %2 = vector.load %arg3[%c0_3, %c0_4, %c0_5, %c0_6] : memref<1x8x1x8xbf16, #tpu.memory_space<vmem>>, vector<1x8x1x8xbf16>
    %3 = vector.shape_cast %2 : vector<1x8x1x8xbf16> to vector<8x1x8xbf16>
    %4 = vector.shape_cast %3 : vector<8x1x8xbf16> to vector<8x8xbf16>
    %5 = arith.extf %4 : vector<8x8xbf16> to vector<8x8xf32>
    %c0_7 = arith.constant 0 : index
    %c0_8 = arith.constant 0 : index
    %c0_9 = arith.constant 0 : index
    %6 = vector.load %arg4[%c0_7, %c0_8, %c0_9] : memref<1x1x128xf32, #tpu.memory_space<vmem>>, vector<1x1x128xf32>
    %7 = vector.shape_cast %6 : vector<1x1x128xf32> to vector<1x128xf32>
    %c0_10 = arith.constant 0 : index
    %c0_11 = arith.constant 0 : index
    %c0_12 = arith.constant 0 : index
    %8 = vector.load %arg5[%c0_10, %c0_11, %c0_12] : memref<1x1x128xf32, #tpu.memory_space<vmem>>, vector<1x1x128xf32>
    %9 = vector.shape_cast %8 : vector<1x1x128xf32> to vector<1x128xf32>
    %10 = arith.extf %1 : vector<8x8x128xbf16> to vector<8x8x128xf32>
    %cst = arith.constant dense<0.000000e+00> : vector<8x8xf32>
    %11 = vector.multi_reduction <add>, %10, %cst [2] : vector<8x8x128xf32> to vector<8x8xf32>
    %12 = vector.shape_cast %11 : vector<8x8xf32> to vector<8x8x1xf32>
    %cst_13 = arith.constant 1.280000e+02 : f32
    %13 = vector.broadcast %cst_13 : f32 to vector<8x8x1xf32>
    %14 = arith.divf %12, %13 : vector<8x8x1xf32>
    %15 = vector.broadcast %14 : vector<8x8x1xf32> to vector<8x8x128xf32>
    %16 = arith.subf %10, %15 : vector<8x8x128xf32>
    %17 = arith.mulf %16, %16 : vector<8x8x128xf32>
    %cst_14 = arith.constant dense<0.000000e+00> : vector<8x8xf32>
    %18 = vector.multi_reduction <add>, %17, %cst_14 [2] : vector<8x8x128xf32> to vector<8x8xf32>
    %19 = vector.shape_cast %18 : vector<8x8xf32> to vector<8x8x1xf32>
    %cst_15 = arith.constant 1.280000e+02 : f32
    %20 = vector.broadcast %cst_15 : f32 to vector<8x8x1xf32>
    %21 = arith.divf %19, %20 : vector<8x8x1xf32>
    %22 = vector.broadcast %14 : vector<8x8x1xf32> to vector<8x8x128xf32>
    %23 = arith.subf %10, %22 : vector<8x8x128xf32>
    %cst_16 = arith.constant 9.99999996E-13 : f32
    %24 = vector.broadcast %cst_16 : f32 to vector<8x8x1xf32>
    %25 = arith.addf %21, %24 : vector<8x8x1xf32>
    %26 = math.rsqrt %25 : vector<8x8x1xf32>
    %27 = vector.broadcast %26 : vector<8x8x1xf32> to vector<8x8x128xf32>
    %28 = arith.mulf %23, %27 : vector<8x8x128xf32>
    %29 = vector.shape_cast %7 : vector<1x128xf32> to vector<1x1x128xf32>
    %30 = vector.broadcast %29 : vector<1x1x128xf32> to vector<8x8x128xf32>
    %31 = arith.mulf %28, %30 : vector<8x8x128xf32>
    %32 = vector.shape_cast %9 : vector<1x128xf32> to vector<1x1x128xf32>
    %33 = vector.broadcast %32 : vector<1x1x128xf32> to vector<8x8x128xf32>
    %34 = arith.addf %31, %33 : vector<8x8x128xf32>
    %35 = arith.truncf %34 : vector<8x8x128xf32> to vector<8x8x128xbf16>
    %36 = vector.extract_strided_slice %1 {offsets = [0, 0, 0], sizes = [8, 1, 128], strides = [1, 1, 1]} : vector<8x8x128xbf16> to vector<8x1x128xbf16>
    %37 = vector.shape_cast %36 : vector<8x1x128xbf16> to vector<8x128xbf16>
    %38 = arith.extf %37 : vector<8x128xbf16> to vector<8x128xf32>
    %cst_17 = arith.constant dense<0.000000e+00> : vector<8xf32>
    %39 = vector.multi_reduction <add>, %38, %cst_17 [1] : vector<8x128xf32> to vector<8xf32>
    %40 = vector.shape_cast %39 : vector<8xf32> to vector<8x1xf32>
    %cst_18 = arith.constant 1.280000e+02 : f32
    %41 = vector.broadcast %cst_18 : f32 to vector<8x1xf32>
    %42 = arith.divf %40, %41 : vector<8x1xf32>
    %43 = vector.broadcast %42 : vector<8x1xf32> to vector<8x128xf32>
    %44 = arith.subf %38, %43 : vector<8x128xf32>
    %45 = arith.mulf %44, %44 : vector<8x128xf32>
    %cst_19 = arith.constant dense<0.000000e+00> : vector<8xf32>
    %46 = vector.multi_reduction <add>, %45, %cst_19 [1] : vector<8x128xf32> to vector<8xf32>
    %47 = vector.shape_cast %46 : vector<8xf32> to vector<8x1xf32>
    %cst_20 = arith.constant 1.280000e+02 : f32
    %48 = vector.broadcast %cst_20 : f32 to vector<8x1xf32>
    %49 = arith.divf %47, %48 : vector<8x1xf32>
    %50 = vector.broadcast %42 : vector<8x1xf32> to vector<8x128xf32>
    %51 = arith.subf %38, %50 : vector<8x128xf32>
    %cst_21 = arith.constant 9.99999996E-13 : f32
    %52 = vector.broadcast %cst_21 : f32 to vector<8x1xf32>
    %53 = arith.addf %49, %52 : vector<8x1xf32>
    %54 = math.rsqrt %53 : vector<8x1xf32>
    %55 = vector.broadcast %54 : vector<8x1xf32> to vector<8x128xf32>
    %56 = arith.mulf %51, %55 : vector<8x128xf32>
    %57 = vector.broadcast %7 : vector<1x128xf32> to vector<8x128xf32>
    %58 = arith.mulf %56, %57 : vector<8x128xf32>
    %59 = vector.broadcast %9 : vector<1x128xf32> to vector<8x128xf32>
    %60 = arith.addf %58, %59 : vector<8x128xf32>
    %61 = vector.shape_cast %35 : vector<8x8x128xbf16> to vector<64x128xbf16>
    %c0_22 = arith.constant 0 : index
    %c0_23 = arith.constant 0 : index
    %c0_24 = arith.constant 0 : index
    %62 = vector.load %arg6[%c0_22, %c0_23, %c0_24] : memref<1x128x256xbf16, #tpu.memory_space<vmem>>, vector<1x128x256xbf16>
    %63 = vector.shape_cast %62 : vector<1x128x256xbf16> to vector<128x256xbf16>
    %cst_25 = arith.constant dense<0.000000e+00> : vector<64x256xf32>
    %64 = tpu.matmul %61, %63, %cst_25 {dimension_numbers = #tpu.dot_dimension_numbers<[1], [0], [0], [1], [0, 0, 1, 1], [], []>} : vector<64x128xbf16>, vector<128x256xbf16>, vector<64x256xf32> -> vector<64x256xf32>
    %c0_26 = arith.constant 0 : index
    %c0_27 = arith.constant 0 : index
    %c0_28 = arith.constant 0 : index
    %65 = vector.load %arg7[%c0_26, %c0_27, %c0_28] : memref<1x1x256xf32, #tpu.memory_space<vmem>>, vector<1x1x256xf32>
    %66 = vector.shape_cast %65 : vector<1x1x256xf32> to vector<1x256xf32>
    %67 = vector.broadcast %66 : vector<1x256xf32> to vector<64x256xf32>
    %68 = arith.addf %64, %67 : vector<64x256xf32>
    %69 = arith.truncf %68 : vector<64x256xf32> to vector<64x256xbf16>
    %70 = vector.shape_cast %69 : vector<64x256xbf16> to vector<8x8x256xbf16>
    %71 = vector.extract_strided_slice %70 {offsets = [0, 0, 0], sizes = [8, 8, 128], strides = [1, 1, 1]} : vector<8x8x256xbf16> to vector<8x8x128xbf16>
    %72 = vector.extract_strided_slice %70 {offsets = [0, 0, 128], sizes = [8, 8, 128], strides = [1, 1, 1]} : vector<8x8x256xbf16> to vector<8x8x128xbf16>
    %73 = arith.truncf %60 : vector<8x128xf32> to vector<8x128xbf16>
    %c0_29 = arith.constant 0 : index
    %c0_30 = arith.constant 0 : index
    %c0_31 = arith.constant 0 : index
    %74 = vector.load %arg8[%c0_29, %c0_30, %c0_31] : memref<1x128x128xbf16, #tpu.memory_space<vmem>>, vector<1x128x128xbf16>
    %75 = vector.shape_cast %74 : vector<1x128x128xbf16> to vector<128x128xbf16>
    %cst_32 = arith.constant dense<0.000000e+00> : vector<8x128xf32>
    %76 = tpu.matmul %73, %75, %cst_32 {dimension_numbers = #tpu.dot_dimension_numbers<[1], [0], [0], [1], [0, 0, 1, 1], [], []>} : vector<8x128xbf16>, vector<128x128xbf16>, vector<8x128xf32> -> vector<8x128xf32>
    %c0_33 = arith.constant 0 : index
    %c0_34 = arith.constant 0 : index
    %c0_35 = arith.constant 0 : index
    %77 = vector.load %arg9[%c0_33, %c0_34, %c0_35] : memref<1x1x128xf32, #tpu.memory_space<vmem>>, vector<1x1x128xf32>
    %78 = vector.shape_cast %77 : vector<1x1x128xf32> to vector<1x128xf32>
    %79 = vector.broadcast %78 : vector<1x128xf32> to vector<8x128xf32>
    %80 = arith.addf %76, %79 : vector<8x128xf32>
    %cst_36 = arith.constant 1.280000e+02 : f32
    %81 = math.sqrt %cst_36 : f32
    %cst_37 = arith.constant 1.000000e+00 : f32
    %82 = arith.divf %cst_37, %81 : f32
    %83 = vector.shape_cast %80 : vector<8x128xf32> to vector<8x1x128xf32>
    %84 = arith.extf %71 : vector<8x8x128xbf16> to vector<8x8x128xf32>
    %85 = vector.broadcast %83 : vector<8x1x128xf32> to vector<8x8x128xf32>
    %86 = arith.mulf %85, %84 : vector<8x8x128xf32>
    %cst_38 = arith.constant dense<0.000000e+00> : vector<8x8xf32>
    %87 = vector.multi_reduction <add>, %86, %cst_38 [2] : vector<8x8x128xf32> to vector<8x8xf32>
    %88 = vector.broadcast %82 : f32 to vector<8x8xf32>
    %89 = arith.mulf %87, %88 : vector<8x8xf32>
    %90 = arith.addf %89, %5 : vector<8x8xf32>
    %cst_39 = arith.constant dense<0xFF800000> : vector<8xf32>
    %91 = vector.multi_reduction <maximumf>, %90, %cst_39 [1] : vector<8x8xf32> to vector<8xf32>
    %92 = vector.shape_cast %91 : vector<8xf32> to vector<8x1xf32>
    %93 = vector.broadcast %92 : vector<8x1xf32> to vector<8x8xf32>
    %94 = arith.subf %90, %93 : vector<8x8xf32>
    %95 = math.exp %94 : vector<8x8xf32>
    %cst_40 = arith.constant dense<0.000000e+00> : vector<8xf32>
    %96 = vector.multi_reduction <add>, %95, %cst_40 [1] : vector<8x8xf32> to vector<8xf32>
    %97 = vector.shape_cast %96 : vector<8xf32> to vector<8x1xf32>
    %98 = tpu.reciprocal %97 {approx = true} : vector<8x1xf32> -> vector<8x1xf32>
    %99 = vector.broadcast %98 : vector<8x1xf32> to vector<8x8xf32>
    %100 = arith.mulf %95, %99 : vector<8x8xf32>
    %101 = vector.shape_cast %100 : vector<8x8xf32> to vector<8x8x1xf32>
    %102 = arith.extf %72 : vector<8x8x128xbf16> to vector<8x8x128xf32>
    %103 = vector.broadcast %101 : vector<8x8x1xf32> to vector<8x8x128xf32>
    %104 = arith.mulf %103, %102 : vector<8x8x128xf32>
    %cst_41 = arith.constant dense<0.000000e+00> : vector<8x128xf32>
    %105 = vector.multi_reduction <add>, %104, %cst_41 [1] : vector<8x8x128xf32> to vector<8x128xf32>
    %106 = arith.truncf %105 : vector<8x128xf32> to vector<8x128xbf16>
    %c0_42 = arith.constant 0 : index
    %c0_43 = arith.constant 0 : index
    %c0_44 = arith.constant 0 : index
    %107 = vector.load %arg10[%c0_42, %c0_43, %c0_44] : memref<1x128x128xbf16, #tpu.memory_space<vmem>>, vector<1x128x128xbf16>
    %108 = vector.shape_cast %107 : vector<1x128x128xbf16> to vector<128x128xbf16>
    %cst_45 = arith.constant dense<0.000000e+00> : vector<8x128xf32>
    %109 = tpu.matmul %106, %108, %cst_45 {dimension_numbers = #tpu.dot_dimension_numbers<[1], [0], [0], [1], [0, 0, 1, 1], [], []>} : vector<8x128xbf16>, vector<128x128xbf16>, vector<8x128xf32> -> vector<8x128xf32>
    %c0_46 = arith.constant 0 : index
    %c0_47 = arith.constant 0 : index
    %c0_48 = arith.constant 0 : index
    %110 = vector.load %arg11[%c0_46, %c0_47, %c0_48] : memref<1x1x128xf32, #tpu.memory_space<vmem>>, vector<1x1x128xf32>
    %111 = vector.shape_cast %110 : vector<1x1x128xf32> to vector<1x128xf32>
    %112 = vector.broadcast %111 : vector<1x128xf32> to vector<8x128xf32>
    %113 = arith.addf %109, %112 : vector<8x128xf32>
    %114 = arith.addf %60, %113 : vector<8x128xf32>
    %c0_49 = arith.constant 0 : index
    %c0_50 = arith.constant 0 : index
    %c0_51 = arith.constant 0 : index
    %115 = vector.load %arg12[%c0_49, %c0_50, %c0_51] : memref<1x1x128xf32, #tpu.memory_space<vmem>>, vector<1x1x128xf32>
    %116 = vector.shape_cast %115 : vector<1x1x128xf32> to vector<1x128xf32>
    %c0_52 = arith.constant 0 : index
    %c0_53 = arith.constant 0 : index
    %c0_54 = arith.constant 0 : index
    %117 = vector.load %arg13[%c0_52, %c0_53, %c0_54] : memref<1x1x128xf32, #tpu.memory_space<vmem>>, vector<1x1x128xf32>
    %118 = vector.shape_cast %117 : vector<1x1x128xf32> to vector<1x128xf32>
    %cst_55 = arith.constant dense<0.000000e+00> : vector<8xf32>
    %119 = vector.multi_reduction <add>, %114, %cst_55 [1] : vector<8x128xf32> to vector<8xf32>
    %120 = vector.shape_cast %119 : vector<8xf32> to vector<8x1xf32>
    %cst_56 = arith.constant 1.280000e+02 : f32
    %121 = vector.broadcast %cst_56 : f32 to vector<8x1xf32>
    %122 = arith.divf %120, %121 : vector<8x1xf32>
    %123 = vector.broadcast %122 : vector<8x1xf32> to vector<8x128xf32>
    %124 = arith.subf %114, %123 : vector<8x128xf32>
    %125 = arith.mulf %124, %124 : vector<8x128xf32>
    %cst_57 = arith.constant dense<0.000000e+00> : vector<8xf32>
    %126 = vector.multi_reduction <add>, %125, %cst_57 [1] : vector<8x128xf32> to vector<8xf32>
    %127 = vector.shape_cast %126 : vector<8xf32> to vector<8x1xf32>
    %cst_58 = arith.constant 1.280000e+02 : f32
    %128 = vector.broadcast %cst_58 : f32 to vector<8x1xf32>
    %129 = arith.divf %127, %128 : vector<8x1xf32>
    %130 = vector.broadcast %122 : vector<8x1xf32> to vector<8x128xf32>
    %131 = arith.subf %114, %130 : vector<8x128xf32>
    %cst_59 = arith.constant 9.99999996E-13 : f32
    %132 = vector.broadcast %cst_59 : f32 to vector<8x1xf32>
    %133 = arith.addf %129, %132 : vector<8x1xf32>
    %134 = math.rsqrt %133 : vector<8x1xf32>
    %135 = vector.broadcast %134 : vector<8x1xf32> to vector<8x128xf32>
    %136 = arith.mulf %131, %135 : vector<8x128xf32>
    %137 = vector.broadcast %116 : vector<1x128xf32> to vector<8x128xf32>
    %138 = arith.mulf %136, %137 : vector<8x128xf32>
    %139 = vector.broadcast %118 : vector<1x128xf32> to vector<8x128xf32>
    %140 = arith.addf %138, %139 : vector<8x128xf32>
    %141 = arith.truncf %140 : vector<8x128xf32> to vector<8x128xbf16>
    %c0_60 = arith.constant 0 : index
    %c0_61 = arith.constant 0 : index
    %c0_62 = arith.constant 0 : index
    %142 = vector.load %arg14[%c0_60, %c0_61, %c0_62] : memref<1x128x256xbf16, #tpu.memory_space<vmem>>, vector<1x128x256xbf16>
    %143 = vector.shape_cast %142 : vector<1x128x256xbf16> to vector<128x256xbf16>
    %cst_63 = arith.constant dense<0.000000e+00> : vector<8x256xf32>
    %144 = tpu.matmul %141, %143, %cst_63 {dimension_numbers = #tpu.dot_dimension_numbers<[1], [0], [0], [1], [0, 0, 1, 1], [], []>} : vector<8x128xbf16>, vector<128x256xbf16>, vector<8x256xf32> -> vector<8x256xf32>
    %c0_64 = arith.constant 0 : index
    %c0_65 = arith.constant 0 : index
    %c0_66 = arith.constant 0 : index
    %145 = vector.load %arg15[%c0_64, %c0_65, %c0_66] : memref<1x1x256xf32, #tpu.memory_space<vmem>>, vector<1x1x256xf32>
    %146 = vector.shape_cast %145 : vector<1x1x256xf32> to vector<1x256xf32>
    %147 = vector.broadcast %146 : vector<1x256xf32> to vector<8x256xf32>
    %148 = arith.addf %144, %147 : vector<8x256xf32>
    %cst_67 = arith.constant 5.000000e-01 : f32
    %149 = vector.broadcast %cst_67 : f32 to vector<8x256xf32>
    %150 = arith.mulf %149, %148 : vector<8x256xf32>
    %cst_68 = arith.constant 4.471500e-02 : f32
    %151 = vector.broadcast %cst_68 : f32 to vector<8x256xf32>
    %152 = arith.mulf %151, %148 : vector<8x256xf32>
    %153 = arith.mulf %152, %148 : vector<8x256xf32>
    %154 = arith.mulf %153, %148 : vector<8x256xf32>
    %155 = arith.addf %148, %154 : vector<8x256xf32>
    %cst_69 = arith.constant 0.797884583 : f32
    %156 = vector.broadcast %cst_69 : f32 to vector<8x256xf32>
    %157 = arith.mulf %156, %155 : vector<8x256xf32>
    %158 = math.tanh %157 : vector<8x256xf32>
    %cst_70 = arith.constant 1.000000e+00 : f32
    %159 = vector.broadcast %cst_70 : f32 to vector<8x256xf32>
    %160 = arith.addf %159, %158 : vector<8x256xf32>
    %161 = arith.mulf %150, %160 : vector<8x256xf32>
    %162 = arith.truncf %161 : vector<8x256xf32> to vector<8x256xbf16>
    %c0_71 = arith.constant 0 : index
    %c0_72 = arith.constant 0 : index
    %c0_73 = arith.constant 0 : index
    %163 = vector.load %arg16[%c0_71, %c0_72, %c0_73] : memref<1x256x128xbf16, #tpu.memory_space<vmem>>, vector<1x256x128xbf16>
    %164 = vector.shape_cast %163 : vector<1x256x128xbf16> to vector<256x128xbf16>
    %cst_74 = arith.constant dense<0.000000e+00> : vector<8x128xf32>
    %165 = tpu.matmul %162, %164, %cst_74 {dimension_numbers = #tpu.dot_dimension_numbers<[1], [0], [0], [1], [0, 0, 1, 1], [], []>} : vector<8x256xbf16>, vector<256x128xbf16>, vector<8x128xf32> -> vector<8x128xf32>
    %c0_75 = arith.constant 0 : index
    %c0_76 = arith.constant 0 : index
    %c0_77 = arith.constant 0 : index
    %166 = vector.load %arg17[%c0_75, %c0_76, %c0_77] : memref<1x1x128xf32, #tpu.memory_space<vmem>>, vector<1x1x128xf32>
    %167 = vector.shape_cast %166 : vector<1x1x128xf32> to vector<1x128xf32>
    %168 = vector.broadcast %167 : vector<1x128xf32> to vector<8x128xf32>
    %169 = arith.addf %165, %168 : vector<8x128xf32>
    %170 = arith.addf %140, %169 : vector<8x128xf32>
    %c0_78 = arith.constant 0 : index
    %c0_79 = arith.constant 0 : index
    %c0_80 = arith.constant 0 : index
    %171 = vector.load %arg18[%c0_78, %c0_79, %c0_80] : memref<1x1x128xf32, #tpu.memory_space<vmem>>, vector<1x1x128xf32>
    %172 = vector.shape_cast %171 : vector<1x1x128xf32> to vector<1x128xf32>
    %c0_81 = arith.constant 0 : index
    %c0_82 = arith.constant 0 : index
    %c0_83 = arith.constant 0 : index
    %173 = vector.load %arg19[%c0_81, %c0_82, %c0_83] : memref<1x1x128xf32, #tpu.memory_space<vmem>>, vector<1x1x128xf32>
    %174 = vector.shape_cast %173 : vector<1x1x128xf32> to vector<1x128xf32>
    %cst_84 = arith.constant dense<0.000000e+00> : vector<8xf32>
    %175 = vector.multi_reduction <add>, %170, %cst_84 [1] : vector<8x128xf32> to vector<8xf32>
    %176 = vector.shape_cast %175 : vector<8xf32> to vector<8x1xf32>
    %cst_85 = arith.constant 1.280000e+02 : f32
    %177 = vector.broadcast %cst_85 : f32 to vector<8x1xf32>
    %178 = arith.divf %176, %177 : vector<8x1xf32>
    %179 = vector.broadcast %178 : vector<8x1xf32> to vector<8x128xf32>
    %180 = arith.subf %170, %179 : vector<8x128xf32>
    %181 = arith.mulf %180, %180 : vector<8x128xf32>
    %cst_86 = arith.constant dense<0.000000e+00> : vector<8xf32>
    %182 = vector.multi_reduction <add>, %181, %cst_86 [1] : vector<8x128xf32> to vector<8xf32>
    %183 = vector.shape_cast %182 : vector<8xf32> to vector<8x1xf32>
    %cst_87 = arith.constant 1.280000e+02 : f32
    %184 = vector.broadcast %cst_87 : f32 to vector<8x1xf32>
    %185 = arith.divf %183, %184 : vector<8x1xf32>
    %186 = vector.broadcast %178 : vector<8x1xf32> to vector<8x128xf32>
    %187 = arith.subf %170, %186 : vector<8x128xf32>
    %cst_88 = arith.constant 9.99999996E-13 : f32
    %188 = vector.broadcast %cst_88 : f32 to vector<8x1xf32>
    %189 = arith.addf %185, %188 : vector<8x1xf32>
    %190 = math.rsqrt %189 : vector<8x1xf32>
    %191 = vector.broadcast %190 : vector<8x1xf32> to vector<8x128xf32>
    %192 = arith.mulf %187, %191 : vector<8x128xf32>
    %193 = vector.broadcast %172 : vector<1x128xf32> to vector<8x128xf32>
    %194 = arith.mulf %192, %193 : vector<8x128xf32>
    %195 = vector.broadcast %174 : vector<1x128xf32> to vector<8x128xf32>
    %196 = arith.addf %194, %195 : vector<8x128xf32>
    %197 = arith.truncf %196 : vector<8x128xf32> to vector<8x128xbf16>
    %c0_89 = arith.constant 0 : index
    %c0_90 = arith.constant 0 : index
    %c0_91 = arith.constant 0 : index
    %198 = vector.load %arg20[%c0_89, %c0_90, %c0_91] : memref<1x128x128xbf16, #tpu.memory_space<vmem>>, vector<1x128x128xbf16>
    %199 = vector.shape_cast %198 : vector<1x128x128xbf16> to vector<128x128xbf16>
    %cst_92 = arith.constant dense<0.000000e+00> : vector<8x128xf32>
    %200 = tpu.matmul %197, %199, %cst_92 {dimension_numbers = #tpu.dot_dimension_numbers<[1], [0], [0], [1], [0, 0, 1, 1], [], []>} : vector<8x128xbf16>, vector<128x128xbf16>, vector<8x128xf32> -> vector<8x128xf32>
    %c0_93 = arith.constant 0 : index
    %c0_94 = arith.constant 0 : index
    %c0_95 = arith.constant 0 : index
    %201 = vector.load %arg21[%c0_93, %c0_94, %c0_95] : memref<1x1x128xf32, #tpu.memory_space<vmem>>, vector<1x1x128xf32>
    %202 = vector.shape_cast %201 : vector<1x1x128xf32> to vector<1x128xf32>
    %203 = vector.broadcast %202 : vector<1x128xf32> to vector<8x128xf32>
    %204 = arith.addf %200, %203 : vector<8x128xf32>
    %205 = math.tanh %204 : vector<8x128xf32>
    %c0_96 = arith.constant 0 : index
    %c0_97 = arith.constant 0 : index
    %c0_98 = arith.constant 0 : index
    %206 = vector.load %arg22[%c0_96, %c0_97, %c0_98] : memref<1x8x128xf32, #tpu.memory_space<vmem>>, vector<1x8x128xf32>
    %207 = vector.shape_cast %206 : vector<1x8x128xf32> to vector<8x128xf32>
    %208 = vector.shape_cast %205 : vector<8x128xf32> to vector<1x8x128xf32>
    tpu.vector_store %arg22[%c0_96, %c0_97, %c0_98], %208 {strides = array<i32>} : memref<1x8x128xf32, #tpu.memory_space<vmem>>, vector<1x8x128xf32>,
    return
  }
  func.func @transform_0(%arg0: i32, %arg1: i32) -> (i32, i32, i32, i32) {
    %c0_i32 = arith.constant 0 : i32
    %c0_i32_0 = arith.constant 0 : i32
    %c0_i32_1 = arith.constant 0 : i32
    return %arg0, %arg1, %c0_i32, %c0_i32_0 : i32, i32, i32, i32
  }
  func.func @transform_1(%arg0: i32, %arg1: i32) -> (i32, i32, i32, i32) {
    %c0_i32 = arith.constant 0 : i32
    %c0_i32_0 = arith.constant 0 : i32
    %c0_i32_1 = arith.constant 0 : i32
    return %arg0, %arg1, %c0_i32, %c0_i32_0 : i32, i32, i32, i32
  }
  func.func @transform_2(%arg0: i32, %arg1: i32) -> (i32, i32, i32) {
    %c0_i32 = arith.constant 0 : i32
    %c0_i32_0 = arith.constant 0 : i32
    %c0_i32_1 = arith.constant 0 : i32
    return %arg0, %c0_i32, %c0_i32_0 : i32, i32, i32
  }
  func.func @transform_3(%arg0: i32, %arg1: i32) -> (i32, i32, i32) {
    %c0_i32 = arith.constant 0 : i32
    %c0_i32_0 = arith.constant 0 : i32
    %c0_i32_1 = arith.constant 0 : i32
    return %arg0, %c0_i32, %c0_i32_0 : i32, i32, i32
  }
  func.func @transform_4(%arg0: i32, %arg1: i32) -> (i32, i32, i32) {
    %c0_i32 = arith.constant 0 : i32
    %c0_i32_0 = arith.constant 0 : i32
    %c0_i32_1 = arith.constant 0 : i32
    return %arg0, %c0_i32, %c0_i32_0 : i32, i32, i32
  }
  func.func @transform_5(%arg0: i32, %arg1: i32) -> (i32, i32, i32) {
    %c0_i32 = arith.constant 0 : i32
    %c0_i32_0 = arith.constant 0 : i32
    %c0_i32_1 = arith.constant 0 : i32
    return %arg0, %c0_i32, %c0_i32_0 : i32, i32, i32
  }
  func.func @transform_6(%arg0: i32, %arg1: i32) -> (i32, i32, i32) {
    %c0_i32 = arith.constant 0 : i32
    %c0_i32_0 = arith.constant 0 : i32
    %c0_i32_1 = arith.constant 0 : i32
    return %arg0, %c0_i32, %c0_i32_0 : i32, i32, i32
  }
  func.func @transform_7(%arg0: i32, %arg1: i32) -> (i32, i32, i32) {
    %c0_i32 = arith.constant 0 : i32
    %c0_i32_0 = arith.constant 0 : i32
    %c0_i32_1 = arith.constant 0 : i32
    return %arg0, %c0_i32, %c0_i32_0 : i32, i32, i32
  }
  func.func @transform_8(%arg0: i32, %arg1: i32) -> (i32, i32, i32) {
    %c0_i32 = arith.constant 0 : i32
    %c0_i32_0 = arith.constant 0 : i32
    %c0_i32_1 = arith.constant 0 : i32
    return %arg0, %c0_i32, %c0_i32_0 : i32, i32, i32
  }
  func.func @transform_9(%arg0: i32, %arg1: i32) -> (i32, i32, i32) {
    %c0_i32 = arith.constant 0 : i32
    %c0_i32_0 = arith.constant 0 : i32
    %c0_i32_1 = arith.constant 0 : i32
    return %arg0, %c0_i32, %c0_i32_0 : i32, i32, i32
  }
  func.func @transform_10(%arg0: i32, %arg1: i32) -> (i32, i32, i32) {
    %c0_i32 = arith.constant 0 : i32
    %c0_i32_0 = arith.constant 0 : i32
    %c0_i32_1 = arith.constant 0 : i32
    return %arg0, %c0_i32, %c0_i32_0 : i32, i32, i32
  }
  func.func @transform_11(%arg0: i32, %arg1: i32) -> (i32, i32, i32) {
    %c0_i32 = arith.constant 0 : i32
    %c0_i32_0 = arith.constant 0 : i32
    %c0_i32_1 = arith.constant 0 : i32
    return %arg0, %c0_i32, %c0_i32_0 : i32, i32, i32
  }
  func.func @transform_12(%arg0: i32, %arg1: i32) -> (i32, i32, i32) {
    %c0_i32 = arith.constant 0 : i32
    %c0_i32_0 = arith.constant 0 : i32
    %c0_i32_1 = arith.constant 0 : i32
    return %arg0, %c0_i32, %c0_i32_0 : i32, i32, i32
  }
  func.func @transform_13(%arg0: i32, %arg1: i32) -> (i32, i32, i32) {
    %c0_i32 = arith.constant 0 : i32
    %c0_i32_0 = arith.constant 0 : i32
    %c0_i32_1 = arith.constant 0 : i32
    return %arg0, %c0_i32, %c0_i32_0 : i32, i32, i32
  }
  func.func @transform_14(%arg0: i32, %arg1: i32) -> (i32, i32, i32) {
    %c0_i32 = arith.constant 0 : i32
    %c0_i32_0 = arith.constant 0 : i32
    %c0_i32_1 = arith.constant 0 : i32
    return %arg0, %c0_i32, %c0_i32_0 : i32, i32, i32
  }
  func.func @transform_15(%arg0: i32, %arg1: i32) -> (i32, i32, i32) {
    %c0_i32 = arith.constant 0 : i32
    %c0_i32_0 = arith.constant 0 : i32
    %c0_i32_1 = arith.constant 0 : i32
    return %arg0, %c0_i32, %c0_i32_0 : i32, i32, i32
  }
  func.func @transform_16(%arg0: i32, %arg1: i32) -> (i32, i32, i32) {
    %c0_i32 = arith.constant 0 : i32
    %c0_i32_0 = arith.constant 0 : i32
    %c0_i32_1 = arith.constant 0 : i32
    return %arg0, %c0_i32, %c0_i32_0 : i32, i32, i32
  }
  func.func @transform_17(%arg0: i32, %arg1: i32) -> (i32, i32, i32) {
    %c0_i32 = arith.constant 0 : i32
    %c0_i32_0 = arith.constant 0 : i32
    %c0_i32_1 = arith.constant 0 : i32
    return %arg0, %c0_i32, %c0_i32_0 : i32, i32, i32
  }
  func.func @transform_18(%arg0: i32, %arg1: i32) -> (i32, i32, i32) {
    %c0_i32 = arith.constant 0 : i32
    %c0_i32_0 = arith.constant 0 : i32
    %c0_i32_1 = arith.constant 0 : i32
    return %arg0, %c0_i32, %c0_i32_0 : i32, i32, i32
  }
  func.func @transform_19(%arg0: i32, %arg1: i32) -> (i32, i32, i32) {
    %c0_i32 = arith.constant 0 : i32
    %c0_i32_0 = arith.constant 0 : i32
    %c0_i32_1 = arith.constant 0 : i32
    return %arg0, %c0_i32, %c0_i32_0 : i32, i32, i32
  }
  func.func @transform_20(%arg0: i32, %arg1: i32) -> (i32, i32, i32) {
    %c0_i32 = arith.constant 0 : i32
    %c0_i32_0 = arith.constant 0 : i32
    return %arg0, %arg1, %c0_i32 : i32, i32, i32
  }
}

module attributes {stable_mosaic.version = 11 : i64} {
  func.func @encoder_kernel(%arg0: i32, %arg1: i32, %arg2: memref<1x8x8x128xbf16, #tpu.memory_space<vmem>>, %arg3: memref<1x8x1x8xbf16, #tpu.memory_space<vmem>>, %arg4: memref<1x1x128xf32, #tpu.memory_space<vmem>>, %arg5: memref<1x1x128xf32, #tpu.memory_space<vmem>>, %arg6: memref<1x128x256xbf16, #tpu.memory_space<vmem>>, %arg7: memref<1x1x256xf32, #tpu.memory_space<vmem>>, %arg8: memref<1x128x128xbf16, #tpu.memory_space<vmem>>, %arg9: memref<1x1x128xf32, #tpu.memory_space<vmem>>, %arg10: memref<1x128x128xbf16, #tpu.memory_space<vmem>>, %arg11: memref<1x1x128xf32, #tpu.memory_space<vmem>>, %arg12: memref<1x1x128xf32, #tpu.memory_space<vmem>>, %arg13: memref<1x1x128xf32, #tpu.memory_space<vmem>>, %arg14: memref<1x128x256xbf16, #tpu.memory_space<vmem>>, %arg15: memref<1x1x256xf32, #tpu.memory_space<vmem>>, %arg16: memref<1x256x128xbf16, #tpu.memory_space<vmem>>, %arg17: memref<1x1x128xf32, #tpu.memory_space<vmem>>, %arg18: memref<1x1x128xf32, #tpu.memory_space<vmem>>, %arg19: memref<1x1x128xf32, #tpu.memory_space<vmem>>, %arg20: memref<1x128x128xbf16, #tpu.memory_space<vmem>>, %arg21: memref<1x1x128xf32, #tpu.memory_space<vmem>>, %arg22: memref<1x8x128xf32, #tpu.memory_space<vmem>>) attributes {dimension_semantics = [#tpu.dimension_semantics<parallel>, #tpu.dimension_semantics<parallel>], iteration_bounds = array<i64: 2, 1>, scalar_prefetch = 0 : i64, scratch_operands = 0 : i64, tpu.core_type = #tpu.core_type<tc>, window_params = [{transform_indices = @transform_0, window_bounds = array<i64: 1, 8, 8, 128>}, {transform_indices = @transform_1, window_bounds = array<i64: 1, 8, 1, 8>}, {transform_indices = @transform_2, window_bounds = array<i64: 1, 1, 128>}, {transform_indices = @transform_3, window_bounds = array<i64: 1, 1, 128>}, {transform_indices = @transform_4, window_bounds = array<i64: 1, 128, 256>}, {transform_indices = @transform_5, window_bounds = array<i64: 1, 1, 256>}, {transform_indices = @transform_6, window_bounds = array<i64: 1, 128, 128>}, {transform_indices = @transform_7, window_bounds = array<i64: 1, 1, 128>}, {transform_indices = @transform_8, window_bounds = array<i64: 1, 128, 128>}, {transform_indices = @transform_9, window_bounds = array<i64: 1, 1, 128>}, {transform_indices = @transform_10, window_bounds = array<i64: 1, 1, 128>}, {transform_indices = @transform_11, window_bounds = array<i64: 1, 1, 128>}, {transform_indices = @transform_12, window_bounds = array<i64: 1, 128, 256>}, {transform_indices = @transform_13, window_bounds = array<i64: 1, 1, 256>}, {transform_indices = @transform_14, window_bounds = array<i64: 1, 256, 128>}, {transform_indices = @transform_15, window_bounds = array<i64: 1, 1, 128>}, {transform_indices = @transform_16, window_bounds = array<i64: 1, 1, 128>}, {transform_indices = @transform_17, window_bounds = array<i64: 1, 1, 128>}, {transform_indices = @transform_18, window_bounds = array<i64: 1, 128, 128>}, {transform_indices = @transform_19, window_bounds = array<i64: 1, 1, 128>}, {transform_indices = @transform_20, window_bounds = array<i64: 1, 8, 128>}]} {
    %c0 = arith.constant 0 : index
    %c0_0 = arith.constant 0 : index
    %c0_1 = arith.constant 0 : index
    %c0_2 = arith.constant 0 : index
    %0 = vector.load %arg2[%c0, %c0_0, %c0_1, %c0_2] : memref<1x8x8x128xbf16, #tpu.memory_space<vmem>>, vector<1x8x8x128xbf16>
    %1 = vector.shape_cast %0 : vector<1x8x8x128xbf16> to vector<8x8x128xbf16>
    %c0_3 = arith.constant 0 : index
    %c0_4 = arith.constant 0 : index
    %c0_5 = arith.constant 0 : index
    %c0_6 = arith.constant 0 : index
    %2 = vector.load %arg3[%c0_3, %c0_4, %c0_5, %c0_6] : memref<1x8x1x8xbf16, #tpu.memory_space<vmem>>, vector<1x8x1x8xbf16>
    %3 = vector.shape_cast %2 : vector<1x8x1x8xbf16> to vector<8x1x8xbf16>
    %4 = vector.shape_cast %3 : vector<8x1x8xbf16> to vector<8x8xbf16>
    %5 = arith.extf %4 : vector<8x8xbf16> to vector<8x8xf32>
    %c0_7 = arith.constant 0 : index
    %c0_8 = arith.constant 0 : index
    %c0_9 = arith.constant 0 : index
    %6 = vector.load %arg4[%c0_7, %c0_8, %c0_9] : memref<1x1x128xf32, #tpu.memory_space<vmem>>, vector<1x1x128xf32>
    %7 = vector.shape_cast %6 : vector<1x1x128xf32> to vector<1x128xf32>
    %c0_10 = arith.constant 0 : index
    %c0_11 = arith.constant 0 : index
    %c0_12 = arith.constant 0 : index
    %8 = vector.load %arg5[%c0_10, %c0_11, %c0_12] : memref<1x1x128xf32, #tpu.memory_space<vmem>>, vector<1x1x128xf32>
    %9 = vector.shape_cast %8 : vector<1x1x128xf32> to vector<1x128xf32>
    %10 = arith.extf %1 : vector<8x8x128xbf16> to vector<8x8x128xf32>
    %cst = arith.constant dense<0.000000e+00> : vector<8x8xf32>
    %11 = vector.multi_reduction <add>, %10, %cst [2] : vector<8x8x128xf32> to vector<8x8xf32>
    %12 = vector.shape_cast %11 : vector<8x8xf32> to vector<8x8x1xf32>
    %cst_13 = arith.constant 1.280000e+02 : f32
    %13 = vector.broadcast %cst_13 : f32 to vector<8x8x1xf32>
    %14 = arith.divf %12, %13 : vector<8x8x1xf32>
    %15 = vector.broadcast %14 : vector<8x8x1xf32> to vector<8x8x128xf32>
    %16 = arith.subf %10, %15 : vector<8x8x128xf32>
    %17 = arith.mulf %16, %16 : vector<8x8x128xf32>
    %cst_14 = arith.constant dense<0.000000e+00> : vector<8x8xf32>
    %18 = vector.multi_reduction <add>, %17, %cst_14 [2] : vector<8x8x128xf32> to vector<8x8xf32>
    %19 = vector.shape_cast %18 : vector<8x8xf32> to vector<8x8x1xf32>
    %cst_15 = arith.constant 1.280000e+02 : f32
    %20 = vector.broadcast %cst_15 : f32 to vector<8x8x1xf32>
    %21 = arith.divf %19, %20 : vector<8x8x1xf32>
    %22 = vector.broadcast %14 : vector<8x8x1xf32> to vector<8x8x128xf32>
    %23 = arith.subf %10, %22 : vector<8x8x128xf32>
    %cst_16 = arith.constant 9.99999996E-13 : f32
    %24 = vector.broadcast %cst_16 : f32 to vector<8x8x1xf32>
    %25 = arith.addf %21, %24 : vector<8x8x1xf32>
    %26 = math.rsqrt %25 : vector<8x8x1xf32>
    %27 = vector.broadcast %26 : vector<8x8x1xf32> to vector<8x8x128xf32>
    %28 = arith.mulf %23, %27 : vector<8x8x128xf32>
    %29 = vector.shape_cast %7 : vector<1x128xf32> to vector<1x1x128xf32>
    %30 = vector.broadcast %29 : vector<1x1x128xf32> to vector<8x8x128xf32>
    %31 = arith.mulf %28, %30 : vector<8x8x128xf32>
    %32 = vector.shape_cast %9 : vector<1x128xf32> to vector<1x1x128xf32>
    %33 = vector.broadcast %32 : vector<1x1x128xf32> to vector<8x8x128xf32>
    %34 = arith.addf %31, %33 : vector<8x8x128xf32>
    %35 = arith.truncf %34 : vector<8x8x128xf32> to vector<8x8x128xbf16>
    %36 = vector.extract_strided_slice %1 {offsets = [0, 0, 0], sizes = [8, 1, 128], strides = [1, 1, 1]} : vector<8x8x128xbf16> to vector<8x1x128xbf16>
    %37 = vector.shape_cast %36 : vector<8x1x128xbf16> to vector<8x128xbf16>
    %38 = arith.extf %37 : vector<8x128xbf16> to vector<8x128xf32>
    %cst_17 = arith.constant dense<0.000000e+00> : vector<8xf32>
    %39 = vector.multi_reduction <add>, %38, %cst_17 [1] : vector<8x128xf32> to vector<8xf32>
    %40 = vector.shape_cast %39 : vector<8xf32> to vector<8x1xf32>
    %cst_18 = arith.constant 1.280000e+02 : f32
    %41 = vector.broadcast %cst_18 : f32 to vector<8x1xf32>
    %42 = arith.divf %40, %41 : vector<8x1xf32>
    %43 = vector.broadcast %42 : vector<8x1xf32> to vector<8x128xf32>
    %44 = arith.subf %38, %43 : vector<8x128xf32>
    %45 = arith.mulf %44, %44 : vector<8x128xf32>
    %cst_19 = arith.constant dense<0.000000e+00> : vector<8xf32>
    %46 = vector.multi_reduction <add>, %45, %cst_19 [1] : vector<8x128xf32> to vector<8xf32>
    %47 = vector.shape_cast %46 : vector<8xf32> to vector<8x1xf32>
    %cst_20 = arith.constant 1.280000e+02 : f32
    %48 = vector.broadcast %cst_20 : f32 to vector<8x1xf32>
    %49 = arith.divf %47, %48 : vector<8x1xf32>
    %50 = vector.broadcast %42 : vector<8x1xf32> to vector<8x128xf32>
    %51 = arith.subf %38, %50 : vector<8x128xf32>
    %cst_21 = arith.constant 9.99999996E-13 : f32
    %52 = vector.broadcast %cst_21 : f32 to vector<8x1xf32>
    %53 = arith.addf %49, %52 : vector<8x1xf32>
    %54 = math.rsqrt %53 : vector<8x1xf32>
    %55 = vector.broadcast %54 : vector<8x1xf32> to vector<8x128xf32>
    %56 = arith.mulf %51, %55 : vector<8x128xf32>
    %57 = vector.broadcast %7 : vector<1x128xf32> to vector<8x128xf32>
    %58 = arith.mulf %56, %57 : vector<8x128xf32>
    %59 = vector.broadcast %9 : vector<1x128xf32> to vector<8x128xf32>
    %60 = arith.addf %58, %59 : vector<8x128xf32>
    %61 = vector.shape_cast %35 : vector<8x8x128xbf16> to vector<64x128xbf16>
    %c0_22 = arith.constant 0 : index
    %c0_23 = arith.constant 0 : index
    %c0_24 = arith.constant 0 : index
    %62 = vector.load %arg6[%c0_22, %c0_23, %c0_24] : memref<1x128x256xbf16, #tpu.memory_space<vmem>>, vector<1x128x256xbf16>
    %63 = vector.shape_cast %62 : vector<1x128x256xbf16> to vector<128x256xbf16>
    %cst_25 = arith.constant dense<0.000000e+00> : vector<64x256xf32>
    %64 = tpu.matmul %61, %63, %cst_25 {dimension_numbers = #tpu.dot_dimension_numbers<[1], [0], [0], [1], [0, 0, 1, 1], [], []>} : vector<64x128xbf16>, vector<128x256xbf16>, vector<64x256xf32> -> vector<64x256xf32>
    %c0_26 = arith.constant 0 : index
    %c0_27 = arith.constant 0 : index
    %c0_28 = arith.constant 0 : index
    %65 = vector.load %arg7[%c0_26, %c0_27, %c0_28] : memref<1x1x256xf32, #tpu.memory_space<vmem>>, vector<1x1x256xf32>
    %66 = vector.shape_cast %65 : vector<1x1x256xf32> to vector<1x256xf32>
    %67 = vector.broadcast %66 : vector<1x256xf32> to vector<64x256xf32>
    %68 = arith.addf %64, %67 : vector<64x256xf32>
    %69 = arith.truncf %68 : vector<64x256xf32> to vector<64x256xbf16>
    %70 = vector.shape_cast %69 : vector<64x256xbf16> to vector<8x8x256xbf16>
    %71 = vector.extract_strided_slice %70 {offsets = [0, 0, 0], sizes = [8, 8, 128], strides = [1, 1, 1]} : vector<8x8x256xbf16> to vector<8x8x128xbf16>
    %72 = vector.extract_strided_slice %70 {offsets = [0, 0, 128], sizes = [8, 8, 128], strides = [1, 1, 1]} : vector<8x8x256xbf16> to vector<8x8x128xbf16>
    %73 = arith.truncf %60 : vector<8x128xf32> to vector<8x128xbf16>
    %c0_29 = arith.constant 0 : index
    %c0_30 = arith.constant 0 : index
    %c0_31 = arith.constant 0 : index
    %74 = vector.load %arg8[%c0_29, %c0_30, %c0_31] : memref<1x128x128xbf16, #tpu.memory_space<vmem>>, vector<1x128x128xbf16>
    %75 = vector.shape_cast %74 : vector<1x128x128xbf16> to vector<128x128xbf16>
    %cst_32 = arith.constant dense<0.000000e+00> : vector<8x128xf32>
    %76 = tpu.matmul %73, %75, %cst_32 {dimension_numbers = #tpu.dot_dimension_numbers<[1], [0], [0], [1], [0, 0, 1, 1], [], []>} : vector<8x128xbf16>, vector<128x128xbf16>, vector<8x128xf32> -> vector<8x128xf32>
    %c0_33 = arith.constant 0 : index
    %c0_34 = arith.constant 0 : index
    %c0_35 = arith.constant 0 : index
    %77 = vector.load %arg9[%c0_33, %c0_34, %c0_35] : memref<1x1x128xf32, #tpu.memory_space<vmem>>, vector<1x1x128xf32>
    %78 = vector.shape_cast %77 : vector<1x1x128xf32> to vector<1x128xf32>
    %79 = vector.broadcast %78 : vector<1x128xf32> to vector<8x128xf32>
    %80 = arith.addf %76, %79 : vector<8x128xf32>
    %cst_36 = arith.constant 1.280000e+02 : f32
    %81 = math.sqrt %cst_36 : f32
    %cst_37 = arith.constant 1.000000e+00 : f32
    %82 = arith.divf %cst_37, %81 : f32
    %83 = vector.shape_cast %80 : vector<8x128xf32> to vector<8x1x128xf32>
    %84 = arith.extf %71 : vector<8x8x128xbf16> to vector<8x8x128xf32>
    %85 = vector.broadcast %83 : vector<8x1x128xf32> to vector<8x8x128xf32>
    %86 = arith.mulf %85, %84 : vector<8x8x128xf32>
    %cst_38 = arith.constant dense<0.000000e+00> : vector<8x8xf32>
    %87 = vector.multi_reduction <add>, %86, %cst_38 [2] : vector<8x8x128xf32> to vector<8x8xf32>
    %88 = vector.broadcast %82 : f32 to vector<8x8xf32>
    %89 = arith.mulf %87, %88 : vector<8x8xf32>
    %90 = arith.addf %89, %5 : vector<8x8xf32>
    %cst_39 = arith.constant dense<0xFF800000> : vector<8xf32>
    %91 = vector.multi_reduction <maximumf>, %90, %cst_39 [1] : vector<8x8xf32> to vector<8xf32>
    %92 = vector.shape_cast %91 : vector<8xf32> to vector<8x1xf32>
    %93 = vector.broadcast %92 : vector<8x1xf32> to vector<8x8xf32>
    %94 = arith.subf %90, %93 : vector<8x8xf32>
    %95 = math.exp %94 : vector<8x8xf32>
    %cst_40 = arith.constant dense<0.000000e+00> : vector<8xf32>
    %96 = vector.multi_reduction <add>, %95, %cst_40 [1] : vector<8x8xf32> to vector<8xf32>
    %97 = vector.shape_cast %96 : vector<8xf32> to vector<8x1xf32>
    %98 = tpu.reciprocal %97 {approx = true} : vector<8x1xf32> -> vector<8x1xf32>
    %99 = vector.broadcast %98 : vector<8x1xf32> to vector<8x8xf32>
    %100 = arith.mulf %95, %99 : vector<8x8xf32>
    %101 = vector.shape_cast %100 : vector<8x8xf32> to vector<8x8x1xf32>
    %102 = arith.extf %72 : vector<8x8x128xbf16> to vector<8x8x128xf32>
    %103 = vector.broadcast %101 : vector<8x8x1xf32> to vector<8x8x128xf32>
    %104 = arith.mulf %103, %102 : vector<8x8x128xf32>
    %cst_41 = arith.constant dense<0.000000e+00> : vector<8x128xf32>
    %105 = vector.multi_reduction <add>, %104, %cst_41 [1] : vector<8x8x128xf32> to vector<8x128xf32>
    %106 = arith.truncf %105 : vector<8x128xf32> to vector<8x128xbf16>
    %c0_42 = arith.constant 0 : index
    %c0_43 = arith.constant 0 : index
    %c0_44 = arith.constant 0 : index
    %107 = vector.load %arg10[%c0_42, %c0_43, %c0_44] : memref<1x128x128xbf16, #tpu.memory_space<vmem>>, vector<1x128x128xbf16>
    %108 = vector.shape_cast %107 : vector<1x128x128xbf16> to vector<128x128xbf16>
    %cst_45 = arith.constant dense<0.000000e+00> : vector<8x128xf32>
    %109 = tpu.matmul %106, %108, %cst_45 {dimension_numbers = #tpu.dot_dimension_numbers<[1], [0], [0], [1], [0, 0, 1, 1], [], []>} : vector<8x128xbf16>, vector<128x128xbf16>, vector<8x128xf32> -> vector<8x128xf32>
    %c0_46 = arith.constant 0 : index
    %c0_47 = arith.constant 0 : index
    %c0_48 = arith.constant 0 : index
    %110 = vector.load %arg11[%c0_46, %c0_47, %c0_48] : memref<1x1x128xf32, #tpu.memory_space<vmem>>, vector<1x1x128xf32>
    %111 = vector.shape_cast %110 : vector<1x1x128xf32> to vector<1x128xf32>
    %112 = vector.broadcast %111 : vector<1x128xf32> to vector<8x128xf32>
    %113 = arith.addf %109, %112 : vector<8x128xf32>
    %114 = arith.addf %60, %113 : vector<8x128xf32>
    %c0_49 = arith.constant 0 : index
    %c0_50 = arith.constant 0 : index
    %c0_51 = arith.constant 0 : index
    %115 = vector.load %arg12[%c0_49, %c0_50, %c0_51] : memref<1x1x128xf32, #tpu.memory_space<vmem>>, vector<1x1x128xf32>
    %116 = vector.shape_cast %115 : vector<1x1x128xf32> to vector<1x128xf32>
    %c0_52 = arith.constant 0 : index
    %c0_53 = arith.constant 0 : index
    %c0_54 = arith.constant 0 : index
    %117 = vector.load %arg13[%c0_52, %c0_53, %c0_54] : memref<1x1x128xf32, #tpu.memory_space<vmem>>, vector<1x1x128xf32>
    %118 = vector.shape_cast %117 : vector<1x1x128xf32> to vector<1x128xf32>
    %cst_55 = arith.constant dense<0.000000e+00> : vector<8xf32>
    %119 = vector.multi_reduction <add>, %114, %cst_55 [1] : vector<8x128xf32> to vector<8xf32>
    %120 = vector.shape_cast %119 : vector<8xf32> to vector<8x1xf32>
    %cst_56 = arith.constant 1.280000e+02 : f32
    %121 = vector.broadcast %cst_56 : f32 to vector<8x1xf32>
    %122 = arith.divf %120, %121 : vector<8x1xf32>
    %123 = vector.broadcast %122 : vector<8x1xf32> to vector<8x128xf32>
    %124 = arith.subf %114, %123 : vector<8x128xf32>
    %125 = arith.mulf %124, %124 : vector<8x128xf32>
    %cst_57 = arith.constant dense<0.000000e+00> : vector<8xf32>
    %126 = vector.multi_reduction <add>, %125, %cst_57 [1] : vector<8x128xf32> to vector<8xf32>
    %127 = vector.shape_cast %126 : vector<8xf32> to vector<8x1xf32>
    %cst_58 = arith.constant 1.280000e+02 : f32
    %128 = vector.broadcast %cst_58 : f32 to vector<8x1xf32>
    %129 = arith.divf %127, %128 : vector<8x1xf32>
    %130 = vector.broadcast %122 : vector<8x1xf32> to vector<8x128xf32>
    %131 = arith.subf %114, %130 : vector<8x128xf32>
    %cst_59 = arith.constant 9.99999996E-13 : f32
    %132 = vector.broadcast %cst_59 : f32 to vector<8x1xf32>
    %133 = arith.addf %129, %132 : vector<8x1xf32>
    %134 = math.rsqrt %133 : vector<8x1xf32>
    %135 = vector.broadcast %134 : vector<8x1xf32> to vector<8x128xf32>
    %136 = arith.mulf %131, %135 : vector<8x128xf32>
    %137 = vector.broadcast %116 : vector<1x128xf32> to vector<8x128xf32>
    %138 = arith.mulf %136, %137 : vector<8x128xf32>
    %139 = vector.broadcast %118 : vector<1x128xf32> to vector<8x128xf32>
    %140 = arith.addf %138, %139 : vector<8x128xf32>
    %141 = arith.truncf %140 : vector<8x128xf32> to vector<8x128xbf16>
    %c0_60 = arith.constant 0 : index
    %c0_61 = arith.constant 0 : index
    %c0_62 = arith.constant 0 : index
    %142 = vector.load %arg14[%c0_60, %c0_61, %c0_62] : memref<1x128x256xbf16, #tpu.memory_space<vmem>>, vector<1x128x256xbf16>
    %143 = vector.shape_cast %142 : vector<1x128x256xbf16> to vector<128x256xbf16>
    %cst_63 = arith.constant dense<0.000000e+00> : vector<8x256xf32>
    %144 = tpu.matmul %141, %143, %cst_63 {dimension_numbers = #tpu.dot_dimension_numbers<[1], [0], [0], [1], [0, 0, 1, 1], [], []>} : vector<8x128xbf16>, vector<128x256xbf16>, vector<8x256xf32> -> vector<8x256xf32>
    %c0_64 = arith.constant 0 : index
    %c0_65 = arith.constant 0 : index
    %c0_66 = arith.constant 0 : index
    %145 = vector.load %arg15[%c0_64, %c0_65, %c0_66] : memref<1x1x256xf32, #tpu.memory_space<vmem>>, vector<1x1x256xf32>
    %146 = vector.shape_cast %145 : vector<1x1x256xf32> to vector<1x256xf32>
    %147 = vector.broadcast %146 : vector<1x256xf32> to vector<8x256xf32>
    %148 = arith.addf %144, %147 : vector<8x256xf32>
    %cst_67 = arith.constant 5.000000e-01 : f32
    %149 = vector.broadcast %cst_67 : f32 to vector<8x256xf32>
    %150 = arith.mulf %149, %148 : vector<8x256xf32>
    %cst_68 = arith.constant 4.471500e-02 : f32
    %151 = vector.broadcast %cst_68 : f32 to vector<8x256xf32>
    %152 = arith.mulf %151, %148 : vector<8x256xf32>
    %153 = arith.mulf %152, %148 : vector<8x256xf32>
    %154 = arith.mulf %153, %148 : vector<8x256xf32>
    %155 = arith.addf %148, %154 : vector<8x256xf32>
    %cst_69 = arith.constant 0.797884583 : f32
    %156 = vector.broadcast %cst_69 : f32 to vector<8x256xf32>
    %157 = arith.mulf %156, %155 : vector<8x256xf32>
    %158 = math.tanh %157 : vector<8x256xf32>
    %cst_70 = arith.constant 1.000000e+00 : f32
    %159 = vector.broadcast %cst_70 : f32 to vector<8x256xf32>
    %160 = arith.addf %159, %158 : vector<8x256xf32>
    %161 = arith.mulf %150, %160 : vector<8x256xf32>
    %162 = arith.truncf %161 : vector<8x256xf32> to vector<8x256xbf16>
    %c0_71 = arith.constant 0 : index
    %c0_72 = arith.constant 0 : index
    %c0_73 = arith.constant 0 : index
    %163 = vector.load %arg16[%c0_71, %c0_72, %c0_73] : memref<1x256x128xbf16, #tpu.memory_space<vmem>>, vector<1x256x128xbf16>
    %164 = vector.shape_cast %163 : vector<1x256x128xbf16> to vector<256x128xbf16>
    %cst_74 = arith.constant dense<0.000000e+00> : vector<8x128xf32>
    %165 = tpu.matmul %162, %164, %cst_74 {dimension_numbers = #tpu.dot_dimension_numbers<[1], [0], [0], [1], [0, 0, 1, 1], [], []>} : vector<8x256xbf16>, vector<256x128xbf16>, vector<8x128xf32> -> vector<8x128xf32>
    %c0_75 = arith.constant 0 : index
    %c0_76 = arith.constant 0 : index
    %c0_77 = arith.constant 0 : index
    %166 = vector.load %arg17[%c0_75, %c0_76, %c0_77] : memref<1x1x128xf32, #tpu.memory_space<vmem>>, vector<1x1x128xf32>
    %167 = vector.shape_cast %166 : vector<1x1x128xf32> to vector<1x128xf32>
    %168 = vector.broadcast %167 : vector<1x128xf32> to vector<8x128xf32>
    %169 = arith.addf %165, %168 : vector<8x128xf32>
    %170 = arith.addf %140, %169 : vector<8x128xf32>
    %c0_78 = arith.constant 0 : index
    %c0_79 = arith.constant 0 : index
    %c0_80 = arith.constant 0 : index
    %171 = vector.load %arg18[%c0_78, %c0_79, %c0_80] : memref<1x1x128xf32, #tpu.memory_space<vmem>>, vector<1x1x128xf32>
    %172 = vector.shape_cast %171 : vector<1x1x128xf32> to vector<1x128xf32>
    %c0_81 = arith.constant 0 : index
    %c0_82 = arith.constant 0 : index
    %c0_83 = arith.constant 0 : index
    %173 = vector.load %arg19[%c0_81, %c0_82, %c0_83] : memref<1x1x128xf32, #tpu.memory_space<vmem>>, vector<1x1x128xf32>
    %174 = vector.shape_cast %173 : vector<1x1x128xf32> to vector<1x128xf32>
    %cst_84 = arith.constant dense<0.000000e+00> : vector<8xf32>
    %175 = vector.multi_reduction <add>, %170, %cst_84 [1] : vector<8x128xf32> to vector<8xf32>
    %176 = vector.shape_cast %175 : vector<8xf32> to vector<8x1xf32>
    %cst_85 = arith.constant 1.280000e+02 : f32
    %177 = vector.broadcast %cst_85 : f32 to vector<8x1xf32>
    %178 = arith.divf %176, %177 : vector<8x1xf32>
    %179 = vector.broadcast %178 : vector<8x1xf32> to vector<8x128xf32>
    %180 = arith.subf %170, %179 : vector<8x128xf32>
    %181 = arith.mulf %180, %180 : vector<8x128xf32>
    %cst_86 = arith.constant dense<0.000000e+00> : vector<8xf32>
    %182 = vector.multi_reduction <add>, %181, %cst_86 [1] : vector<8x128xf32> to vector<8xf32>
    %183 = vector.shape_cast %182 : vector<8xf32> to vector<8x1xf32>
    %cst_87 = arith.constant 1.280000e+02 : f32
    %184 = vector.broadcast %cst_87 : f32 to vector<8x1xf32>
    %185 = arith.divf %183, %184 : vector<8x1xf32>
    %186 = vector.broadcast %178 : vector<8x1xf32> to vector<8x128xf32>
    %187 = arith.subf %170, %186 : vector<8x128xf32>
    %cst_88 = arith.constant 9.99999996E-13 : f32
    %188 = vector.broadcast %cst_88 : f32 to vector<8x1xf32>
    %189 = arith.addf %185, %188 : vector<8x1xf32>
    %190 = math.rsqrt %189 : vector<8x1xf32>
    %191 = vector.broadcast %190 : vector<8x1xf32> to vector<8x128xf32>
    %192 = arith.mulf %187, %191 : vector<8x128xf32>
    %193 = vector.broadcast %172 : vector<1x128xf32> to vector<8x128xf32>
    %194 = arith.mulf %192, %193 : vector<8x128xf32>
    %195 = vector.broadcast %174 : vector<1x128xf32> to vector<8x128xf32>
    %196 = arith.addf %194, %195 : vector<8x128xf32>
    %197 = arith.truncf %196 : vector<8x128xf32> to vector<8x128xbf16>
    %c0_89 = arith.constant 0 : index
    %c0_90 = arith.constant 0 : index
    %c0_91 = arith.constant 0 : index
    %198 = vector.load %arg20[%c0_89, %c0_90, %c0_91] : memref<1x128x128xbf16, #tpu.memory_space<vmem>>, vector<1x128x128xbf16>
    %199 = vector.shape_cast %198 : vector<1x128x128xbf16> to vector<128x128xbf16>
    %cst_92 = arith.constant dense<0.000000e+00> : vector<8x128xf32>
    %200 = tpu.matmul %197, %199, %cst_92 {dimension_numbers = #tpu.dot_dimension_numbers<[1], [0], [0], [1], [0, 0, 1, 1], [], []>} : vector<8x128xbf16>, vector<128x128xbf16>, vector<8x128xf32> -> vector<8x128xf32>
    %c0_93 = arith.constant 0 : index
    %c0_94 = arith.constant 0 : index
    %c0_95 = arith.constant 0 : index
    %201 = vector.load %arg21[%c0_93, %c0_94, %c0_95] : memref<1x1x128xf32, #tpu.memory_space<vmem>>, vector<1x1x128xf32>
    %202 = vector.shape_cast %201 : vector<1x1x128xf32> to vector<1x128xf32>
    %203 = vector.broadcast %202 : vector<1x128xf32> to vector<8x128xf32>
    %204 = arith.addf %200, %203 : vector<8x128xf32>
    %205 = math.tanh %204 : vector<8x128xf32>
    %c0_96 = arith.constant 0 : index
    %c0_97 = arith.constant 0 : index
    %c0_98 = arith.constant 0 : index
    %206 = vector.load %arg22[%c0_96, %c0_97, %c0_98] : memref<1x8x128xf32, #tpu.memory_space<vmem>>, vector<1x8x128xf32>
    %207 = vector.shape_cast %206 : vector<1x8x128xf32> to vector<8x128xf32>
    %208 = vector.shape_cast %205 : vector<8x128xf32> to vector<1x8x128xf32>
    tpu.vector_store %arg22[%c0_96, %c0_97, %c0_98], %208 {strides = array<i32>} : memref<1x8x128xf32, #tpu.memory_space<vmem>>, vector<1x8x128xf32>,
    return
  }
  func.func @transform_0(%arg0: i32, %arg1: i32) -> (i32, i32, i32, i32) {
    %c0_i32 = arith.constant 0 : i32
    %c0_i32_0 = arith.constant 0 : i32
    %c0_i32_1 = arith.constant 0 : i32
    return %arg0, %arg1, %c0_i32, %c0_i32_0 : i32, i32, i32, i32
  }
  func.func @transform_1(%arg0: i32, %arg1: i32) -> (i32, i32, i32, i32) {
    %c0_i32 = arith.constant 0 : i32
    %c0_i32_0 = arith.constant 0 : i32
    %c0_i32_1 = arith.constant 0 : i32
    return %arg0, %arg1, %c0_i32, %c0_i32_0 : i32, i32, i32, i32
  }
  func.func @transform_2(%arg0: i32, %arg1: i32) -> (i32, i32, i32) {
    %c0_i32 = arith.constant 0 : i32
    %c0_i32_0 = arith.constant 0 : i32
    %c0_i32_1 = arith.constant 0 : i32
    return %arg0, %c0_i32, %c0_i32_0 : i32, i32, i32
  }
  func.func @transform_3(%arg0: i32, %arg1: i32) -> (i32, i32, i32) {
    %c0_i32 = arith.constant 0 : i32
    %c0_i32_0 = arith.constant 0 : i32
    %c0_i32_1 = arith.constant 0 : i32
    return %arg0, %c0_i32, %c0_i32_0 : i32, i32, i32
  }
  func.func @transform_4(%arg0: i32, %arg1: i32) -> (i32, i32, i32) {
    %c0_i32 = arith.constant 0 : i32
    %c0_i32_0 = arith.constant 0 : i32
    %c0_i32_1 = arith.constant 0 : i32
    return %arg0, %c0_i32, %c0_i32_0 : i32, i32, i32
  }
  func.func @transform_5(%arg0: i32, %arg1: i32) -> (i32, i32, i32) {
    %c0_i32 = arith.constant 0 : i32
    %c0_i32_0 = arith.constant 0 : i32
    %c0_i32_1 = arith.constant 0 : i32
    return %arg0, %c0_i32, %c0_i32_0 : i32, i32, i32
  }
  func.func @transform_6(%arg0: i32, %arg1: i32) -> (i32, i32, i32) {
    %c0_i32 = arith.constant 0 : i32
    %c0_i32_0 = arith.constant 0 : i32
    %c0_i32_1 = arith.constant 0 : i32
    return %arg0, %c0_i32, %c0_i32_0 : i32, i32, i32
  }
  func.func @transform_7(%arg0: i32, %arg1: i32) -> (i32, i32, i32) {
    %c0_i32 = arith.constant 0 : i32
    %c0_i32_0 = arith.constant 0 : i32
    %c0_i32_1 = arith.constant 0 : i32
    return %arg0, %c0_i32, %c0_i32_0 : i32, i32, i32
  }
  func.func @transform_8(%arg0: i32, %arg1: i32) -> (i32, i32, i32) {
    %c0_i32 = arith.constant 0 : i32
    %c0_i32_0 = arith.constant 0 : i32
    %c0_i32_1 = arith.constant 0 : i32
    return %arg0, %c0_i32, %c0_i32_0 : i32, i32, i32
  }
  func.func @transform_9(%arg0: i32, %arg1: i32) -> (i32, i32, i32) {
    %c0_i32 = arith.constant 0 : i32
    %c0_i32_0 = arith.constant 0 : i32
    %c0_i32_1 = arith.constant 0 : i32
    return %arg0, %c0_i32, %c0_i32_0 : i32, i32, i32
  }
  func.func @transform_10(%arg0: i32, %arg1: i32) -> (i32, i32, i32) {
    %c0_i32 = arith.constant 0 : i32
    %c0_i32_0 = arith.constant 0 : i32
    %c0_i32_1 = arith.constant 0 : i32
    return %arg0, %c0_i32, %c0_i32_0 : i32, i32, i32
  }
  func.func @transform_11(%arg0: i32, %arg1: i32) -> (i32, i32, i32) {
    %c0_i32 = arith.constant 0 : i32
    %c0_i32_0 = arith.constant 0 : i32
    %c0_i32_1 = arith.constant 0 : i32
    return %arg0, %c0_i32, %c0_i32_0 : i32, i32, i32
  }
  func.func @transform_12(%arg0: i32, %arg1: i32) -> (i32, i32, i32) {
    %c0_i32 = arith.constant 0 : i32
    %c0_i32_0 = arith.constant 0 : i32
    %c0_i32_1 = arith.constant 0 : i32
    return %arg0, %c0_i32, %c0_i32_0 : i32, i32, i32
  }
  func.func @transform_13(%arg0: i32, %arg1: i32) -> (i32, i32, i32) {
    %c0_i32 = arith.constant 0 : i32
    %c0_i32_0 = arith.constant 0 : i32
    %c0_i32_1 = arith.constant 0 : i32
    return %arg0, %c0_i32, %c0_i32_0 : i32, i32, i32
  }
  func.func @transform_14(%arg0: i32, %arg1: i32) -> (i32, i32, i32) {
    %c0_i32 = arith.constant 0 : i32
    %c0_i32_0 = arith.constant 0 : i32
    %c0_i32_1 = arith.constant 0 : i32
    return %arg0, %c0_i32, %c0_i32_0 : i32, i32, i32
  }
  func.func @transform_15(%arg0: i32, %arg1: i32) -> (i32, i32, i32) {
    %c0_i32 = arith.constant 0 : i32
    %c0_i32_0 = arith.constant 0 : i32
    %c0_i32_1 = arith.constant 0 : i32
    return %arg0, %c0_i32, %c0_i32_0 : i32, i32, i32
  }
  func.func @transform_16(%arg0: i32, %arg1: i32) -> (i32, i32, i32) {
    %c0_i32 = arith.constant 0 : i32
    %c0_i32_0 = arith.constant 0 : i32
    %c0_i32_1 = arith.constant 0 : i32
    return %arg0, %c0_i32, %c0_i32_0 : i32, i32, i32
  }
  func.func @transform_17(%arg0: i32, %arg1: i32) -> (i32, i32, i32) {
    %c0_i32 = arith.constant 0 : i32
    %c0_i32_0 = arith.constant 0 : i32
    %c0_i32_1 = arith.constant 0 : i32
    return %arg0, %c0_i32, %c0_i32_0 : i32, i32, i32
  }
  func.func @transform_18(%arg0: i32, %arg1: i32) -> (i32, i32, i32) {
    %c0_i32 = arith.constant 0 : i32
    %c0_i32_0 = arith.constant 0 : i32
    %c0_i32_1 = arith.constant 0 : i32
    return %arg0, %c0_i32, %c0_i32_0 : i32, i32, i32
  }
  func.func @transform_19(%arg0: i32, %arg1: i32) -> (i32, i32, i32) {
    %c0_i32 = arith.constant 0 : i32
    %c0_i32_0 = arith.constant 0 : i32
    %c0_i32_1 = arith.constant 0 : i32
    return %arg0, %c0_i32, %c0_i32_0 : i32, i32, i32
  }
  func.func @transform_20(%arg0: i32, %arg1: i32) -> (i32, i32, i32) {
    %c0_i32 = arith.constant 0 : i32
    %c0_i32_0 = arith.constant 0 : i32
    return %arg0, %arg1, %c0_i32 : i32, i32, i32
  }
}

</mosaic_0001>

<bundles_post_ra>
// kernel: tpu_custom_call.1
= control target key start
LH: loop header
LB: loop body
LE: loop exit
PB: predicated region body
PF: predicated region fallthrough
CT: control target
= control target key end

     0   :  { %s5571_s0 = inlined_call_operand.hbm [shape: bf16[2,8,8,128], index: 0, kind: input, shape index: {}]   ;;  %s5572_s1 = inlined_call_operand.vmem [shape: bf16[2,8,1,8], index: 1, kind: input, shape index: {}]   ;;  %s5573_s2 = inlined_call_operand.vmem [shape: f32[2,1,128], index: 2, kind: input, shape index: {}]   ;;  %s5574_s3 = inlined_call_operand.vmem [shape: f32[2,1,128], index: 3, kind: input, shape index: {}]   ;;  %s5575_s4 = inlined_call_operand.hbm [shape: bf16[2,128,256], index: 4, kind: input, shape index: {}]   ;;  %s5576_s5 = inlined_call_operand.vmem [shape: f32[2,1,256], index: 5, kind: input, shape index: {}]   ;;  %s5577_s6 = inlined_call_operand.hbm [shape: bf16[2,128,128], index: 6, kind: input, shape index: {}]   ;;  %s5578_s7 = inlined_call_operand.vmem [shape: f32[2,1,128], index: 7, kind: input, shape index: {}]   ;;  %s5579_s8 = inlined_call_operand.hbm [shape: bf16[2,128,128], index: 8, kind: input, shape index: {}]   ;;  %s5580_s9 = inlined_call_operand.vmem [shape: f32[2,1,128], index: 9, kind: input, shape index: {}]   ;;  %s5581_s10 = inlined_call_operand.vmem [shape: f32[2,1,128], index: 10, kind: input, shape index: {}]   ;;  %s5582_s11 = inlined_call_operand.vmem [shape: f32[2,1,128], index: 11, kind: input, shape index: {}]   ;;  %s5583_s12 = inlined_call_operand.hbm [shape: bf16[2,128,256], index: 12, kind: input, shape index: {}]   ;;  %s5584_s13 = inlined_call_operand.vmem [shape: f32[2,1,256], index: 13, kind: input, shape index: {}]   ;;  %s5585_s14 = inlined_call_operand.hbm [shape: bf16[2,256,128], index: 14, kind: input, shape index: {}]   ;;  %s5586_s15 = inlined_call_operand.vmem [shape: f32[2,1,128], index: 15, kind: input, shape index: {}]   ;;  %s5587_s16 = inlined_call_operand.vmem [shape: f32[2,1,128], index: 16, kind: input, shape index: {}]   ;;  %s5588_s17 = inlined_call_operand.vmem [shape: f32[2,1,128], index: 17, kind: input, shape index: {}]   ;;  %s5589_s18 = inlined_call_operand.hbm [shape: bf16[2,128,128], index: 18, kind: input, shape index: {}]   ;;  %s5590_s19 = inlined_call_operand.vmem [shape: f32[2,1,128], index: 19, kind: input, shape index: {}]   ;;  %s5591_s20 = inlined_call_operand.hbm [shape: f32[2,8,128], index: 20, kind: output, shape index: {}]  }
   0x1   :  { %5603 = sst [smem:[#allocation22_spill]] %s5571_s0 }
   0x2   :  { %5604 = sst [smem:[#allocation23_spill]] %s5572_s1 }
   0x3   :  { %5605 = sst [smem:[#allocation24_spill]] %s5573_s2 }
   0x4   :  { %5606 = sst [smem:[#allocation25_spill]] %s5574_s3 }
   0x5   :  { %5607 = sst [smem:[#allocation26_spill]] %s5575_s4 }
   0x6   :  { %5608 = sst [smem:[#allocation27_spill]] %s5576_s5 }
   0x7   :  { %5609 = sst [smem:[#allocation28_spill]] %s5578_s7 }
   0x8   :  { %5610 = sst [smem:[#allocation29_spill]] %s5579_s8 }
   0x9   :  { %5611 = sst [smem:[#allocation30_spill]] %s5580_s9 }
   0xa   :  { %5612 = sst [smem:[#allocation31_spill]] %s5581_s10 }
   0xb   :  { %5613 = sst [smem:[#allocation32_spill]] %s5582_s11 }
   0xc   :  { %5614 = sst [smem:[#allocation33_spill]] %s5584_s13 }
   0xd   :  { %5615 = sst [smem:[#allocation34_spill]] %s5586_s15 }
   0xe   :  { %5616 = sst [smem:[#allocation35_spill]] %s5587_s16 }
   0xf   :  { %5617 = sst [smem:[#allocation36_spill]] %s5588_s17 }
  0x10   :  { %5618 = sst [smem:[#allocation37_spill]] %s5590_s19 }
  0x11   :  { %5619 = sst [smem:[#allocation38_spill]] %s5591_s20 }
  0x12   :  { %25 = vsyncpa [#allocation3], 0 }
  0x13   :  { %27 = vsyncpa [#allocation3 + $0x1], 0 }
  0x14   :  { %28 = vsyncpa [#allocation6], 0 }
  0x15   :  { %29 = vsyncpa [#allocation9], 0 }
  0x16   :  { %30 = vsyncpa [#allocation12], 0 }
  0x17   :  { %31 = vsyncpa [#allocation4], 0 }
  0x18   :  { %33 = vsyncpa [#allocation4 + $0x1], 0  ;;  %s4568_s1 = smov 0   ;;  %s4570_s22 = smov 0  }
  0x19   :  { %s4572_s23 = smov 0   ;;  %s4574_s24 = smov 0  }
  0x1a   :  { %s4576_s2 = smov 0   ;;  %s4578_s25 = smov 0  }
  0x1b LB: > { %5620 = sst [smem:[#allocation20_spill]] %s4425_s1  ;;  %s5593_s3 = sadd.s32 4294967295, %s4445_s25   ;;  %s4445_s25 = sphi %s4578_s25, %s39_s25   ;;  %s4441_s2 = sphi %s4576_s2, %s5660_s2   ;;  %s4437_s24 = sphi %s4574_s24, %s5659_s24   ;;  %s4433_s23 = sphi %s4572_s23, %s5658_s23   ;;  %s4429_s22 = sphi %s4570_s22, %s5657_s22   ;;  %s4425_s1 = sphi %s4568_s1, %s5656_s1  }
  0x1c   : > { %s3645_s26 = sadd.s32 4294967294, %s4445_s25   ;;  %p73_p0 = scmp.ne.s32.totalorder %s4429_s22, %s4425_s1 }
  0x1d   : > { %p74_p1 = scmp.eq.s32.totalorder %s5593_s3, 0  ;;  %p601_p2 = scmp.eq.s32.totalorder %s3645_s26, 1 }
  0x1e   : > { %p3646_p3 = scmp.ge.s32.totalorder %s4445_s25, 1  ;;  %p608_p5 = scmp.lt.s32.totalorder %s4445_s25, 3 }
  0x1f   : > { %p4605_p4 = por %p74_p1, %p73_p0  ;;  %p4610_p6 = por %p601_p2, %p73_p0 }
  0x20   : > { %s4615_s4 = sshll.u32 %s4437_s24, 11  ;;  %p4617_p7 = pnand %p3646_p3, %p608_p5 }
  0x21   : > { %s5621_s27 = scalar_select %p4605_p4, 1, 0 }
  0x22   : > { %s5622_s28 = scalar_select %p4610_p6, 1, 0 }
  0x23   : > { %s5624_s29 = scalar_select %p4617_p7, 1, 0 }
  0x24   : > { %5623 = sst [smem:[#allocation21_spill]] %s5622_s28  ;;  %p3930_p8 = pneg %p4617_p7 }
  0x25   : > { %s5625_s21 = sld [smem:[#allocation26_spill]]  ;;  %s4447_s3 = smov [#allocation5]  }
  0x26   : > { %s635_s28 = sshll.u32 %s4447_s3, 4  ;;  %p4633_p9 = pnand %p3930_p8, %p4605_p4  ;;  %s4629_s28 = int_to_ptr.vmem [resolvable:$true] %s635_s28 }
  0x27   : > { %s4639_s30 = sshll.u32 %s4437_s24, 10 }
  0x28   : > { %p4645_p12 = pneg %p4633_p9 }
  0x2b   : > { %s4625_s26 = scalar_lea.hbm %s5625_s21, %s4615_s4  ;;  %s4162_s17 = scalar_lea.hbm %s5625_s21, 4096 }
  0x2c   : > { %s4157_s0 = scalar_lea.hbm %s4625_s26, 2048  ;;  %p4163_p1 = scmp.lt.s32.totalorder %s4625_s26, %s5625_s21 }
  0x2d   : > { %p4158_p11 = scmp.ne.s32.totalorder %s4625_s26, %s4157_s0  ;;  %p4164_p2 = scmp.lt.s32.totalorder %s4162_s17, %s4157_s0 }
  0x2f   : > { %p4160_p13 = pnand %p4645_p12, %p4158_p11  ;;  %p4165_p3 = por %p4164_p2, %p4163_p1 }
  0x31   : > { %p4161_p0 = pneg %p4160_p13 }
  0x33   : > { %p4166_p5 = pnand %p4165_p3, %p4161_p0 }
  0x35   : > { %4169 = shalt.err (!%p4166_p5)
}
  0x36   : > { %s4170_s13 = scalar_lea.vmem %s4629_s28, 2048  ;;  %p4178_p10 = scmp.lt.s32.totalorder %s4629_s28, %s4629_s28 }
  0x37   : > { %p4171_p8 = scmp.ne.s32.totalorder %s4629_s28, %s4170_s13  ;;  %p4179_p6 = scmp.lt.s32.totalorder %s4170_s13, %s4170_s13 }
  0x39   : > { %p4173_p11 = pnand %p4171_p8, %p4645_p12  ;;  %p4180_p4 = por %p4179_p6, %p4178_p10 }
  0x3b   : > { %p4174_p13 = pneg %p4173_p11 }
  0x3d   : > { %p4181_p7 = pnand %p4180_p4, %p4174_p13 }
  0x3f   : > { %4184 = shalt.err (!%p4181_p7)
}
  0x40   : > { %s5601_s15 = smov 128   ;;  %s5602_s16 = smov 8  }
  0x41   : > { %3933 = dma.hbm_to_vmem [thread:$0]  (!%p4633_p9), %s4625_s26, 2048, %s4629_s28, [#allocation6], %s5601_s15, %s5601_s15, %s5602_s16  }
  0x42   : > { %s5628_s8 = sld [smem:[#allocation29_spill]]  ;;  %s4450_s0 = smov [#allocation8]  }
  0x43   : > { %s680_s3 = sshll.u32 %s4450_s0, 4  ;;  %s4681_s10 = scalar_lea.hbm %s5585_s14, %s4615_s4  ;;  %s681_s3 = int_to_ptr.vmem [resolvable:$true] %s680_s3 }
  0x48   : > { %s4675_s13 = scalar_lea.hbm %s5628_s8, %s4639_s30  ;;  %s4190_s17 = scalar_lea.hbm %s5628_s8, 2048 }
  0x49   : > { %s4185_s9 = scalar_lea.hbm %s4675_s13, 1024  ;;  %p4191_p10 = scmp.lt.s32.totalorder %s4675_s13, %s5628_s8 }
  0x4a   : > { %p4186_p4 = scmp.ne.s32.totalorder %s4675_s13, %s4185_s9  ;;  %p4192_p0 = scmp.lt.s32.totalorder %s4190_s17, %s4185_s9 }
  0x4c   : > { %p4188_p6 = pnand %p4186_p4, %p4645_p12  ;;  %p4193_p1 = por %p4192_p0, %p4191_p10 }
  0x4e   : > { %p4189_p7 = pneg %p4188_p6 }
  0x50   : > { %p4194_p2 = pnand %p4193_p1, %p4189_p7 }
  0x52   : > { %4197 = shalt.err (!%p4194_p2)
}
  0x53   : > { %s4198_s11 = scalar_lea.vmem %s681_s3, 1024  ;;  %p4206_p11 = scmp.lt.s32.totalorder %s681_s3, %s681_s3 }
  0x54   : > { %p4199_p3 = scmp.ne.s32.totalorder %s681_s3, %s4198_s11  ;;  %p4207_p13 = scmp.lt.s32.totalorder %s4198_s11, %s4198_s11 }
  0x56   : > { %p4201_p5 = pnand %p4199_p3, %p4645_p12  ;;  %p4208_p4 = por %p4207_p13, %p4206_p11 }
  0x58   : > { %p4202_p8 = pneg %p4201_p5 }
  0x5a   : > { %p4209_p6 = pnand %p4208_p4, %p4202_p8 }
  0x5c   : > { %4212 = shalt.err (!%p4209_p6)
}
  0x5d   : > { %s4451_s21 = smov 64   ;;  %s4452_s9 = smov 4  }
  0x5e   : > { %3939 = dma.hbm_to_vmem [thread:$0]  (!%p4633_p9), %s4675_s13, 1024, %s681_s3, [#allocation9], %s4451_s21, %s4451_s21, %s4452_s9  }
  0x5f   : > { %s4453_s15 = smov [#allocation11]   ;;  %s4706_s17 = scalar_lea.hbm %s5577_s6, %s4639_s30 }
  0x60   : > { %s737_s0 = sshll.u32 %s4453_s15, 4  ;;  %s4213_s19 = scalar_lea.hbm %s4681_s10, 2048  ;;  %s738_s0 = int_to_ptr.vmem [resolvable:$true] %s737_s0 }
  0x61   : > { %p4214_p7 = scmp.ne.s32.totalorder %s4681_s10, %s4213_s19  ;;  %s4218_s8 = scalar_lea.hbm %s5585_s14, 4096 }
  0x62   : > { %p4219_p1 = scmp.lt.s32.totalorder %s4681_s10, %s5585_s14  ;;  %p4220_p2 = scmp.lt.s32.totalorder %s4218_s8, %s4213_s19 }
  0x63   : > { %p4216_p10 = pnand %p4214_p7, %p4645_p12 }
  0x64   : > { %p4221_p3 = por %p4220_p2, %p4219_p1 }
  0x65   : > { %p4217_p0 = pneg %p4216_p10 }
  0x67   : > { %p4222_p5 = pnand %p4221_p3, %p4217_p0 }
  0x69   : > { %4225 = shalt.err (!%p4222_p5)
}
  0x6a   : > { %s4226_s13 = scalar_lea.vmem %s738_s0, 2048  ;;  %p4234_p4 = scmp.lt.s32.totalorder %s738_s0, %s738_s0 }
  0x6b   : > { %p4227_p8 = scmp.ne.s32.totalorder %s738_s0, %s4226_s13  ;;  %p4235_p6 = scmp.lt.s32.totalorder %s4226_s13, %s4226_s13 }
  0x6d   : > { %p4229_p11 = pnand %p4227_p8, %p4645_p12  ;;  %p4236_p7 = por %p4235_p6, %p4234_p4 }
  0x6f   : > { %p4230_p13 = pneg %p4229_p11 }
  0x71   : > { %p4237_p10 = pnand %p4236_p7, %p4230_p13 }
  0x73   : > { %4240 = shalt.err (!%p4237_p10)
}
  0x74   : > { %3945 = dma.hbm_to_vmem [thread:$0]  (!%p4633_p9), %s4681_s10, 2048, %s738_s0, [#allocation12], %s4451_s21, %s4451_s21, %s4452_s9  }
  0x75   : > { %s4454_s5 = smov [#allocation7]   ;;  %s4731_s3 = scalar_lea.hbm %s5583_s12, %s4615_s4 }
  0x76   : > { %s658_s7 = sshll.u32 %s4454_s5, 4  ;;  %s4241_s15 = scalar_lea.hbm %s4706_s17, 1024  ;;  %s659_s7 = int_to_ptr.vmem [resolvable:$true] %s658_s7 }
  0x77   : > { %p4242_p0 = scmp.ne.s32.totalorder %s4706_s17, %s4241_s15  ;;  %s4246_s19 = scalar_lea.hbm %s5577_s6, 2048 }
  0x78   : > { %p4247_p3 = scmp.lt.s32.totalorder %s4706_s17, %s5577_s6  ;;  %p4248_p5 = scmp.lt.s32.totalorder %s4246_s19, %s4241_s15 }
  0x79   : > { %p4244_p1 = pnand %p4242_p0, %p4645_p12 }
  0x7a   : > { %p4249_p8 = por %p4248_p5, %p4247_p3 }
  0x7b   : > { %p4245_p2 = pneg %p4244_p1 }
  0x7d   : > { %p4250_p11 = pnand %p4249_p8, %p4245_p2 }
  0x7f   : > { %4253 = shalt.err (!%p4250_p11)
}
  0x80   : > { %s4254_s10 = scalar_lea.vmem %s659_s7, 1024  ;;  %p4262_p7 = scmp.lt.s32.totalorder %s659_s7, %s659_s7 }
  0x81   : > { %p4255_p13 = scmp.ne.s32.totalorder %s659_s7, %s4254_s10  ;;  %p4263_p10 = scmp.lt.s32.totalorder %s4254_s10, %s4254_s10 }
  0x83   : > { %p4257_p4 = pnand %p4255_p13, %p4645_p12  ;;  %p4264_p0 = por %p4263_p10, %p4262_p7 }
  0x85   : > { %p4258_p6 = pneg %p4257_p4 }
  0x87   : > { %p4265_p1 = pnand %p4264_p0, %p4258_p6 }
  0x89   : > { %4268 = shalt.err (!%p4265_p1)
}
  0x8a   : > { %3936 = dma.hbm_to_vmem [thread:$0]  (!%p4633_p9), %s4706_s17, 1024, %s659_s7, [#allocation6], %s4451_s21, %s4451_s21, %s4452_s9  }
  0x8b   : > { %s4455_s4 = smov [#allocation10]   ;;  %s4756_s16 = scalar_lea.hbm %s5589_s18, %s4639_s30 }
  0x8c   : > { %s714_s0 = sshll.u32 %s4455_s4, 4  ;;  %s4269_s15 = scalar_lea.hbm %s4731_s3, 2048  ;;  %s715_s0 = int_to_ptr.vmem [resolvable:$true] %s714_s0 }
  0x8d   : > { %p4270_p2 = scmp.ne.s32.totalorder %s4731_s3, %s4269_s15  ;;  %s4274_s19 = scalar_lea.hbm %s5583_s12, 4096 }
  0x8e   : > { %p4275_p8 = scmp.lt.s32.totalorder %s4731_s3, %s5583_s12  ;;  %p4276_p11 = scmp.lt.s32.totalorder %s4274_s19, %s4269_s15 }
  0x8f   : > { %p4272_p3 = pnand %p4270_p2, %p4645_p12 }
  0x90   : > { %p4277_p13 = por %p4276_p11, %p4275_p8 }
  0x91   : > { %p4273_p5 = pneg %p4272_p3 }
  0x93   : > { %p4278_p4 = pnand %p4277_p13, %p4273_p5 }
  0x95   : > { %4281 = shalt.err (!%p4278_p4)
}
  0x96   : > { %s4282_s30 = scalar_lea.vmem %s715_s0, 2048  ;;  %p4290_p0 = scmp.lt.s32.totalorder %s715_s0, %s715_s0 }
  0x97   : > { %p4283_p6 = scmp.ne.s32.totalorder %s715_s0, %s4282_s30  ;;  %p4291_p1 = scmp.lt.s32.totalorder %s4282_s30, %s4282_s30 }
  0x99   : > { %p4285_p7 = pnand %p4283_p6, %p4645_p12  ;;  %p4292_p2 = por %p4291_p1, %p4290_p0 }
  0x9b   : > { %p4286_p10 = pneg %p4285_p7 }
  0x9d   : > { %p4293_p3 = pnand %p4292_p2, %p4286_p10 }
  0x9f   : > { %4296 = shalt.err (!%p4293_p3)
}
  0xa0   : > { %s5629_s17 = smov 8   ;;  %s5630_s7 = smov 128  }
  0xa1   : > { %3942 = dma.hbm_to_vmem [thread:$0]  (!%p4633_p9), %s4731_s3, 2048, %s715_s0, [#allocation9], %s5630_s7, %s5630_s7, %s5629_s17  }
  0xa2   : > { %s4456_s10 = smov [#allocation13]   ;;  %s4297_s5 = scalar_lea.hbm %s4756_s16, 1024 }
  0xa3   : > { %s771_s4 = sshll.u32 %s4456_s10, 4  ;;  %p4298_p5 = scmp.ne.s32.totalorder %s4756_s16, %s4297_s5  ;;  %s772_s4 = int_to_ptr.vmem [resolvable:$true] %s771_s4 }
  0xa4   : > { %s4302_s28 = scalar_lea.hbm %s5589_s18, 2048  ;;  %p4303_p13 = scmp.lt.s32.totalorder %s4756_s16, %s5589_s18 }
  0xa5   : > { %p4300_p8 = pnand %p4298_p5, %p4645_p12  ;;  %p4304_p4 = scmp.lt.s32.totalorder %s4302_s28, %s4297_s5 }
  0xa7   : > { %p4301_p11 = pneg %p4300_p8  ;;  %p4305_p6 = por %p4304_p4, %p4303_p13 }
  0xa9   : > { %p4306_p7 = pnand %p4305_p6, %p4301_p11 }
  0xab   : > { %4309 = shalt.err (!%p4306_p7)
}
  0xac   : > { %s4310_s3 = scalar_lea.vmem %s772_s4, 1024  ;;  %p4318_p2 = scmp.lt.s32.totalorder %s772_s4, %s772_s4 }
  0xad   : > { %p4311_p10 = scmp.ne.s32.totalorder %s772_s4, %s4310_s3  ;;  %p4319_p3 = scmp.lt.s32.totalorder %s4310_s3, %s4310_s3 }
  0xaf   : > { %p4313_p0 = pnand %p4311_p10, %p4645_p12  ;;  %p4320_p5 = por %p4319_p3, %p4318_p2 }
  0xb1   : > { %p4314_p1 = pneg %p4313_p0 }
  0xb3   : > { %p4321_p8 = pnand %p4320_p5, %p4314_p1 }
  0xb5   : > { %4324 = shalt.err (!%p4321_p8)
}
  0xb6   : > { %3948 = dma.hbm_to_vmem [thread:$0]  (!%p4633_p9), %s4756_s16, 1024, %s772_s4, [#allocation12], %s4451_s21, %s4451_s21, %s4452_s9  }
  0xb7   : > { %s51_s20 = sadd.s32 1, %s4441_s2  ;;  %s60_s0 = sadd.s32 1, %s4433_s23 }
  0xb8   : > { %p53_p12 = scmp.ge.s32.totalorder %s51_s20, 2  ;;  %p67_p11 = scmp.ne.s32.totalorder %s4433_s23, %s4429_s22 }
  0xb9   : > { %p68_p13 = scmp.eq.s32.totalorder %s4445_s25, 0  ;;  %s5631_s1 = sadd.s32 4294967295, %s4445_s25  }
  0xba   : > { %p595_p4 = scmp.eq.s32.totalorder %s5631_s1, 1  ;;  %s5662_s20 = smov (%p53_p12, %s51_s20), 0 }
  0xbb   : > { %p4805_p6 = por %p68_p13, %p67_p11  ;;  %s55_s16 = ssub.s32 %s4441_s2, %s5662_s20 }
  0xbc   : > { %p4809_p7 = por %p595_p4, %p67_p11  ;;  %p3957_p9 = scmp.lt.s32.totalorder %s4445_s25, 2 }
  0xbd   : > { %p58_p10 = scmp.eq.s32.totalorder %s55_s16, 0  ;;  %s791_s30 = sand.u32 1, %s4433_s23  }
  0xbe   : > { %s3660_s17 = sshll.u32 %s791_s30, 5  ;;  %s3773_s10 = sshll.u32 %s4441_s2, 9 }
  0xbf   : > { %s4818_s7 = scalar_select %p58_p10, %s4433_s23, %s60_s0  }
  0xc0   : > { %s5634_s8 = sld [smem:[#allocation22_spill]]  ;;  %s795_s28 = scalar_lea.vmem [#allocation2], %s3660_s17 }
  0xc1   : > { %s804_s26 = sshll.u32 %s795_s28, 4  ;;  %p4826_p0 = pnand %p3957_p9, %p4805_p6  ;;  %s805_s26 = int_to_ptr.vmem [resolvable:$true] %s804_s26 }
  0xc2   : > { %s792_s3 = scalar_lea.sflag [#allocation3], %s791_s30  ;;  %s4338_s1 = scalar_lea.vmem %s805_s26, 512 }
  0xc3   : > { %p4327_p1 = pneg %p4826_p0  ;;  %p4339_p2 = scmp.ne.s32.totalorder %s805_s26, %s4338_s1 }
  0xc4   : > { %s4457_s0 = smov [#allocation2]  }
  0xc5   : > { %p4341_p3 = pnand %p4339_p2, %p4327_p1  ;;  %s4343_s16 = sshll.u32 %s4457_s0, 4  ;;  %s4344_s16 = int_to_ptr.vmem [resolvable:$false] %s4343_s16 }
  0xc6   : > { %s803_s15 = scalar_lea.hbm %s5634_s8, %s3773_s10  ;;  %s4345_s10 = scalar_lea.vmem %s4344_s16, 1024 }
  0xc7   : > { %p4342_p5 = pneg %p4341_p3  ;;  %p4346_p8 = scmp.lt.s32.totalorder %s805_s26, %s4344_s16 }
  0xc8   : > { %p4347_p12 = scmp.lt.s32.totalorder %s4345_s10, %s4338_s1 }
  0xca   : > { %p4348_p11 = por %p4347_p12, %p4346_p8 }
  0xcc   : > { %p4349_p13 = pnand %p4348_p11, %p4342_p5 }
  0xce   : > { %4352 = shalt.err (!%p4349_p13)
}
  0xcf   : > { %3952 = dma.hbm_to_vmem [thread:$0]  (!%p4826_p0), %s803_s15, 512, %s805_s26, %s792_s3, %s4451_s21, %s4451_s21, %s4452_s9  }
  0xd0   : > { %p5636_p4 = scmp.ne.s32.totalorder %s5624_s29, 0 }
  0xd1   : > { %s4840_s11 = sand.u32 (!%p5636_p4), 1, %s4429_s22   ;;  %p5637_p6 = scmp.ne.s32.totalorder (!%p5636_p4), %s5621_s27, 0 }
  0xd2   : > { %828 = sbr.rel (%p5636_p4) target bundleno = 3236 (0xca4), region = 100  ;;  %s3664_s30 = sshll.u32 (!%p5636_p4), %s4840_s11, 5 }
  0xd3   : > { %s831_s17 = scalar_lea.sflag (!%p5636_p4), [#allocation3], %s4840_s11  ;;  %s834_s4 = scalar_lea.vmem (!%p5636_p4), [#allocation2], %s3664_s30 }
  0xd7   : > { %4404 = dma.done.wait (%p5637_p6), %s831_s17, 512  }
  0xd8   : > { %4406 = vsyncadd (%p5637_p6), %s831_s17, 4294966784 }
  0xd9   : > { %4408 = dma.done.wait (%p5637_p6), [#allocation6], 3072  }
  0xda   : > { %4410 = vsyncadd (%p5637_p6), [#allocation6], 4294964224 }
  0xdb   : > { %4412 = dma.done.wait (%p5637_p6), [#allocation9], 3072  }
  0xdc   : > { %4414 = vsyncadd (%p5637_p6), [#allocation9], 4294964224 }
  0xdd   : > { %4416 = dma.done.wait (%p5637_p6), [#allocation12], 3072  }
  0xde   : > { %4418 = vsyncadd (%p5637_p6), [#allocation12], 4294964224  ;;  %v3787_v0 = vld [vmem:[%s834_s4] sm:$0xff]   ;;  %v3802_v1 = vld [vmem:[%s834_s4 + $0x8] sm:$0xff]   ;;  %vm1178_vm0 = vcmask 1041409   ;;  %vm1181_vm1 = vcmask 1042434  }
  0xdf   : > { %v3803_v2 = vld [vmem:[%s834_s4 + $0x10] sm:$0xff]   ;;  %v4860_v3 = vunpack.c.h.bf16 %v3787_v0  ;;  %v4862_v4 = vunpack.c.l.bf16 %v3787_v0  ;;  %v4864_v5 = vunpack.c.l.bf16 %v3802_v1  ;;  %v4866_v6 = vunpack.c.h.bf16 %v3802_v1  ;;  %v3804_v7 = vld [vmem:[%s834_s4 + $0x18] sm:$0xff]   ;;  %p963_p9 = scmp.lt.s32.totalorder %s4437_s24, 1  ;;  %s5638_s5 = sld [smem:[#allocation23_spill]] }
  0xe0   : > { %v4868_v8 = vunpack.c.l.bf16 %v3803_v2  ;;  %v4870_v9 = vunpack.c.h.bf16 %v3803_v2  ;;  %v4872_v10 = vunpack.c.l.bf16 %v3804_v7  ;;  %v4876_v12 = vunpack.c.h.bf16 %v3804_v7  ;;  %s5639_s26 = sld [smem:[#allocation24_spill]] }
  0xe1   : > { %1046 = vadd.xlane.f32.xlu1 %v4860_v3  ;;  %v1177_v11 = vrot.slane %v4860_v3, 7  ;;  %v1180_v13 = vrot.slane %v4864_v5, 6  ;;  %v1183_v14 = vrot.slane %v4866_v6, 5  ;;  %vm1184_vm2 = vcmask 1043459   ;;  %s5002_s27 = scalar_select %p963_p9, %s4437_s24, 1 }
  0xe2   : > { %v1186_v15 = vrot.slane %v4868_v8, 4  ;;  %vm1187_vm3 = vcmask 1044484   ;;  %v1189_v17 = vrot.slane %v4870_v9, 3  ;;  %vm1190_vm4 = vcmask 1045509   ;;  %s5640_s0 = sld [smem:[#allocation25_spill]] }
  0xe3   : > { %v1179_v16 = vsel %vm1178_vm0, %v1177_v11, %v4862_v4  ;;  %v1192_v19 = vrot.slane %v4872_v10, 2  ;;  %vm1193_vm5 = vcmask 1046534   ;;  %v1195_v21 = vrot.slane %v4876_v12, 1  ;;  %s3666_s29 = sshll.u32 %s5002_s27, 3  ;;  %s3667_s10 = sshll.u32 %s5002_s27, 1 }
  0xe4   : > { %v1182_v18 = vsel %vm1181_vm1, %v1180_v13, %v1179_v16  ;;  %vm1196_vm6 = vcmask 1047559   ;;  %vm4460_vm7 = vmmov 0   ;;  %s5641_s4 = sld [smem:[#allocation27_spill]]  ;;  %vm1990_vm8 = vcmask 64512  }
  0xe5   : > { %1048 = vadd.xlane.f32.xlu1 %v4864_v5  ;;  %v1185_v20 = vsel %vm1184_vm2, %v1183_v14, %v1182_v18  ;;  %s5008_s8 = scalar_lea.vmem %s5638_s5, %s3666_s29  ;;  %s5642_s5 = sld [smem:[#allocation28_spill]] }
  0xe6   : > { %v1188_v22 = vsel %vm1187_vm3, %v1186_v15, %v1185_v20  ;;  %s973_s19 = scalar_lea.vmem %s5639_s26, %s5002_s27  ;;  %s5643_s26 = sld [smem:[#allocation30_spill]] }
  0xe7   : > { %v1191_v23 = vsel %vm1190_vm4, %v1189_v17, %v1188_v22  ;;  %s5647_s28 = sld [smem:[#allocation34_spill]] }
  0xe8   : > { %v1194_v24 = vsel %vm1193_vm5, %v1192_v19, %v1191_v23  ;;  %s976_s16 = scalar_lea.vmem %s5640_s0, %s5002_s27  ;;  %s5644_s0 = sld [smem:[#allocation31_spill]] }
  0xe9   : > { %1052 = vadd.xlane.f32.xlu1 %v4868_v8  ;;  %v1197_v25 = vsel %vm1196_vm6, %v1195_v21, %v1194_v24  ;;  %s5648_s1 = sld [smem:[#allocation35_spill]] }
  0xea   : > { %1199 = vadd.xlane.f32.xlu0 %v1197_v25  ;;  %s980_s29 = scalar_lea.vmem %s5641_s4, %s3667_s10  ;;  %s5645_s4 = sld [smem:[#allocation32_spill]] }
  0xeb   : > { %s983_s15 = scalar_lea.vmem %s5642_s5, %s5002_s27  ;;  %s5646_s5 = sld [smem:[#allocation33_spill]] }
  0xec   : > { %s5649_s17 = sld [smem:[#allocation36_spill]] }
  0xed   : > { %1056 = vadd.xlane.f32.xlu1 %v4872_v10  ;;  %s5650_s9 = sld [smem:[#allocation37_spill]] }
  0xee   : > { %1044 = vadd.xlane.f32.xlu0 %v4862_v4  ;;  %s5651_s3 = sld [smem:[#allocation38_spill]] }
  0xf2   : > { %1050 = vadd.xlane.f32.xlu0 %v4866_v6 }
  0xf6   : > { %1054 = vadd.xlane.f32.xlu0 %v4870_v9 }
  0xfa   : > { %1058 = vadd.xlane.f32.xlu0 %v4876_v12 }
 0x16a   : > { %v1047_v26 = vpop.xlane.xlu1 %1046 }
 0x16b   : > { %v1062_v27 = vmul.f32 0.0078125, %v1047_v26 }
 0x16d   : > { %v4900_v28 = vsub.f32 %v4860_v3, %v1062_v27 }
 0x16e   : > { %v1049_v29 = vpop.xlane.xlu1 %1048 }
 0x16f   : > { %v1063_v30 = vmul.f32 0.0078125, %v1049_v29  ;;  %v1078_v31 = vmul.f32 %v4900_v28, %v4900_v28  ;;  %v4023_v29 = vld [vmem:[#allocation5 + $0x74] ss:$8 sps:$4 sm:$0xff]  }
 0x170   : > { %1434 = vmatprep.subr.bf16.mxu0 %v4023_v29 }
 0x171   : > { %v4905_v32 = vsub.f32 %v4864_v5, %v1063_v30  ;;  %1087 = vadd.xlane.f32.xlu0 %v1078_v31  ;;  %v4025_v31 = vld [vmem:[#allocation5 + $0x70] ss:$8 sps:$4 sm:$0xff]  }
 0x172   : > { %v1053_v33 = vpop.xlane.xlu1 %1052  ;;  %1435 = vmatpush1.bf16.msra.mxu0 %v4025_v31 }
 0x173   : > { %v1065_v34 = vmul.f32 0.0078125, %v1053_v33  ;;  %v1200_v35 = vpop.xlane.xlu0 %1199  ;;  %v1079_v36 = vmul.f32 %v4905_v32, %v4905_v32 }
 0x174   : > { %v1201_v37 = vmul.f32 0.0078125, %v1200_v35 }
 0x175   : > { %v4910_v38 = vsub.f32 %v4868_v8, %v1065_v34  ;;  %1089 = vadd.xlane.f32.xlu0 %v1079_v36  ;;  %v4026_v36 = vld [vmem:[#allocation5 + $0x64] ss:$8 sps:$4 sm:$0xff]  }
 0x176   : > { %v1057_v39 = vpop.xlane.xlu1 %1056  ;;  %v1203_v40 = vrot.slane %v1201_v37, 1  ;;  %v1204_v41 = vrot.slane %v1201_v37, 2  ;;  %v1205_v42 = vrot.slane %v1201_v37, 3  ;;  %v1206_v43 = vrot.slane %v1201_v37, 4  ;;  %1436 = vmatprep.subr.bf16.mxu0 %v4026_v36 }
 0x177   : > { %v1067_v44 = vmul.f32 0.0078125, %v1057_v39  ;;  %v1045_v45 = vpop.xlane.xlu0 %1044  ;;  %v1081_v46 = vmul.f32 %v4910_v38, %v4910_v38  ;;  %v1207_v47 = vrot.slane %v1201_v37, 5  ;;  %v1208_v48 = vrot.slane %v1201_v37, 6 }
 0x178   : > { %v1061_v49 = vmul.f32 0.0078125, %v1045_v45  ;;  %v1209_v50 = vrot.slane %v1201_v37, 7  ;;  %v4915_v51 = vsub.f32 %v4862_v4, %v1201_v37  ;;  %v4918_v52 = vsub.f32 %v4860_v3, %v1203_v40  ;;  %v4028_v37 = vld [vmem:[#allocation5 + $0x60] ss:$8 sps:$4 sm:$0xff]   ;;  %v4035_v45 = vld [vmem:[#allocation5 + $0x34] ss:$8 sps:$4 sm:$0xff]  }
 0x179   : > { %v4921_v53 = vsub.f32 %v4872_v10, %v1067_v44  ;;  %1093 = vadd.xlane.f32.xlu0 %v1081_v46  ;;  %v4924_v54 = vsub.f32 %v4864_v5, %v1204_v41  ;;  %v4927_v55 = vsub.f32 %v4866_v6, %v1205_v42  ;;  %v4930_v56 = vsub.f32 %v4868_v8, %v1206_v43  ;;  %v4029_v41 = vld [vmem:[#allocation5 + $0x54] ss:$8 sps:$4 sm:$0xff]   ;;  %v4031_v42 = vld [vmem:[#allocation5 + $0x50] ss:$8 sps:$4 sm:$0xff]   ;;  %v4034_v44 = vld [vmem:[#allocation5 + $0x40] ss:$8 sps:$4 sm:$0xff]  }
 0x17a   : > { %v4933_v57 = vsub.f32 %v4862_v4, %v1061_v49  ;;  %v4936_v58 = vsub.f32 %v4870_v9, %v1207_v47  ;;  %v4939_v59 = vsub.f32 %v4872_v10, %v1208_v48  ;;  %v4944_v62 = vsub.f32 %v4876_v12, %v1209_v50  ;;  %1437 = vmatpush1.bf16.msra.mxu0 %v4028_v37  ;;  %v4038_v46 = vld [vmem:[#allocation5 + $0x24] ss:$8 sps:$4 sm:$0xff]   ;;  %v4040_v47 = vld [vmem:[#allocation5 + $0x20] ss:$8 sps:$4 sm:$0xff]   ;;  %v4041_v48 = vld [vmem:[#allocation7 + $0x38] sm:$0xff]  }
 0x17b   : > { %v1083_v60 = vmul.f32 %v4921_v53, %v4921_v53  ;;  %v1051_v61 = vpop.xlane.xlu0 %1050  ;;  %v1227_v63 = vmul.f32 %v4918_v52, %v4918_v52  ;;  %v1228_v0 = vmul.f32 %v4924_v54, %v4924_v54  ;;  %v1229_v2 = vmul.f32 %v4927_v55, %v4927_v55  ;;  %1438 = vmatprep.subr.bf16.mxu0 %v4029_v41  ;;  %v4042_v50 = vld [vmem:[#allocation5 + $0x14] ss:$8 sps:$4 sm:$0xff]  }
 0x17c   : > { %v1077_v1 = vmul.f32 %v4933_v57, %v4933_v57  ;;  %v1230_v3 = vmul.f32 %v4930_v56, %v4930_v56  ;;  %v1226_v4 = vmul.f32 %v4915_v51, %v4915_v51  ;;  %v1231_v5 = vmul.f32 %v4936_v58, %v4936_v58 }
 0x17d   : > { %1097 = vadd.xlane.f32.xlu0 %v1083_v60  ;;  %v1242_v7 = vrot.slane %v1227_v63, 7  ;;  %v1064_v8 = vmul.f32 0.0078125, %v1051_v61  ;;  %v1232_v10 = vmul.f32 %v4939_v59, %v4939_v59  ;;  %v1244_v11 = vrot.slane %v1228_v0, 6  ;;  %v4044_v60 = vld [vmem:[#allocation5 + $0x10] ss:$8 sps:$4 sm:$0xff]  }
 0x17e   : > { %1085 = vadd.xlane.f32.xlu1 %v1077_v1  ;;  %v1233_v13 = vmul.f32 %v4944_v62, %v4944_v62  ;;  %v1246_v15 = vrot.slane %v1229_v2, 5  ;;  %v1248_v18 = vrot.slane %v1230_v3, 4  ;;  %v1250_v20 = vrot.slane %v1231_v5, 3  ;;  %1439 = vmatpush1.bf16.msra.mxu0 %v4031_v42  ;;  %v4045_v61 = vld [vmem:[#allocation7 + $0x30] sm:$0xff]   ;;  %v4046_v63 = vld [vmem:[#allocation5 + $0x4] ss:$8 sps:$4 sm:$0xff]  }
 0x17f   : > { %v1243_v14 = vsel %vm1178_vm0, %v1242_v7, %v1226_v4  ;;  %v1055_v16 = vpop.xlane.xlu0 %1054  ;;  %v4968_v21 = vsub.f32 %v4866_v6, %v1064_v8  ;;  %v1252_v23 = vrot.slane %v1232_v10, 2  ;;  %v4458_v49 = vmov 0.0   ;;  %v4048_v0 = vld [vmem:[#allocation5] ss:$8 sps:$4 sm:$0xff]   ;;  %v4051_v4 = vld [vmem:[#allocation7 + $0x18] sm:$0xff]   ;;  %v4052_v5 = vld [vmem:[#allocation7 + $0x10] sm:$0xff]  }
 0x180   : > { %v1245_v17 = vsel %vm1181_vm1, %v1244_v11, %v1243_v14  ;;  %v1066_v24 = vmul.f32 0.0078125, %v1055_v16  ;;  %v1254_v26 = vrot.slane %v1233_v13, 1  ;;  %3854 = vmatprep.subr.bf16.mxu1 %v4458_v49  ;;  %v4049_v1 = vld [vmem:[#allocation7 + $0x28] sm:$0xff]   ;;  %v4459_v2 = vmov 0   ;;  %v4050_v3 = vld [vmem:[#allocation7 + $0x20] sm:$0xff]   ;;  %3870 = vmatprep.mubr.msk.bf16.mxu1 %vm4460_vm7, %v4458_v49 }
 0x181   : > { %v1247_v19 = vsel %vm1184_vm2, %v1246_v15, %v1245_v17  ;;  %v1080_v6 = vmul.f32 %v4968_v21, %v4968_v21  ;;  %3855 = vmatpush3.bf16.msra.mxu1 %v4041_v48  ;;  %1466 = vmatprep.mubr.bf16.mxu0 %v4459_v2  ;;  %v4053_v7 = vld [vmem:[#allocation7 + $0x8] sm:$0xff]   ;;  %v4054_v8 = vld [vmem:[#allocation7] sm:$0xff]   ;;  %v1320_v10 = vlaneseq }
 0x182   : > { %v1249_v22 = vsel %vm1187_vm3, %v1248_v18, %v1247_v19  ;;  %v4975_v34 = vsub.f32 %v4870_v9, %v1066_v24  ;;  %v4032_v9 = vld [vmem:[#allocation5 + $0x44] ss:$8 sps:$4 sm:$0xff]   ;;  %3856 = vmatprep.subr.bf16.mxu1 %v4458_v49  ;;  %4021 = vset.pattern.permute.xlu0 %v4459_v2  ;;  %v1019_v11 = vld [vmem:[%s5008_s8 + $0x1] sm:$0x1]  ;;  %v1020_v14 = vld [vmem:[%s5008_s8 + $0x2] sm:$0x1] }
 0x183   : > { %v1251_v25 = vsel %vm1190_vm4, %v1250_v20, %v1249_v22  ;;  %v1059_v27 = vpop.xlane.xlu0 %1058  ;;  %1440 = vmatprep.subr.bf16.mxu0 %v4032_v9  ;;  %4022 = vset.pattern.permute.xlu1 %v4459_v2  ;;  %v5012_v13 = vshrl.u32 %v1320_v10, 7  ;;  %v1027_v15 = vunpack.c.l.bf16 %v1019_v11  ;;  %v1018_v16 = vld [vmem:[%s5008_s8] sm:$0x1]  ;;  %v1028_v18 = vunpack.c.l.bf16 %v1020_v14  ;;  %v1021_v20 = vld [vmem:[%s5008_s8 + $0x3] sm:$0x1] }
 0x184   : > { %v1253_v30 = vsel %vm1193_vm5, %v1252_v23, %v1251_v25  ;;  %v1068_v35 = vmul.f32 0.0078125, %v1059_v27  ;;  %v1082_v40 = vmul.f32 %v4975_v34, %v4975_v34  ;;  %1441 = vmatpush1.bf16.msra.mxu0 %v4034_v44  ;;  %v1026_v19 = vunpack.c.l.bf16 %v1018_v16 }
 0x185   : > { %v1255_v33 = vsel %vm1196_vm6, %v1254_v26, %v1253_v30  ;;  %1442 = vmatprep.subr.bf16.mxu0 %v4035_v45  ;;  %3857 = vmatpush3.bf16.msra.mxu1 %v4045_v61  ;;  %v5017_v17 = vsub.s32 0, %v5012_v13  ;;  %v1029_v25 = vunpack.c.l.bf16 %v1021_v20  ;;  %v1023_v26 = vld [vmem:[%s5008_s8 + $0x5] sm:$0x1] }
 0x186   : > { %1257 = vadd.xlane.f32.xlu1 %v1255_v33  ;;  %v4980_v39 = vsub.f32 %v4876_v12, %v1068_v35  ;;  %v4037_v12 = vld [vmem:[#allocation5 + $0x30] ss:$8 sps:$4 sm:$0xff]   ;;  %3858 = vmatprep.subr.bf16.mxu1 %v4458_v49  ;;  %v1031_v29 = vunpack.c.l.bf16 %v1023_v26 }
 0x187   : > { %v1851_v22 = vrot.slane %v1027_v15, %v5017_v17  ;;  %v1847_v23 = vrot.slane %v1026_v19, %v5017_v17  ;;  %v1855_v24 = vrot.slane %v1028_v18, %v5017_v17  ;;  %v1859_v27 = vrot.slane %v1029_v25, %v5017_v17 }
 0x188   : > { %v1084_v43 = vmul.f32 %v4980_v39, %v4980_v39  ;;  %1443 = vmatpush1.bf16.msra.mxu0 %v4037_v12  ;;  %v1867_v30 = vrot.slane %v1031_v29, %v5017_v17 }
 0x189   : > { %1444 = vmatprep.subr.bf16.mxu0 %v4038_v46  ;;  %3859 = vmatpush3.bf16.msra.mxu1 %v4049_v1 }
 0x18a   : > { %1091 = vadd.xlane.f32.xlu1 %v1080_v6  ;;  %3860 = vmatprep.subr.bf16.mxu1 %v4458_v49 }
 0x18c   : > { %1445 = vmatpush1.bf16.msra.mxu0 %v4040_v47 }
 0x18d   : > { %1446 = vmatprep.subr.bf16.mxu0 %v4042_v50  ;;  %3861 = vmatpush3.bf16.msra.mxu1 %v4050_v3  ;;  %v5031_v3 = vld [vmem:[%s973_s19] ss:$0 sm:$0xff]  ;;  %s986_s19 = scalar_lea.vmem %s5643_s26, %s5002_s27  ;;  %s999_s26 = scalar_lea.vmem %s5647_s28, %s5002_s27 }
 0x18e   : > { %1095 = vadd.xlane.f32.xlu1 %v1082_v40  ;;  %3862 = vmatprep.subr.bf16.mxu1 %v4458_v49 }
 0x190   : > { %1447 = vmatpush1.bf16.msra.mxu0 %v4044_v60 }
 0x191   : > { %1448 = vmatprep.subr.bf16.mxu0 %v4046_v63  ;;  %3863 = vmatpush3.bf16.msra.mxu1 %v4051_v4 }
 0x192   : > { %1099 = vadd.xlane.f32.xlu1 %v1084_v43  ;;  %3864 = vmatprep.subr.bf16.mxu1 %v4458_v49 }
 0x193   : > { %1877 = vbcast.lane.b32.xlu0 %v1847_v23, 256 }
 0x194   : > { %1449 = vmatpush1.bf16.msra.mxu0 %v4048_v0 }
 0x195   : > { %3874 = vmatprep.subr.bf16.mxu0 %v4458_v49  ;;  %3865 = vmatpush3.bf16.msra.mxu1 %v4052_v5 }
 0x196   : > { %3866 = vmatprep.subr.bf16.mxu1 %v4458_v49 }
 0x199   : > { %3867 = vmatpush3.bf16.msra.mxu1 %v4053_v7 }
 0x19a   : > { %3868 = vmatprep.subr.bf16.mxu1 %v4458_v49 }
 0x19d   : > { %3869 = vmatpush3.bf16.msra.mxu1 %v4054_v8 }
 0x1a3   : > { %1880 = vbcast.lane.b32.xlu1 %v1851_v22, 256 }
 0x1a7   : > { %1883 = vbcast.lane.b32.xlu1 %v1855_v24, 256 }
 0x1ab   : > { %1886 = vbcast.lane.b32.xlu1 %v1859_v27, 256 }
 0x1af   : > { %1892 = vbcast.lane.b32.xlu1 %v1867_v30, 256 }
 0x1fa   : > { %v1088_v31 = vpop.xlane.xlu0 %1087 }
 0x1fb   : > { %v1102_v33 = vmul.f32 0.0078125, %v1088_v31 }
 0x1fd   : > { %v1110_v36 = vadd.f32 1e-12, %v1102_v33 }
 0x1fe   : > { %v1090_v6 = vpop.xlane.xlu0 %1089 }
 0x1ff   : > { %v1103_v35 = vmul.f32 0.0078125, %v1090_v6  ;;  %4111 = vrsqrt.f32 %v1110_v36 }
 0x201   : > { %v1111_v37 = vadd.f32 1e-12, %v1103_v35 }
 0x202   : > { %v1094_v40 = vpop.xlane.xlu0 %1093 }
 0x203   : > { %4113 = vrsqrt.f32 %v1111_v37  ;;  %v1105_v9 = vmul.f32 0.0078125, %v1094_v40 }
 0x205   : > { %v1113_v44 = vadd.f32 1e-12, %v1105_v9 }
 0x206   : > { %v1098_v60 = vpop.xlane.xlu0 %1097 }
 0x207   : > { %v1086_v41 = vpop.xlane.xlu1 %1085  ;;  %v1107_v4 = vmul.f32 0.0078125, %v1098_v60 }
 0x208   : > { %v1101_v42 = vmul.f32 0.0078125, %v1086_v41 }
 0x209   : > { %v1115_v18 = vadd.f32 1e-12, %v1107_v4 }
 0x20a   : > { %v1109_v43 = vadd.f32 1e-12, %v1101_v42 }
 0x20c   : > { %4115 = vrsqrt.f32 %v1109_v43  ;;  %v4112_v47 = vpop.eup %4111 }
 0x20d   : > { %4117 = vrsqrt.f32 %v1113_v44  ;;  %v1126_v0 = vmul.f32 %v4112_v47, %v4900_v28  ;;  %v5040_v28 = vld [vmem:[%s976_s16] ss:$0 sm:$0xff]  ;;  %s989_s16 = scalar_lea.vmem %s5644_s0, %s5002_s27  ;;  %s1002_s0 = scalar_lea.vmem %s5648_s1, %s5002_s27 }
 0x20f   : > { %v1258_v45 = vpop.xlane.xlu1 %1257  ;;  %v1140_v15 = vmul.f32 %v5031_v3, %v1126_v0 }
 0x210   : > { %v1259_v12 = vmul.f32 0.0078125, %v1258_v45  ;;  %v4114_v61 = vpop.eup %4113 }
 0x211   : > { %v1127_v8 = vmul.f32 %v4114_v61, %v4905_v32  ;;  %v1154_v32 = vadd.f32 %v5040_v28, %v1140_v15 }
 0x212   : > { %v1260_v46 = vadd.f32 1e-12, %v1259_v12 }
 0x213   : > { %v1092_v48 = vpop.xlane.xlu1 %1091  ;;  %v1141_v22 = vmul.f32 %v5031_v3, %v1127_v8 }
 0x214   : > { %4119 = vrsqrt.f32 %v1260_v46  ;;  %v1104_v50 = vmul.f32 0.0078125, %v1092_v48 }
 0x215   : > { %v1155_v27 = vadd.f32 %v5040_v28, %v1141_v22 }
 0x216   : > { %v1112_v63 = vadd.f32 1e-12, %v1104_v50 }
 0x217   : > { %v1096_v1 = vpop.xlane.xlu1 %1095 }
 0x218   : > { %4121 = vrsqrt.f32 %v1112_v63  ;;  %v1106_v5 = vmul.f32 0.0078125, %v1096_v1 }
 0x219   : > { %v4116_v7 = vpop.eup %4115 }
 0x21a   : > { %v1114_v11 = vadd.f32 1e-12, %v1106_v5  ;;  %v1125_v14 = vmul.f32 %v4116_v7, %v4933_v57  ;;  %v4118_v23 = vpop.eup %4117 }
 0x21b   : > { %v1100_v16 = vpop.xlane.xlu1 %1099  ;;  %v1129_v29 = vmul.f32 %v4118_v23, %v4910_v38 }
 0x21c   : > { %4123 = vrsqrt.f32 %v1114_v11  ;;  %v1108_v19 = vmul.f32 0.0078125, %v1100_v16  ;;  %v1139_v20 = vmul.f32 %v5031_v3, %v1125_v14 }
 0x21d   : > { %4125 = vrsqrt.f32 %v1115_v18 }
 0x21e   : > { %v1116_v24 = vadd.f32 1e-12, %v1108_v19  ;;  %v1153_v25 = vadd.f32 %v5040_v28, %v1139_v20 }
 0x220   : > { %v3774_v57 = vpack.c.bf16 %v1154_v32, %v1153_v25  ;;  %4127 = vrsqrt.f32 %v1116_v24 }
 0x221   : > { %v4120_v26 = vpop.eup %4119 }
 0x222   : > { %1467 = vmatmul.mubr.bf16.vlgmr.msra.gmra.mxu0 %v3774_v57  ;;  %v1263_v30 = vrot.slane %v4120_v26, 1  ;;  %v1264_v31 = vrot.slane %v4120_v26, 2  ;;  %v1265_v33 = vrot.slane %v4120_v26, 3  ;;  %v1266_v6 = vrot.slane %v4120_v26, 4 }
 0x223   : > { %1476 = vmatprep.mubr.bf16.mxu0 %v4459_v2  ;;  %v1267_v35 = vrot.slane %v4120_v26, 5  ;;  %v1268_v36 = vrot.slane %v4120_v26, 6  ;;  %v1269_v37 = vrot.slane %v4120_v26, 7  ;;  %v1278_v40 = vmul.f32 %v4120_v26, %v4915_v51 }
 0x224   : > { %v1279_v41 = vmul.f32 %v1263_v30, %v4918_v52  ;;  %v1280_v42 = vmul.f32 %v1264_v31, %v4924_v54  ;;  %v1281_v9 = vmul.f32 %v1265_v33, %v4927_v55  ;;  %v1282_v38 = vmul.f32 %v1266_v6, %v4930_v56 }
 0x225   : > { %v4122_v43 = vpop.eup %4121  ;;  %v1283_v44 = vmul.f32 %v1267_v35, %v4936_v58  ;;  %v1284_v45 = vmul.f32 %v1268_v36, %v4939_v59  ;;  %v1285_v12 = vmul.f32 %v1269_v37, %v4944_v62  ;;  %v1286_v46 = vmul.f32 %v5031_v3, %v1278_v40 }
 0x226   : > { %v1128_v47 = vmul.f32 %v4122_v43, %v4968_v21  ;;  %v1287_v51 = vmul.f32 %v5031_v3, %v1279_v41  ;;  %v1288_v52 = vmul.f32 %v5031_v3, %v1280_v42  ;;  %v1289_v54 = vmul.f32 %v5031_v3, %v1281_v9 }
 0x227   : > { %v1290_v55 = vmul.f32 %v5031_v3, %v1282_v38  ;;  %v1291_v56 = vmul.f32 %v5031_v3, %v1283_v44  ;;  %v1292_v58 = vmul.f32 %v5031_v3, %v1284_v45  ;;  %v1293_v59 = vmul.f32 %v5031_v3, %v1285_v12 }
 0x228   : > { %v1142_v62 = vmul.f32 %v5031_v3, %v1128_v47  ;;  %v5068_v48 = vadd.f32 %v5040_v28, %v1286_v46  ;;  %v5071_v21 = vadd.f32 %v5040_v28, %v1287_v51  ;;  %v5074_v50 = vadd.f32 %v5040_v28, %v1288_v52 }
 0x229   : > { %v4124_v60 = vpop.eup %4123  ;;  %v5077_v61 = vadd.f32 %v5040_v28, %v1289_v54  ;;  %v5080_v63 = vadd.f32 %v5040_v28, %v1290_v55  ;;  %v5083_v0 = vadd.f32 %v5040_v28, %v1291_v56  ;;  %v5086_v1 = vadd.f32 %v5040_v28, %v1292_v58 }
 0x22a   : > { %v1156_v4 = vadd.f32 %v5040_v28, %v1142_v62  ;;  %v1130_v5 = vmul.f32 %v4124_v60, %v4975_v34  ;;  %v5091_v7 = vadd.f32 %v5040_v28, %v1293_v59  ;;  %v1555_v8 = vpack.c.bf16 %v5068_v48, %v5068_v48  ;;  %v4126_v22 = vpop.eup %4125 }
 0x22b   : > { %v1556_v11 = vpack.c.bf16 %v5071_v21, %v5071_v21  ;;  %v1557_v14 = vpack.c.bf16 %v5074_v50, %v5074_v50  ;;  %v1558_v15 = vpack.c.bf16 %v5077_v61, %v5077_v61  ;;  %v1559_v16 = vpack.c.bf16 %v5080_v63, %v5080_v63 }
 0x22c   : > { %v3775_v18 = vpack.c.bf16 %v1156_v4, %v1155_v27  ;;  %v1144_v34 = vmul.f32 %v5031_v3, %v1130_v5  ;;  %v1560_v19 = vpack.c.bf16 %v5083_v0, %v5083_v0  ;;  %v1561_v20 = vpack.c.bf16 %v5086_v1, %v5086_v1 }
 0x22d   : > { %v1562_v23 = vpack.c.bf16 %v5091_v7, %v5091_v7  ;;  %v1595_v24 = vunpack.c.l.b16 %v1556_v11  ;;  %v1596_v25 = vunpack.c.l.b16 %v1557_v14  ;;  %v4128_v32 = vpop.eup %4127  ;;  %v1143_v57 = vmul.f32 %v5031_v3, %v1129_v29 }
 0x22e   : > { %1477 = vmatmul.mubr.bf16.gmra.mxu0 %v3775_v18  ;;  %v1597_v26 = vunpack.c.l.b16 %v1558_v15  ;;  %v1598_v27 = vunpack.c.l.b16 %v1559_v16  ;;  %v1594_v30 = vunpack.c.l.b16 %v1555_v8  ;;  %v1599_v31 = vunpack.c.l.b16 %v1560_v19  ;;  %v1318_v19 = vld [vmem:[%s980_s29] sm:$0x3]  ;;  %s992_s29 = scalar_lea.vmem %s5645_s4, %s5002_s27  ;;  %s1005_s4 = scalar_lea.vmem %s5649_s17, %s5002_s27 }
 0x22f   : > { %1486 = vmatprep.mubr.bf16.mxu0 %v4459_v2  ;;  %v1602_v33 = vrot.slane %v1595_v24, 7  ;;  %v1604_v6 = vrot.slane %v1596_v25, 6  ;;  %v1158_v35 = vadd.f32 %v5040_v28, %v1144_v34  ;;  %v1600_v36 = vunpack.c.l.b16 %v1561_v20 }
 0x230   : > { %v1601_v37 = vunpack.c.l.b16 %v1562_v23  ;;  %v1606_v41 = vrot.slane %v1597_v26, 5  ;;  %v1132_v42 = vmul.f32 %v4128_v32, %v4980_v39  ;;  %v1157_v9 = vadd.f32 %v5040_v28, %v1143_v57 }
 0x231   : > { %v1603_v40 = vsel %vm1178_vm0, %v1602_v33, %v1594_v30  ;;  %v1608_v38 = vrot.slane %v1598_v27, 4  ;;  %v1131_v43 = vmul.f32 %v4126_v22, %v4921_v53  ;;  %v1610_v45 = vrot.slane %v1599_v31, 3  ;;  %v3699_v30 = vld [vmem:[%s983_s15] ss:$0 sm:$0xff]  ;;  %s996_s15 = scalar_lea.vmem %s5646_s5, %s3667_s10  ;;  %s1008_s5 = scalar_lea.vmem %s5650_s9, %s5002_s27 }
 0x232   : > { %v1605_v29 = vsel %vm1181_vm1, %v1604_v6, %v1603_v40  ;;  %v3776_v12 = vpack.c.bf16 %v1158_v35, %v1157_v9  ;;  %v1612_v47 = vrot.slane %v1600_v36, 2  ;;  %v1146_v51 = vmul.f32 %v5031_v3, %v1132_v42  ;;  %s3764_s10 = sshll.u32 %s4437_s24, 7  ;;  %s3314_s27 = scalar_lea.sflag [#allocation4], %s4840_s11 }
 0x233   : > { %v1607_v44 = vsel %vm1184_vm2, %v1606_v41, %v1605_v29  ;;  %v1614_v39 = vrot.slane %v1601_v37, 1  ;;  %v1145_v55 = vmul.f32 %v5031_v3, %v1131_v43  ;;  %v1022_v3 = vld [vmem:[%s5008_s8 + $0x4] sm:$0x1]  ;;  %v4461_v16 = vmov 1966171168   ;;  %s5529_s1 = scalar_lea.hbm %s5651_s3, %s3764_s10 }
 0x234   : > { %v1609_v46 = vsel %vm1187_vm3, %v1608_v38, %v1607_v44  ;;  %v1160_v58 = vadd.f32 %v5040_v28, %v1146_v51  ;;  %v1030_v60 = vunpack.c.l.bf16 %v1022_v3  ;;  %v1709_v18 = vunpack.c.l.s4 %v4461_v16 }
 0x235   : > { %v1611_v52 = vsel %vm1190_vm4, %v1610_v45, %v1609_v46  ;;  %v1159_v59 = vadd.f32 %v5040_v28, %v1145_v55  ;;  %v1323_v24 = vrot.slane %v1318_v19, %v5017_v17 }
 0x236   : > { %1487 = vmatmul.mubr.bf16.gmra.mxu0 %v3776_v12  ;;  %v1613_v54 = vsel %vm1193_vm5, %v1612_v47, %v1611_v52  ;;  %v1863_v4 = vrot.slane %v1030_v60, %v5017_v17  ;;  %v1710_v23 = vunpack.c.0.s8 %v1709_v18 }
 0x237   : > { %v1615_v53 = vsel %vm1196_vm6, %v1614_v39, %v1613_v54  ;;  %1496 = vmatprep.mubr.bf16.mxu0 %v4459_v2  ;;  %v3777_v62 = vpack.c.bf16 %v1160_v58, %v1159_v59 }
 0x238   : > { %v1616_v56 = vpack.c.b16 %v1615_v53, %v1615_v53  ;;  %1889 = vbcast.lane.b32.xlu0 %v1863_v4, 256  ;;  %v1713_v31 = vsub.s32 %v1710_v23, %v5012_v13 }
 0x23a   : > { %3871 = vmatmul.mubr.bf16.vlgmr.msra.gmra.mxu1 %v1616_v56 }
 0x23b   : > { %2792 = vmatprep.mubr.bf16.mxu1 %v4459_v2  ;;  %v5140_v2 = vsub.s32 1, %v5012_v13 }
 0x23d   : > { %v1327_v20 = vrot.slane %v1318_v19, %v5140_v2 }
 0x23e   : > { %1497 = vmatmul.mubr.bf16.gmra.mxu0 %v3777_v62 }
 0x23f   : > { %3890 = vmatprep.mubr.msk.bf16.mxu0 %vm4460_vm7, %v4458_v49 }
 0x2e2   : > { %v1468_v5 = vpop.f32.mrf.mxu0 }
 0x2e3   : > { %v1469_v33 = vadd.f32 %v1468_v5, %v1323_v24 }
 0x2e4   : > { %v1470_v8 = vpop.f32.mrf.mxu0 }
 0x2e5   : > { %v1471_v32 = vadd.f32 %v1470_v8, %v1327_v20 }
 0x2e6   : > { %v1472_v11 = vpop.f32.mrf.mxu0 }
 0x2e7   : > { %v1473_v6 = vadd.f32 %v1472_v11, %v1323_v24  ;;  %v5149_v41 = vpack.c.bf16 %v1471_v32, %v1469_v33 }
 0x2e8   : > { %v1474_v14 = vpop.f32.mrf.mxu0 }
 0x2e9   : > { %v1475_v57 = vadd.f32 %v1474_v14, %v1327_v20  ;;  %v1756_v53 = vunpack.c.l.bf16 %v5149_v41 }
 0x2eb   : > { %v5151_v42 = vpack.c.bf16 %v1475_v57, %v1473_v6 }
 0x2ed   : > { %v1757_v56 = vunpack.c.l.bf16 %v5151_v42 }
 0x2ee   : > { %v1478_v15 = vpop.f32.mrf.mxu0 }
 0x2ef   : > { %v1479_v35 = vadd.f32 %v1478_v15, %v1323_v24 }
 0x2f0   : > { %v1480_v28 = vpop.f32.mrf.mxu0 }
 0x2f1   : > { %v1481_v26 = vadd.f32 %v1480_v28, %v1327_v20 }
 0x2f2   : > { %v1482_v34 = vpop.f32.mrf.mxu0 }
 0x2f3   : > { %v5153_v9 = vpack.c.bf16 %v1481_v26, %v1479_v35  ;;  %v1483_v39 = vadd.f32 %v1482_v34, %v1323_v24 }
 0x2f4   : > { %v1484_v22 = vpop.f32.mrf.mxu0 }
 0x2f5   : > { %v1485_v45 = vadd.f32 %v1484_v22, %v1327_v20  ;;  %v1758_v58 = vunpack.c.l.bf16 %v5153_v9 }
 0x2f6   : > { %v1488_v25 = vpop.f32.mrf.mxu0 }
 0x2f7   : > { %v5159_v4 = vpack.c.bf16 %v1485_v45, %v1483_v39  ;;  %v1489_v15 = vadd.f32 %v1488_v25, %v1323_v24 }
 0x2f8   : > { %v1490_v27 = vpop.f32.mrf.mxu0 }
 0x2f9   : > { %v1491_v59 = vadd.f32 %v1490_v27, %v1327_v20  ;;  %v1759_v25 = vunpack.c.l.bf16 %v5159_v4 }
 0x2fa   : > { %v1700_v36 = vpop.f32.mrf.mxu1  ;;  %v1492_v37 = vpop.f32.mrf.mxu0 }
 0x2fb   : > { %v1701_v40 = vadd.f32 %v3699_v30, %v1700_v36  ;;  %v1493_v34 = vadd.f32 %v1492_v37, %v1323_v24  ;;  %v5163_v57 = vpack.c.bf16 %v1491_v59, %v1489_v15 }
 0x2fc   : > { %v3872_v29 = vpop.f32.mrf.mxu1  ;;  %v1494_v38 = vpop.f32.mrf.mxu0 }
 0x2fd   : > { %v1707_v43 = vcombine.high %v1701_v40, %v1701_v40  ;;  %v1714_v44 = vrot.slane %v1701_v40, %v1713_v31  ;;  %v1495_v5 = vadd.f32 %v1494_v38, %v1327_v20 }
 0x2fe   : > { %v1703_v12 = vpop.f32.mrf.mxu1  ;;  %v1498_v46 = vpop.f32.mrf.mxu0 }
 0x2ff   : > { %v1721_v47 = vrot.slane %v1707_v43, %v1713_v31  ;;  %v1722_v51 = vcombine.high %v1714_v44, %v1714_v44  ;;  %v1730_v52 = vrot.slane %v1714_v44, %v1713_v31  ;;  %v1499_v19 = vadd.f32 %v1498_v46, %v1323_v24 }
 0x300   : > { %v3873_v54 = vpop.f32.mrf.mxu1  ;;  %v1500_v55 = vpop.f32.mrf.mxu0  ;;  %v5165_v33 = vpack.c.bf16 %v1495_v5, %v1493_v34 }
 0x301   : > { %v1723_v62 = vcombine.high %v1721_v47, %v1721_v47  ;;  %v1767_v3 = vrot.slane %v1730_v52, %v5017_v17  ;;  %v1744_v60 = vrot.slane %v1722_v51, %v1713_v31  ;;  %v1501_v8 = vadd.f32 %v1500_v55, %v1327_v20  ;;  %v1025_v55 = vld [vmem:[%s5008_s8 + $0x7] sm:$0x1]  ;;  %v1878_v5 = vpop.permute.xlu0 %1877 }
 0x302   : > { %v1502_v11 = vpop.f32.mrf.mxu0  ;;  %v1752_v14 = vcombine.high %v1730_v52, %v1730_v52  ;;  %v1737_v18 = vrot.slane %v1721_v47, %v1713_v31  ;;  %v1761_v44 = vunpack.c.l.bf16 %v5165_v33 }
 0x303   : > { %v1804_v28 = vmul.f32 %v1767_v3, %v1756_v53  ;;  %v1771_v16 = vrot.slane %v1744_v60, %v5017_v17  ;;  %v1754_v32 = vcombine.high %v1744_v60, %v1744_v60  ;;  %v1751_v30 = vrot.slane %v1723_v62, %v1713_v31  ;;  %v1024_v53 = vld [vmem:[%s5008_s8 + $0x6] sm:$0x1]  ;;  %v1881_v3 = vpop.permute.xlu1 %1880 }
 0x304   : > { %v1504_v22 = vpop.f32.mrf.mxu0  ;;  %v1775_v23 = vrot.slane %v1752_v14, %v5017_v17  ;;  %v5167_v6 = vpack.c.bf16 %v1501_v8, %v1499_v19  ;;  %v1503_v36 = vadd.f32 %v1502_v11, %v1323_v24  ;;  %v1783_v40 = vrot.slane %v1737_v18, %v5017_v17 }
 0x305   : > { %1812 = vadd.xlane.f32.xlu0 %v1804_v28  ;;  %v1505_v26 = vadd.f32 %v1504_v22, %v1327_v20  ;;  %v1805_v27 = vmul.f32 %v1771_v16, %v1757_v56  ;;  %v1779_v35 = vrot.slane %v1754_v32, %v5017_v17  ;;  %v1753_v29 = vcombine.high %v1737_v18, %v1737_v18  ;;  %v1890_v11 = vpop.permute.xlu0 %1889 }
 0x306   : > { %v1806_v37 = vmul.f32 %v1775_v23, %v1758_v58  ;;  %v1760_v31 = vunpack.c.l.bf16 %v5163_v57  ;;  %v1787_v43 = vrot.slane %v1751_v30, %v5017_v17  ;;  %v1762_v24 = vunpack.c.l.bf16 %v5167_v6 }
 0x307   : > { %1814 = vadd.xlane.f32.xlu1 %v1805_v27  ;;  %v5172_v38 = vpack.c.bf16 %v1505_v26, %v1503_v36  ;;  %v1807_v20 = vmul.f32 %v1779_v35, %v1759_v25  ;;  %v1791_v12 = vrot.slane %v1753_v29, %v5017_v17  ;;  %v1755_v46 = vcombine.high %v1751_v30, %v1751_v30  ;;  %v1884_v60 = vpop.permute.xlu1 %1883 }
 0x308   : > { %v1808_v45 = vmul.f32 %v1783_v40, %v1760_v31  ;;  %v1809_v47 = vmul.f32 %v1787_v43, %v1761_v44  ;;  %v1033_v56 = vunpack.c.l.bf16 %v1025_v55  ;;  %v1032_v58 = vunpack.c.l.bf16 %v1024_v53 }
 0x309   : > { %1816 = vadd.xlane.f32.xlu0 %v1806_v37  ;;  %v1763_v51 = vunpack.c.l.bf16 %v5172_v38  ;;  %v1810_v52 = vmul.f32 %v1791_v12, %v1762_v24  ;;  %v1795_v39 = vrot.slane %v1755_v46, %v5017_v17 }
 0x30a   : > { %v1875_v59 = vrot.slane %v1033_v56, %v5017_v17  ;;  %v1871_v62 = vrot.slane %v1032_v58, %v5017_v17 }
 0x30b   : > { %1818 = vadd.xlane.f32.xlu1 %v1807_v20  ;;  %v1811_v54 = vmul.f32 %v1795_v39, %v1763_v51  ;;  %v1887_v8 = vpop.permute.xlu1 %1886 }
 0x30d   : > { %1820 = vadd.xlane.f32.xlu0 %v1808_v45 }
 0x30f   : > { %1822 = vadd.xlane.f32.xlu1 %v1809_v47  ;;  %v1893_v14 = vpop.permute.xlu1 %1892  ;;  %v1949_v47 = vand.u32 127, %v1320_v10 }
 0x311   : > { %1824 = vadd.xlane.f32.xlu0 %v1810_v52  ;;  %v5211_v51 = vsub.s32 %v1949_v47, %v5012_v13 }
 0x313   : > { %1826 = vadd.xlane.f32.xlu1 %v1811_v54 }
 0x324   : > { %1898 = vbcast.lane.b32.xlu1 %v1875_v59, 256 }
 0x327   : > { %1895 = vbcast.lane.b32.xlu0 %v1871_v62, 256 }
 0x38e   : > { %v1813_v15 = vpop.xlane.xlu0 %1812 }
 0x38f   : > { %v1828_v28 = vmul.f32 0.088388346, %v1813_v15 }
 0x390   : > { %v1815_v16 = vpop.xlane.xlu1 %1814 }
 0x391   : > { %v5185_v18 = vadd.f32 %v1878_v5, %v1828_v28  ;;  %v1829_v34 = vmul.f32 0.088388346, %v1815_v16 }
 0x392   : > { %v1817_v19 = vpop.xlane.xlu0 %1816 }
 0x393   : > { %v5187_v22 = vadd.f32 %v1881_v3, %v1829_v34  ;;  %v1830_v23 = vmul.f32 0.088388346, %v1817_v19  ;;  %1925 = vperm.xlu0 %4021, %v5185_v18  }
 0x394   : > { %v1819_v32 = vpop.xlane.xlu1 %1818 }
 0x395   : > { %v1831_v26 = vmul.f32 0.088388346, %v1819_v32  ;;  %1928 = vperm.xlu1 %4022, %v5187_v22   ;;  %v5191_v30 = vadd.f32 %v1884_v60, %v1830_v23 }
 0x396   : > { %v1821_v27 = vpop.xlane.xlu0 %1820 }
 0x397   : > { %v5193_v25 = vadd.f32 %v1887_v8, %v1831_v26  ;;  %v1832_v35 = vmul.f32 0.088388346, %v1821_v27  ;;  %v2005_v27 = vsub.s32 2, %v5012_v13 }
 0x398   : > { %v1823_v36 = vpop.xlane.xlu1 %1822 }
 0x399   : > { %v1833_v37 = vmul.f32 0.088388346, %v1823_v36  ;;  %1934 = vperm.xlu0 %4021, %v5193_v25   ;;  %1931 = vperm.xlu1 %4022, %v5191_v30   ;;  %v5197_v29 = vadd.f32 %v1890_v11, %v1832_v35 }
 0x39a   : > { %v1825_v40 = vpop.xlane.xlu0 %1824 }
 0x39b   : > { %v5199_v20 = vadd.f32 %v1893_v14, %v1833_v37  ;;  %v1834_v43 = vmul.f32 0.088388346, %v1825_v40  ;;  %v2009_v40 = vsub.s32 3, %v5012_v13 }
 0x39c   : > { %v1827_v31 = vpop.xlane.xlu1 %1826 }
 0x39d   : > { %1940 = vperm.xlu0 %4021, %v5199_v20   ;;  %1937 = vperm.xlu1 %4022, %v5197_v29   ;;  %v1835_v45 = vmul.f32 0.088388346, %v1827_v31 }
 0x39e   : > { %v1896_v44 = vpop.permute.xlu0 %1895 }
 0x39f   : > { %v5203_v24 = vadd.f32 %v1896_v44, %v1834_v43 }
 0x3a0   : > { %v1899_v12 = vpop.permute.xlu1 %1898 }
 0x3a1   : > { %v5205_v46 = vadd.f32 %v1899_v12, %v1835_v45  ;;  %1943 = vperm.xlu1 %4022, %v5203_v24   ;;  %v2013_v12 = vsub.s32 4, %v5012_v13 }
 0x3a3   : > { %1946 = vperm.xlu0 %4021, %v5205_v46  }
 0x40e   : > { %v1926_v52 = vpop.permute.xlu0 %1925 }
 0x40f   : > { %v1953_v55 = vrot.slane %v1926_v52, %v5211_v51 }
 0x410   : > { %v1929_v39 = vpop.permute.xlu1 %1928 }
 0x411   : > { %v1957_v54 = vrot.slane %v1929_v39, %v5211_v51 }
 0x413   : > { %v1982_v59 = vsel %vm1178_vm0, %v1957_v54, %v1953_v55  ;;  %v2017_v54 = vsub.s32 5, %v5012_v13 }
 0x414   : > { %v1932_v53 = vpop.permute.xlu1 %1931  ;;  %v1935_v56 = vpop.permute.xlu0 %1934 }
 0x415   : > { %v1961_v58 = vrot.slane %v1932_v53, %v5211_v51  ;;  %v1965_v62 = vrot.slane %v1935_v56, %v5211_v51 }
 0x417   : > { %v1983_v3 = vsel %vm1181_vm1, %v1961_v58, %v1982_v59  ;;  %v2025_v59 = vsub.s32 7, %v5012_v13 }
 0x418   : > { %v1938_v10 = vpop.permute.xlu1 %1937  ;;  %v1941_v60 = vpop.permute.xlu0 %1940  ;;  %v1984_v8 = vsel %vm1184_vm2, %v1965_v62, %v1983_v3 }
 0x419   : > { %v1969_v5 = vrot.slane %v1938_v10, %v5211_v51  ;;  %v1973_v11 = vrot.slane %v1941_v60, %v5211_v51 }
 0x41b   : > { %v1985_v14 = vsel %vm1187_vm3, %v1969_v5, %v1984_v8 }
 0x41c   : > { %v1944_v15 = vpop.permute.xlu1 %1943  ;;  %v1986_v16 = vsel %vm1190_vm4, %v1973_v11, %v1985_v14 }
 0x41d   : > { %v1977_v28 = vrot.slane %v1944_v15, %v5211_v51 }
 0x41e   : > { %v1947_v34 = vpop.permute.xlu0 %1946 }
 0x41f   : > { %v1981_v19 = vrot.slane %v1947_v34, %v5211_v51  ;;  %v1987_v23 = vsel %vm1193_vm5, %v1977_v28, %v1986_v16 }
 0x421   : > { %v1988_v32 = vsel %vm1196_vm6, %v1981_v19, %v1987_v23 }
 0x422   : > { %v1991_v26 = vsel %vm1990_vm8, %v1988_v32, -inf }
 0x423   : > { %1992 = vmax.xlane.f32.xlu1 %v1991_v26 }
 0x4ac   : > { %v1993_v35 = vpop.xlane.xlu1 %1992 }
 0x4ad   : > { %v1998_v36 = vrot.slane %v1993_v35, %v5017_v17  ;;  %v2002_v37 = vrot.slane %v1993_v35, %v5140_v2  ;;  %v2006_v31 = vrot.slane %v1993_v35, %v2005_v27  ;;  %v2010_v47 = vrot.slane %v1993_v35, %v2009_v40 }
 0x4ae   : > { %v2014_v55 = vrot.slane %v1993_v35, %v2013_v12  ;;  %v2018_v56 = vrot.slane %v1993_v35, %v2017_v54  ;;  %v2026_v60 = vrot.slane %v1993_v35, %v2025_v59 }
 0x4af   : > { %v2035_v43 = vsub.f32 %v5185_v18, %v1998_v36  ;;  %v2036_v44 = vsub.f32 %v5187_v22, %v2002_v37  ;;  %v2037_v52 = vsub.f32 %v5191_v30, %v2006_v31  ;;  %v2038_v53 = vsub.f32 %v5193_v25, %v2010_v47 }
 0x4b0   : > { %v2021_v22 = vsub.s32 6, %v5012_v13  ;;  %v2039_v58 = vsub.f32 %v5197_v29, %v2014_v55  ;;  %v2040_v3 = vsub.f32 %v5199_v20, %v2018_v56  ;;  %v2042_v11 = vsub.f32 %v5205_v46, %v2026_v60  ;;  %v4060_v13 = vld [vmem:[#allocation8 + $0x10] sm:$0xff]  }
 0x4b1   : > { %v2043_v45 = vmul.f32 1.442695, %v2035_v43  ;;  %v2045_v39 = vmul.f32 1.442695, %v2036_v44  ;;  %v2047_v18 = vmul.f32 1.442695, %v2037_v52 }
 0x4b2   : > { %v2049_v30 = vmul.f32 1.442695, %v2038_v53  ;;  %v2022_v62 = vrot.slane %v1993_v35, %v2021_v22  ;;  %v2051_v25 = vmul.f32 1.442695, %v2039_v58  ;;  %v2053_v29 = vmul.f32 1.442695, %v2040_v3 }
 0x4b3   : > { %4129 = vpow2.f32 %v2043_v45  ;;  %v2057_v20 = vmul.f32 1.442695, %v2042_v11 }
 0x4b4   : > { %4131 = vpow2.f32 %v2045_v39  ;;  %v2041_v5 = vsub.f32 %v5203_v24, %v2022_v62 }
 0x4b5   : > { %4133 = vpow2.f32 %v2047_v18 }
 0x4b6   : > { %4135 = vpow2.f32 %v2049_v30  ;;  %v2055_v14 = vmul.f32 1.442695, %v2041_v5 }
 0x4b7   : > { %4137 = vpow2.f32 %v2051_v25 }
 0x4b8   : > { %4139 = vpow2.f32 %v2053_v29 }
 0x4b9   : > { %4141 = vpow2.f32 %v2055_v14 }
 0x4ba   : > { %4143 = vpow2.f32 %v2057_v20 }
 0x4c0   : > { %v4130_v10 = vpop.eup %4129 }
 0x4c1   : > { %2068 = vperm.xlu0 %4021, %v4130_v10   ;;  %v4132_v8 = vpop.eup %4131 }
 0x4c2   : > { %v4134_v15 = vpop.eup %4133 }
 0x4c3   : > { %v4136_v28 = vpop.eup %4135 }
 0x4c4   : > { %v4138_v16 = vpop.eup %4137 }
 0x4c5   : > { %2071 = vperm.xlu0 %4021, %v4132_v8   ;;  %v4140_v34 = vpop.eup %4139 }
 0x4c6   : > { %v4142_v24 = vpop.eup %4141 }
 0x4c7   : > { %v4144_v19 = vpop.eup %4143 }
 0x4c9   : > { %2074 = vperm.xlu0 %4021, %v4134_v15  }
 0x4cd   : > { %2077 = vperm.xlu0 %4021, %v4136_v28  }
 0x4d1   : > { %2080 = vperm.xlu0 %4021, %v4138_v16  }
 0x4d5   : > { %2083 = vperm.xlu0 %4021, %v4140_v34  }
 0x4d9   : > { %2086 = vperm.xlu0 %4021, %v4142_v24  }
 0x4dd   : > { %2089 = vperm.xlu0 %4021, %v4144_v19  }
 0x53c   : > { %v2069_v23 = vpop.permute.xlu0 %2068 }
 0x53d   : > { %v2094_v43 = vrot.slane %v2069_v23, %v5211_v51 }
 0x540   : > { %v2072_v32 = vpop.permute.xlu0 %2071 }
 0x541   : > { %v2098_v37 = vrot.slane %v2072_v32, %v5211_v51 }
 0x543   : > { %v2123_v52 = vsel %vm1178_vm0, %v2098_v37, %v2094_v43  ;;  %v4055_v37 = vld [vmem:[#allocation8 + $0x38] sm:$0xff]  }
 0x544   : > { %v2075_v46 = vpop.permute.xlu0 %2074  ;;  %3875 = vmatpush3.bf16.msra.mxu0 %v4055_v37 }
 0x545   : > { %v2102_v31 = vrot.slane %v2075_v46, %v5211_v51  ;;  %3876 = vmatprep.subr.bf16.mxu0 %v4458_v49 }
 0x547   : > { %v2124_v55 = vsel %vm1181_vm1, %v2102_v31, %v2123_v52 }
 0x548   : > { %v2078_v26 = vpop.permute.xlu0 %2077 }
 0x549   : > { %v2106_v44 = vrot.slane %v2078_v26, %v5211_v51 }
 0x54b   : > { %v2125_v18 = vsel %vm1184_vm2, %v2106_v44, %v2124_v55  ;;  %v2185_v44 = vrot.slane %v5151_v42, 4 }
 0x54c   : > { %v2081_v35 = vpop.permute.xlu0 %2080 }
 0x54d   : > { %v2110_v45 = vrot.slane %v2081_v35, %v5211_v51 }
 0x54f   : > { %v2126_v56 = vsel %vm1187_vm3, %v2110_v45, %v2125_v18  ;;  %v2201_v18 = vunpack.c.l.bf16 %v2185_v44 }
 0x550   : > { %v2084_v36 = vpop.permute.xlu0 %2083 }
 0x551   : > { %v2114_v39 = vrot.slane %v2084_v36, %v5211_v51 }
 0x553   : > { %v2127_v30 = vsel %vm1190_vm4, %v2114_v39, %v2126_v56  ;;  %v2186_v56 = vrot.slane %v5153_v9, 4  ;;  %v2189_v9 = vrot.slane %v5165_v33, 4 }
 0x554   : > { %v2087_v47 = vpop.permute.xlu0 %2086 }
 0x555   : > { %v2118_v53 = vrot.slane %v2087_v47, %v5211_v51 }
 0x557   : > { %v2128_v3 = vsel %vm1193_vm5, %v2118_v53, %v2127_v30 }
 0x558   : > { %v2090_v58 = vpop.permute.xlu0 %2089 }
 0x559   : > { %v2122_v62 = vrot.slane %v2090_v58, %v5211_v51 }
 0x55b   : > { %v2129_v25 = vsel %vm1196_vm6, %v2122_v62, %v2128_v3 }
 0x55c   : > { %v2131_v60 = vsel %vm1990_vm8, %v2129_v25, 0.0 }
 0x55d   : > { %2132 = vadd.xlane.f32.xlu0 %v2131_v60 }
 0x5e6   : > { %v2133_v5 = vpop.xlane.xlu0 %2132 }
 0x5e7   : > { %4145 = vrcp.f32 %v2133_v5  ;;  %v2187_v5 = vrot.slane %v5159_v4, 4  ;;  %v2190_v4 = vrot.slane %v5167_v6, 4 }
 0x5f4   : > { %v4146_v29 = vpop.eup %4145 }
 0x5f5   : > { %v2155_v11 = vrot.slane %v4146_v29, %v2013_v12  ;;  %v2139_v14 = vrot.slane %v4146_v29, %v5017_v17  ;;  %v2143_v32 = vrot.slane %v4146_v29, %v5140_v2  ;;  %v2147_v46 = vrot.slane %v4146_v29, %v2005_v27 }
 0x5f6   : > { %v2151_v35 = vrot.slane %v4146_v29, %v2009_v40  ;;  %v2159_v12 = vrot.slane %v4146_v29, %v2017_v54  ;;  %v2167_v27 = vrot.slane %v4146_v29, %v2025_v59  ;;  %v4056_v40 = vld [vmem:[#allocation8 + $0x30] sm:$0xff]   ;;  %v4057_v54 = vld [vmem:[#allocation8 + $0x28] sm:$0xff]  }
 0x5f7   : > { %v2180_v20 = vmul.f32 %v4138_v16, %v2155_v11  ;;  %v2176_v23 = vmul.f32 %v4130_v10, %v2139_v14  ;;  %v2177_v51 = vmul.f32 %v4132_v8, %v2143_v32  ;;  %v2178_v26 = vmul.f32 %v4134_v15, %v2147_v46  ;;  %3877 = vmatpush3.bf16.msra.mxu0 %v4056_v40  ;;  %v4061_v59 = vld [vmem:[#allocation8 + $0x8] sm:$0xff]  }
 0x5f8   : > { %v2179_v36 = vmul.f32 %v4136_v28, %v2151_v35  ;;  %v2181_v10 = vmul.f32 %v4140_v34, %v2159_v12  ;;  %v2163_v16 = vrot.slane %v4146_v29, %v2021_v22  ;;  %v2183_v15 = vmul.f32 %v4144_v19, %v2167_v27  ;;  %3878 = vmatprep.subr.bf16.mxu0 %v4458_v49  ;;  %v4058_v22 = vld [vmem:[#allocation8 + $0x20] sm:$0xff]   ;;  %v4059_v28 = vld [vmem:[#allocation8 + $0x18] sm:$0xff]  }
 0x5f9   : > { %2230 = vperm.xlu0 %4021, %v2180_v20   ;;  %2210 = vperm.xlu1 %4022, %v2176_v23   ;;  %v4062_v34 = vld [vmem:[#allocation8] sm:$0xff]   ;;  %v2184_v19 = vrot.slane %v5149_v41, 4  ;;  %v2202_v41 = vunpack.c.l.bf16 %v2186_v56  ;;  %v2205_v27 = vunpack.c.l.bf16 %v2189_v9 }
 0x5fa   : > { %v2182_v8 = vmul.f32 %v4142_v24, %v2163_v16  ;;  %v2188_v24 = vrot.slane %v5163_v57, 4 }
 0x5fb   : > { %3879 = vmatpush3.bf16.msra.mxu0 %v4057_v54  ;;  %v2200_v43 = vunpack.c.l.bf16 %v2184_v19  ;;  %v2206_v19 = vunpack.c.l.bf16 %v2190_v4 }
 0x5fc   : > { %3880 = vmatprep.subr.bf16.mxu0 %v4458_v49  ;;  %v2204_v31 = vunpack.c.l.bf16 %v2188_v24 }
 0x5fd   : > { %2215 = vperm.xlu1 %4022, %v2177_v51   ;;  %v2203_v51 = vunpack.c.l.bf16 %v2187_v5 }
 0x5ff   : > { %3881 = vmatpush3.bf16.msra.mxu0 %v4058_v22 }
 0x600   : > { %3882 = vmatprep.subr.bf16.mxu0 %v4458_v49 }
 0x601   : > { %2220 = vperm.xlu1 %4022, %v2178_v26  }
 0x603   : > { %3883 = vmatpush3.bf16.msra.mxu0 %v4059_v28 }
 0x604   : > { %3884 = vmatprep.subr.bf16.mxu0 %v4458_v49 }
 0x605   : > { %2225 = vperm.xlu1 %4022, %v2179_v36  }
 0x607   : > { %3885 = vmatpush3.bf16.msra.mxu0 %v4060_v13 }
 0x608   : > { %3886 = vmatprep.subr.bf16.mxu0 %v4458_v49 }
 0x609   : > { %2235 = vperm.xlu1 %4022, %v2181_v10  }
 0x60b   : > { %3887 = vmatpush3.bf16.msra.mxu0 %v4061_v59  ;;  %v2191_v59 = vrot.slane %v5172_v38, 4 }
 0x60c   : > { %3888 = vmatprep.subr.bf16.mxu0 %v4458_v49 }
 0x60d   : > { %2240 = vperm.xlu1 %4022, %v2182_v8  }
 0x60f   : > { %3889 = vmatpush3.bf16.msra.mxu0 %v4062_v34 }
 0x611   : > { %2245 = vperm.xlu1 %4022, %v2183_v15  }
 0x674   : > { %v2231_v45 = vpop.permute.xlu0 %2230  ;;  %v2211_v47 = vpop.permute.xlu1 %2210 }
 0x675   : > { %v2252_v52 = vmul.f32 %v2231_v45, %v2204_v31  ;;  %v2248_v39 = vmul.f32 %v2211_v47, %v2200_v43 }
 0x677   : > { %v2280_v55 = vrot.slane %v2252_v52, 4  ;;  %v2256_v53 = vrot.slane %v2248_v39, 4 }
 0x678   : > { %v2216_v58 = vpop.permute.xlu1 %2215 }
 0x679   : > { %v2257_v30 = vadd.f32 %v2256_v53, %v2248_v39  ;;  %v2249_v62 = vmul.f32 %v2216_v58, %v2201_v18  ;;  %v2281_v3 = vadd.f32 %v2280_v55, %v2252_v52  ;;  %v2207_v53 = vunpack.c.l.bf16 %v2191_v59 }
 0x67b   : > { %v2258_v57 = vrot.slane %v2257_v30, 2  ;;  %v2262_v25 = vrot.slane %v2249_v62, 4  ;;  %v2282_v14 = vrot.slane %v2281_v3, 2 }
 0x67c   : > { %v2221_v60 = vpop.permute.xlu1 %2220 }
 0x67d   : > { %v2259_v42 = vadd.f32 %v2258_v57, %v2257_v30  ;;  %v2263_v29 = vadd.f32 %v2262_v25, %v2249_v62  ;;  %v2250_v11 = vmul.f32 %v2221_v60, %v2202_v41  ;;  %v2283_v10 = vadd.f32 %v2282_v14, %v2281_v3 }
 0x67f   : > { %v2260_v20 = vrot.slane %v2259_v42, 1  ;;  %v2264_v23 = vrot.slane %v2263_v29, 2  ;;  %v2268_v32 = vrot.slane %v2250_v11, 4  ;;  %v2284_v33 = vrot.slane %v2283_v10, 1 }
 0x680   : > { %v2226_v46 = vpop.permute.xlu1 %2225 }
 0x681   : > { %v2261_v26 = vadd.f32 %v2260_v20, %v2259_v42  ;;  %v2265_v35 = vadd.f32 %v2264_v23, %v2263_v29  ;;  %v2269_v36 = vadd.f32 %v2268_v32, %v2250_v11  ;;  %v2251_v12 = vmul.f32 %v2226_v46, %v2203_v51 }
 0x682   : > { %v2285_v18 = vadd.f32 %v2284_v33, %v2283_v10 }
 0x683   : > { %v2266_v16 = vrot.slane %v2265_v35, 1  ;;  %v2270_v37 = vrot.slane %v2269_v36, 2  ;;  %v2274_v8 = vrot.slane %v2251_v12, 4  ;;  %v2304_v15 = vpack.c.bf16 %v2261_v26, %v2261_v26 }
 0x684   : > { %v2236_v40 = vpop.permute.xlu1 %2235  ;;  %v2308_v42 = vpack.c.bf16 %v2285_v18, %v2285_v18 }
 0x685   : > { %v2267_v54 = vadd.f32 %v2266_v16, %v2265_v35  ;;  %v2271_v22 = vadd.f32 %v2270_v37, %v2269_v36  ;;  %v2275_v28 = vadd.f32 %v2274_v8, %v2251_v12  ;;  %v2253_v13 = vmul.f32 %v2236_v40, %v2205_v27 }
 0x686   : > { %v2343_v45 = vunpack.c.l.b16 %v2304_v15  ;;  %v2347_v26 = vunpack.c.l.b16 %v2308_v42 }
 0x687   : > { %v2305_v34 = vpack.c.bf16 %v2267_v54, %v2267_v54  ;;  %v2272_v24 = vrot.slane %v2271_v22, 1  ;;  %v2276_v31 = vrot.slane %v2275_v28, 2  ;;  %v2286_v43 = vrot.slane %v2253_v13, 4 }
 0x688   : > { %v2241_v44 = vpop.permute.xlu1 %2240 }
 0x689   : > { %v2344_v47 = vunpack.c.l.b16 %v2305_v34  ;;  %v2273_v6 = vadd.f32 %v2272_v24, %v2271_v22  ;;  %v2254_v52 = vmul.f32 %v2241_v44, %v2206_v19  ;;  %v2277_v39 = vadd.f32 %v2276_v31, %v2275_v28  ;;  %v3708_v24 = vld [vmem:[%s986_s19] ss:$0 sm:$0xff] }
 0x68a   : > { %v2287_v55 = vadd.f32 %v2286_v43, %v2253_v13 }
 0x68b   : > { %v2351_v56 = vsel %vm1178_vm0, %v2344_v47, %v2343_v45  ;;  %v2306_v58 = vpack.c.bf16 %v2273_v6, %v2273_v6  ;;  %v2292_v30 = vrot.slane %v2254_v52, 4  ;;  %v2278_v38 = vrot.slane %v2277_v39, 1 }
 0x68c   : > { %v2288_v62 = vrot.slane %v2287_v55, 2  ;;  %v2246_v3 = vpop.permute.xlu1 %2245 }
 0x68d   : > { %v2345_v57 = vunpack.c.l.b16 %v2306_v58  ;;  %v2293_v25 = vadd.f32 %v2292_v30, %v2254_v52  ;;  %v2255_v41 = vmul.f32 %v2246_v3, %v2207_v53  ;;  %v2279_v60 = vadd.f32 %v2278_v38, %v2277_v39 }
 0x68e   : > { %v2289_v5 = vadd.f32 %v2288_v62, %v2287_v55 }
 0x68f   : > { %v2352_v29 = vsel %vm1181_vm1, %v2345_v57, %v2351_v56  ;;  %v2294_v11 = vrot.slane %v2293_v25, 2  ;;  %v2298_v14 = vrot.slane %v2255_v41, 4  ;;  %v2307_v20 = vpack.c.bf16 %v2279_v60, %v2279_v60 }
 0x690   : > { %v2290_v23 = vrot.slane %v2289_v5, 1 }
 0x691   : > { %v2295_v32 = vadd.f32 %v2294_v11, %v2293_v25  ;;  %v2299_v51 = vadd.f32 %v2298_v14, %v2255_v41  ;;  %v2346_v46 = vunpack.c.l.b16 %v2307_v20 }
 0x692   : > { %v2291_v9 = vadd.f32 %v2290_v23, %v2289_v5 }
 0x693   : > { %v2296_v35 = vrot.slane %v2295_v32, 1  ;;  %v2300_v36 = vrot.slane %v2299_v51, 2  ;;  %v2353_v12 = vsel %vm1184_vm2, %v2346_v46, %v2352_v29 }
 0x694   : > { %v2309_v10 = vpack.c.bf16 %v2291_v9, %v2291_v9  ;;  %v2354_v16 = vsel %vm1187_vm3, %v2347_v26, %v2353_v12 }
 0x695   : > { %v2297_v37 = vadd.f32 %v2296_v35, %v2295_v32  ;;  %v2301_v4 = vadd.f32 %v2300_v36, %v2299_v51 }
 0x696   : > { %v2348_v8 = vunpack.c.l.b16 %v2309_v10 }
 0x697   : > { %v2310_v27 = vpack.c.bf16 %v2297_v37, %v2297_v37  ;;  %v2302_v40 = vrot.slane %v2301_v4, 1 }
 0x698   : > { %v2355_v15 = vsel %vm1190_vm4, %v2348_v8, %v2354_v16 }
 0x699   : > { %v2349_v54 = vunpack.c.l.b16 %v2310_v27  ;;  %v2303_v22 = vadd.f32 %v2302_v40, %v2301_v4 }
 0x69b   : > { %v2356_v28 = vsel %vm1193_vm5, %v2349_v54, %v2355_v15  ;;  %v2311_v13 = vpack.c.bf16 %v2303_v22, %v2303_v22 }
 0x69d   : > { %v2350_v59 = vunpack.c.l.b16 %v2311_v13 }
 0x69f   : > { %v2357_v33 = vsel %vm1196_vm6, %v2350_v59, %v2356_v28 }
 0x6a0   : > { %v2358_v34 = vpack.c.b16 %v2357_v33, %v2357_v33 }
 0x6a2   : > { %3891 = vmatmul.mubr.bf16.vlgmr.msra.gmra.mxu0 %v2358_v34 }
 0x762   : > { %v2442_v19 = vpop.f32.mrf.mxu0 }
 0x763   : > { %v2443_v31 = vadd.f32 %v3708_v24, %v2442_v19 }
 0x764   : > { %v3892_v43 = vpop.f32.mrf.mxu0 }
 0x765   : > { %v2449_v44 = vrot.slane %v2443_v31, 1  ;;  %v2450_v45 = vrot.slane %v2443_v31, 2  ;;  %v2451_v47 = vrot.slane %v2443_v31, 3  ;;  %v2452_v6 = vrot.slane %v2443_v31, 4 }
 0x766   : > { %v2445_v52 = vpop.f32.mrf.mxu0  ;;  %v2453_v39 = vrot.slane %v2443_v31, 5  ;;  %v2454_v55 = vrot.slane %v2443_v31, 6  ;;  %v2455_v53 = vrot.slane %v2443_v31, 7  ;;  %v2464_v62 = vadd.f32 %v2443_v31, %v5068_v48 }
 0x767   : > { %v2465_v18 = vadd.f32 %v2449_v44, %v5071_v21  ;;  %v2466_v56 = vadd.f32 %v2450_v45, %v5074_v50  ;;  %v2467_v58 = vadd.f32 %v2451_v47, %v5077_v61  ;;  %v2468_v38 = vadd.f32 %v2452_v6, %v5080_v63 }
 0x768   : > { %v3893_v30 = vpop.f32.mrf.mxu0  ;;  %v2469_v3 = vadd.f32 %v2453_v39, %v5083_v0  ;;  %v2470_v41 = vadd.f32 %v2454_v55, %v5086_v1  ;;  %v2471_v60 = vadd.f32 %v2455_v53, %v5091_v7 }
 0x769   : > { %v2482_v57 = vrot.slane %v2465_v18, 7  ;;  %v2484_v25 = vrot.slane %v2466_v56, 6  ;;  %v2486_v21 = vrot.slane %v2467_v58, 5  ;;  %v2488_v42 = vrot.slane %v2468_v38, 4  ;;  %v4068_v30 = vld [vmem:[#allocation10 + $0x64] ss:$8 sps:$4 sm:$0xff]  }
 0x76a   : > { %v2490_v29 = vrot.slane %v2469_v3, 3  ;;  %v2492_v48 = vrot.slane %v2470_v41, 2  ;;  %v2494_v11 = vrot.slane %v2471_v60, 1 }
 0x76b   : > { %v2483_v5 = vsel %vm1178_vm0, %v2482_v57, %v2464_v62  ;;  %v4074_v57 = vld [vmem:[#allocation10 + $0x44] ss:$8 sps:$4 sm:$0xff]  }
 0x76c   : > { %v2485_v50 = vsel %vm1181_vm1, %v2484_v25, %v2483_v5  ;;  %v4072_v25 = vld [vmem:[#allocation10 + $0x40] ss:$8 sps:$4 sm:$0xff]   ;;  %v4080_v5 = vld [vmem:[#allocation10 + $0x24] ss:$8 sps:$4 sm:$0xff]  }
 0x76d   : > { %v2487_v61 = vsel %vm1184_vm2, %v2486_v21, %v2485_v50  ;;  %v4078_v21 = vld [vmem:[#allocation10 + $0x20] ss:$8 sps:$4 sm:$0xff]   ;;  %v4083_v50 = vld [vmem:[#allocation10 + $0x14] ss:$8 sps:$4 sm:$0xff]  }
 0x76e   : > { %v2489_v63 = vsel %vm1187_vm3, %v2488_v42, %v2487_v61  ;;  %v4081_v42 = vld [vmem:[#allocation10 + $0x10] ss:$8 sps:$4 sm:$0xff]   ;;  %v4086_v61 = vld [vmem:[#allocation10 + $0x4] ss:$8 sps:$4 sm:$0xff]  }
 0x76f   : > { %v2491_v0 = vsel %vm1190_vm4, %v2490_v29, %v2489_v63  ;;  %v4084_v29 = vld [vmem:[#allocation10] ss:$8 sps:$4 sm:$0xff]  }
 0x770   : > { %v2493_v14 = vsel %vm1193_vm5, %v2492_v48, %v2491_v0 }
 0x771   : > { %v2495_v1 = vsel %vm1196_vm6, %v2494_v11, %v2493_v14  ;;  %v3717_v14 = vld [vmem:[%s989_s16] ss:$0 sm:$0xff]  ;;  %s4462_s16 = smov [#allocation14]  }
 0x772   : > { %2497 = vadd.xlane.f32.xlu1 %v2495_v1  ;;  %s4357_s30 = sshll.u32 %s4462_s16, 4  ;;  %s4358_s30 = int_to_ptr.vmem [resolvable:$false] %s4357_s30 }
 0x773   : > { %s4359_s24 = scalar_lea.vmem %s4358_s30, 256 }
 0x7fb   : > { %v2498_v7 = vpop.xlane.xlu1 %2497 }
 0x7fc   : > { %v2499_v20 = vmul.f32 0.0078125, %v2498_v7 }
 0x7fe   : > { %v2501_v23 = vrot.slane %v2499_v20, 1  ;;  %v2502_v32 = vrot.slane %v2499_v20, 2  ;;  %v2503_v51 = vrot.slane %v2499_v20, 3  ;;  %v2504_v46 = vrot.slane %v2499_v20, 4 }
 0x7ff   : > { %v2505_v9 = vrot.slane %v2499_v20, 5  ;;  %v2506_v26 = vrot.slane %v2499_v20, 6  ;;  %v2507_v35 = vrot.slane %v2499_v20, 7  ;;  %v5328_v36 = vsub.f32 %v2464_v62, %v2499_v20  ;;  %v4071_v62 = vld [vmem:[#allocation10 + $0x54] ss:$8 sps:$4 sm:$0xff]  }
 0x800   : > { %v5330_v12 = vsub.f32 %v2465_v18, %v2501_v23  ;;  %v5332_v10 = vsub.f32 %v2466_v56, %v2502_v32  ;;  %v5334_v16 = vsub.f32 %v2467_v58, %v2503_v51  ;;  %v5336_v37 = vsub.f32 %v2468_v38, %v2504_v46  ;;  %v4063_v56 = vld [vmem:[#allocation10 + $0x70] ss:$8 sps:$4 sm:$0xff]   ;;  %v4065_v58 = vld [vmem:[#allocation10 + $0x74] ss:$8 sps:$4 sm:$0xff]   ;;  %v4066_v38 = vld [vmem:[#allocation10 + $0x60] ss:$8 sps:$4 sm:$0xff]  }
 0x801   : > { %v5338_v4 = vsub.f32 %v2469_v3, %v2505_v9  ;;  %v5340_v8 = vsub.f32 %v2470_v41, %v2506_v26  ;;  %v5342_v27 = vsub.f32 %v2471_v60, %v2507_v35  ;;  %v2524_v28 = vmul.f32 %v5328_v36, %v5328_v36  ;;  %2760 = vmatprep.subr.bf16.mxu1 %v4065_v58  ;;  %v4069_v3 = vld [vmem:[#allocation10 + $0x50] ss:$8 sps:$4 sm:$0xff]   ;;  %v4077_v41 = vld [vmem:[#allocation10 + $0x34] ss:$8 sps:$4 sm:$0xff]   ;;  %v3718_v26 = vld [vmem:[%s992_s29] ss:$0 sm:$0xff] }
 0x802   : > { %v2525_v40 = vmul.f32 %v5330_v12, %v5330_v12  ;;  %v2526_v15 = vmul.f32 %v5332_v10, %v5332_v10  ;;  %v2527_v54 = vmul.f32 %v5334_v16, %v5334_v16  ;;  %v2528_v22 = vmul.f32 %v5336_v37, %v5336_v37  ;;  %2761 = vmatpush1.bf16.msra.mxu1 %v4063_v56  ;;  %v4075_v60 = vld [vmem:[#allocation10 + $0x30] ss:$8 sps:$4 sm:$0xff]  }
 0x803   : > { %v2529_v13 = vmul.f32 %v5338_v4, %v5338_v4  ;;  %v2530_v34 = vmul.f32 %v5340_v8, %v5340_v8  ;;  %v2531_v24 = vmul.f32 %v5342_v27, %v5342_v27  ;;  %2762 = vmatprep.subr.bf16.mxu1 %v4068_v30 }
 0x804   : > { %v2540_v59 = vrot.slane %v2525_v40, 7  ;;  %v2542_v33 = vrot.slane %v2526_v15, 6  ;;  %v2544_v31 = vrot.slane %v2527_v54, 5  ;;  %v2546_v44 = vrot.slane %v2528_v22, 4 }
 0x805   : > { %v2548_v47 = vrot.slane %v2529_v13, 3  ;;  %v2550_v52 = vrot.slane %v2530_v34, 2  ;;  %v2552_v55 = vrot.slane %v2531_v24, 1 }
 0x806   : > { %v2541_v19 = vsel %vm1178_vm0, %v2540_v59, %v2524_v28  ;;  %2763 = vmatpush1.bf16.msra.mxu1 %v4066_v38 }
 0x807   : > { %v2543_v43 = vsel %vm1181_vm1, %v2542_v33, %v2541_v19  ;;  %2764 = vmatprep.subr.bf16.mxu1 %v4071_v62 }
 0x808   : > { %v2545_v45 = vsel %vm1184_vm2, %v2544_v31, %v2543_v43 }
 0x809   : > { %v2547_v6 = vsel %vm1187_vm3, %v2546_v44, %v2545_v45 }
 0x80a   : > { %v2549_v39 = vsel %vm1190_vm4, %v2548_v47, %v2547_v6  ;;  %2765 = vmatpush1.bf16.msra.mxu1 %v4069_v3 }
 0x80b   : > { %v2551_v53 = vsel %vm1193_vm5, %v2550_v52, %v2549_v39  ;;  %2766 = vmatprep.subr.bf16.mxu1 %v4074_v57 }
 0x80c   : > { %v2553_v18 = vsel %vm1196_vm6, %v2552_v55, %v2551_v53 }
 0x80d   : > { %2555 = vadd.xlane.f32.xlu0 %v2553_v18 }
 0x80e   : > { %2767 = vmatpush1.bf16.msra.mxu1 %v4072_v25 }
 0x80f   : > { %2768 = vmatprep.subr.bf16.mxu1 %v4077_v41 }
 0x812   : > { %2769 = vmatpush1.bf16.msra.mxu1 %v4075_v60 }
 0x813   : > { %2770 = vmatprep.subr.bf16.mxu1 %v4080_v5 }
 0x816   : > { %2771 = vmatpush1.bf16.msra.mxu1 %v4078_v21 }
 0x817   : > { %2772 = vmatprep.subr.bf16.mxu1 %v4083_v50 }
 0x81a   : > { %2773 = vmatpush1.bf16.msra.mxu1 %v4081_v42 }
 0x81b   : > { %2774 = vmatprep.subr.bf16.mxu1 %v4086_v61 }
 0x81e   : > { %2775 = vmatpush1.bf16.msra.mxu1 %v4084_v29 }
 0x81f   : > { %3894 = vmatprep.subr.bf16.mxu1 %v4458_v49 }
 0x896   : > { %v2556_v63 = vpop.xlane.xlu0 %2555 }
 0x897   : > { %v2557_v48 = vmul.f32 0.0078125, %v2556_v63 }
 0x899   : > { %v2558_v0 = vadd.f32 1e-12, %v2557_v48 }
 0x89b   : > { %4147 = vrsqrt.f32 %v2558_v0 }
 0x8a8   : > { %v4148_v11 = vpop.eup %4147 }
 0x8a9   : > { %v2561_v1 = vrot.slane %v4148_v11, 1  ;;  %v2562_v7 = vrot.slane %v4148_v11, 2  ;;  %v2563_v20 = vrot.slane %v4148_v11, 3  ;;  %v2564_v23 = vrot.slane %v4148_v11, 4 }
 0x8aa   : > { %v2565_v32 = vrot.slane %v4148_v11, 5  ;;  %v2566_v51 = vrot.slane %v4148_v11, 6  ;;  %v2567_v46 = vrot.slane %v4148_v11, 7  ;;  %v2576_v9 = vmul.f32 %v4148_v11, %v5328_v36 }
 0x8ab   : > { %v2577_v35 = vmul.f32 %v2561_v1, %v5330_v12  ;;  %v2578_v40 = vmul.f32 %v2562_v7, %v5332_v10  ;;  %v2579_v15 = vmul.f32 %v2563_v20, %v5334_v16  ;;  %v2580_v54 = vmul.f32 %v2564_v23, %v5336_v37  ;;  %v4087_v20 = vld [vmem:[#allocation11 + $0x78] sm:$0xff]  }
 0x8ac   : > { %v2581_v22 = vmul.f32 %v2565_v32, %v5338_v4  ;;  %v2582_v28 = vmul.f32 %v2566_v51, %v5340_v8  ;;  %v2583_v13 = vmul.f32 %v2567_v46, %v5342_v27  ;;  %v2590_v59 = vmul.f32 %v3717_v14, %v2576_v9  ;;  %v4088_v23 = vld [vmem:[#allocation11 + $0x38] sm:$0xff]   ;;  %3823 = vmatprep.subr.bf16.mxu0 %v4087_v20  ;;  %v4089_v32 = vld [vmem:[#allocation11 + $0x70] sm:$0xff]   ;;  %v4091_v46 = vld [vmem:[#allocation11 + $0x68] sm:$0xff]  }
 0x8ad   : > { %v2591_v33 = vmul.f32 %v3717_v14, %v2577_v35  ;;  %v2592_v34 = vmul.f32 %v3717_v14, %v2578_v40  ;;  %v2593_v24 = vmul.f32 %v3717_v14, %v2579_v15  ;;  %v2594_v36 = vmul.f32 %v3717_v14, %v2580_v54  ;;  %3824 = vmatpush3.bf16.msra.mxu0 %v4088_v23  ;;  %v4090_v51 = vld [vmem:[#allocation11 + $0x30] sm:$0xff]   ;;  %v4092_v9 = vld [vmem:[#allocation11 + $0x28] sm:$0xff]   ;;  %v4094_v35 = vld [vmem:[#allocation11 + $0x20] sm:$0xff]  }
 0x8ae   : > { %v2595_v19 = vmul.f32 %v3717_v14, %v2581_v22  ;;  %v2596_v31 = vmul.f32 %v3717_v14, %v2582_v28  ;;  %v2597_v12 = vmul.f32 %v3717_v14, %v2583_v13  ;;  %v5384_v43 = vadd.f32 %v3718_v26, %v2590_v59  ;;  %3825 = vmatprep.subr.bf16.mxu0 %v4089_v32  ;;  %v4095_v40 = vld [vmem:[#allocation11 + $0x58] sm:$0xff]   ;;  %v4097_v54 = vld [vmem:[#allocation11 + $0x50] sm:$0xff]   ;;  %v4099_v28 = vld [vmem:[#allocation11 + $0x48] sm:$0xff]  }
 0x8af   : > { %v5386_v10 = vadd.f32 %v3718_v26, %v2591_v33  ;;  %v5388_v16 = vadd.f32 %v3718_v26, %v2592_v34  ;;  %v5390_v37 = vadd.f32 %v3718_v26, %v2593_v24  ;;  %v5392_v4 = vadd.f32 %v3718_v26, %v2594_v36  ;;  %v4096_v15 = vld [vmem:[#allocation11 + $0x18] sm:$0xff]   ;;  %v4098_v22 = vld [vmem:[#allocation11 + $0x10] sm:$0xff]   ;;  %v4100_v13 = vld [vmem:[#allocation11 + $0x8] sm:$0xff]  }
 0x8b0   : > { %v5394_v8 = vadd.f32 %v3718_v26, %v2595_v19  ;;  %v5396_v27 = vadd.f32 %v3718_v26, %v2596_v31  ;;  %v5398_v44 = vadd.f32 %v3718_v26, %v2597_v12  ;;  %v2612_v45 = vpack.c.bf16 %v5384_v43, %v5384_v43  ;;  %v4093_v26 = vld [vmem:[#allocation11 + $0x60] sm:$0xff]  }
 0x8b1   : > { %v2613_v47 = vpack.c.bf16 %v5386_v10, %v5386_v10  ;;  %v2614_v6 = vpack.c.bf16 %v5388_v16, %v5388_v16  ;;  %v2615_v52 = vpack.c.bf16 %v5390_v37, %v5390_v37  ;;  %v2616_v39 = vpack.c.bf16 %v5392_v4, %v5392_v4  ;;  %3826 = vmatpush3.bf16.msra.mxu0 %v4090_v51  ;;  %v4101_v59 = vld [vmem:[#allocation11 + $0x40] sm:$0xff]  }
 0x8b2   : > { %v2617_v55 = vpack.c.bf16 %v5394_v8, %v5394_v8  ;;  %v2618_v53 = vpack.c.bf16 %v5396_v27, %v5396_v27  ;;  %v2619_v18 = vpack.c.bf16 %v5398_v44, %v5398_v44  ;;  %v2656_v62 = vunpack.c.l.b16 %v2612_v45  ;;  %3827 = vmatprep.subr.bf16.mxu0 %v4091_v46  ;;  %v4102_v33 = vld [vmem:[#allocation11] sm:$0xff]  }
 0x8b3   : > { %v2657_v56 = vunpack.c.l.b16 %v2613_v47  ;;  %v2658_v58 = vunpack.c.l.b16 %v2614_v6  ;;  %v2659_v30 = vunpack.c.l.b16 %v2615_v52  ;;  %v2660_v38 = vunpack.c.l.b16 %v2616_v39  ;;  %v2636_v34 = vld [vmem:[%s996_s15] sm:$0x3]  ;;  %s3665_s15 = sshll.u32 %s4840_s11, 3 }
 0x8b4   : > { %v2661_v3 = vunpack.c.l.b16 %v2617_v55  ;;  %v2662_v41 = vunpack.c.l.b16 %v2618_v53  ;;  %v2663_v60 = vunpack.c.l.b16 %v2619_v18  ;;  %v2641_v24 = vrot.slane %v2636_v34, %v5017_v17  ;;  %s960_s8 = scalar_lea.vmem [#allocation14], %s3665_s15 }
 0x8b5   : > { %v2664_v57 = vrot.slane %v2657_v56, 7  ;;  %v2666_v25 = vrot.slane %v2658_v58, 6  ;;  %v2668_v21 = vrot.slane %v2659_v30, 5  ;;  %v2670_v42 = vrot.slane %v2660_v38, 4  ;;  %3828 = vmatpush3.bf16.msra.mxu0 %v4092_v9  ;;  %s3328_s28 = sshll.u32 %s960_s8, 4  ;;  %s3329_s28 = int_to_ptr.vmem [resolvable:$true] %s3328_s28 }
 0x8b6   : > { %v2672_v29 = vrot.slane %v2661_v3, 3  ;;  %v2674_v48 = vrot.slane %v2662_v41, 2  ;;  %v2676_v11 = vrot.slane %v2663_v60, 1  ;;  %3829 = vmatprep.subr.bf16.mxu0 %v4093_v26  ;;  %v2645_v36 = vrot.slane %v2636_v34, %v5140_v2  ;;  %p4360_p2 = scmp.lt.s32.totalorder %s3329_s28, %s4358_s30 }
 0x8b7   : > { %v2665_v5 = vsel %vm1178_vm0, %v2664_v57, %v2656_v62 }
 0x8b8   : > { %v2667_v50 = vsel %vm1181_vm1, %v2666_v25, %v2665_v5 }
 0x8b9   : > { %v2669_v61 = vsel %vm1184_vm2, %v2668_v21, %v2667_v50  ;;  %3830 = vmatpush3.bf16.msra.mxu0 %v4094_v35 }
 0x8ba   : > { %v2671_v63 = vsel %vm1187_vm3, %v2670_v42, %v2669_v61  ;;  %3831 = vmatprep.subr.bf16.mxu0 %v4095_v40  ;;  %v3735_v61 = vld [vmem:[%s999_s26] ss:$0 sm:$0xff] }
 0x8bb   : > { %v2673_v0 = vsel %vm1190_vm4, %v2672_v29, %v2671_v63 }
 0x8bc   : > { %v2675_v14 = vsel %vm1193_vm5, %v2674_v48, %v2673_v0 }
 0x8bd   : > { %v2677_v1 = vsel %vm1196_vm6, %v2676_v11, %v2675_v14  ;;  %3832 = vmatpush3.bf16.msra.mxu0 %v4096_v15 }
 0x8be   : > { %v2678_v7 = vpack.c.b16 %v2677_v1, %v2677_v1  ;;  %3833 = vmatprep.subr.bf16.mxu0 %v4097_v54 }
 0x8c0   : > { %2793 = vmatmul.mubr.bf16.vlgmr.msra.gmra.mxu1 %v2678_v7 }
 0x8c1   : > { %3910 = vmatprep.mubr.msk.bf16.mxu1 %vm4460_vm7, %v4458_v49  ;;  %3834 = vmatpush3.bf16.msra.mxu0 %v4098_v22 }
 0x8c2   : > { %3835 = vmatprep.subr.bf16.mxu0 %v4099_v28 }
 0x8c5   : > { %3836 = vmatpush3.bf16.msra.mxu0 %v4100_v13 }
 0x8c6   : > { %3837 = vmatprep.subr.bf16.mxu0 %v4101_v59 }
 0x8c9   : > { %3838 = vmatpush3.bf16.msra.mxu0 %v4102_v33 }
 0x980   : > { %v2794_v19 = vpop.f32.mrf.mxu1 }
 0x981   : > { %v2795_v31 = vadd.f32 %v2794_v19, %v2641_v24 }
 0x982   : > { %v2796_v12 = vpop.f32.mrf.mxu1 }
 0x983   : > { %v2803_v45 = vmul.f32 0.044715, %v2795_v31  ;;  %v2797_v47 = vadd.f32 %v2796_v12, %v2645_v36  ;;  %v2801_v57 = vmul.f32 0.5, %v2795_v31 }
 0x984   : > { %v2798_v6 = vpop.f32.mrf.mxu1 }
 0x985   : > { %v2805_v52 = vmul.f32 %v2803_v45, %v2795_v31  ;;  %v2804_v39 = vmul.f32 0.044715, %v2797_v47  ;;  %v2802_v25 = vmul.f32 0.5, %v2797_v47 }
 0x986   : > { %v2799_v55 = vpop.f32.mrf.mxu1 }
 0x987   : > { %v2807_v53 = vmul.f32 %v2805_v52, %v2795_v31  ;;  %v2806_v18 = vmul.f32 %v2804_v39, %v2797_v47 }
 0x989   : > { %v2809_v56 = vadd.f32 %v2807_v53, %v2795_v31  ;;  %v2808_v58 = vmul.f32 %v2806_v18, %v2797_v47 }
 0x98b   : > { %v2811_v30 = vmul.f32 0.7978846, %v2809_v56  ;;  %v2810_v38 = vadd.f32 %v2808_v58, %v2797_v47 }
 0x98d   : > { %v2812_v62 = vmul.f32 0.7978846, %v2810_v38  ;;  %4149 = vtanh.f32 %v2811_v30 }
 0x98f   : > { %4151 = vtanh.f32 %v2812_v62 }
 0x99a   : > { %v4150_v17 = vpop.eup %4149 }
 0x99b   : > { %v2815_v2 = vadd.f32 1.0, %v4150_v17 }
 0x99c   : > { %v4152_v3 = vpop.eup %4151 }
 0x99d   : > { %v2816_v41 = vadd.f32 1.0, %v4152_v3  ;;  %v2817_v60 = vmul.f32 %v2815_v2, %v2801_v57 }
 0x99f   : > { %v2818_v5 = vmul.f32 %v2816_v41, %v2802_v25  ;;  %v2819_v50 = vpack.c.bf16 %v2817_v60, %v2817_v60 }
 0x9a1   : > { %v2820_v21 = vpack.c.bf16 %v2818_v5, %v2818_v5 }
 0x9a3   : > { %2988 = vmatprep.mubr.bf16.mxu0 %v2820_v21 }
 0x9a4   : > { %2989 = vmatmul.mubr.bf16.vlgmr.msra.gmra.mxu0 %v2819_v50 }
 0xa64   : > { %v3839_v42 = vpop.f32.mrf.mxu0 }
 0xa66   : > { %v3840_v29 = vpop.f32.mrf.mxu0 }
 0xa67   : > { %v3841_v63 = vadd.f32 %v3840_v29, %v3839_v42 }
 0xa68   : > { %v3842_v48 = vpop.f32.mrf.mxu0 }
 0xa69   : > { %v2991_v0 = vadd.f32 %v3841_v63, %v3735_v61 }
 0xa6a   : > { %v3843_v11 = vpop.f32.mrf.mxu0 }
 0xa6b   : > { %v2997_v14 = vrot.slane %v2991_v0, 1  ;;  %v2998_v1 = vrot.slane %v2991_v0, 2  ;;  %v2999_v7 = vrot.slane %v2991_v0, 3  ;;  %v3000_v20 = vrot.slane %v2991_v0, 4 }
 0xa6c   : > { %v3001_v23 = vrot.slane %v2991_v0, 5  ;;  %v3002_v32 = vrot.slane %v2991_v0, 6  ;;  %v3003_v51 = vrot.slane %v2991_v0, 7  ;;  %v3012_v40 = vadd.f32 %v2991_v0, %v5384_v43 }
 0xa6d   : > { %v3013_v46 = vadd.f32 %v2997_v14, %v5386_v10  ;;  %v3014_v9 = vadd.f32 %v2998_v1, %v5388_v16  ;;  %v3015_v26 = vadd.f32 %v2999_v7, %v5390_v37  ;;  %v3016_v35 = vadd.f32 %v3000_v20, %v5392_v4 }
 0xa6e   : > { %v3017_v15 = vadd.f32 %v3001_v23, %v5394_v8  ;;  %v3018_v28 = vadd.f32 %v3002_v32, %v5396_v27  ;;  %v3019_v13 = vadd.f32 %v3003_v51, %v5398_v44  ;;  %v4103_v32 = vld [vmem:[#allocation13 + $0x38] sm:$0xff]   ;;  %v4104_v51 = vld [vmem:[#allocation13 + $0x30] sm:$0xff]  }
 0xa6f   : > { %v3030_v54 = vrot.slane %v3013_v46, 7  ;;  %v3032_v22 = vrot.slane %v3014_v9, 6  ;;  %v3034_v33 = vrot.slane %v3015_v26, 5  ;;  %v3036_v16 = vrot.slane %v3016_v35, 4  ;;  %3895 = vmatpush3.bf16.msra.mxu1 %v4103_v32 }
 0xa70   : > { %v3038_v34 = vrot.slane %v3017_v15, 3  ;;  %v3040_v43 = vrot.slane %v3018_v28, 2  ;;  %v3042_v24 = vrot.slane %v3019_v13, 1  ;;  %3896 = vmatprep.subr.bf16.mxu1 %v4458_v49 }
 0xa71   : > { %v3031_v59 = vsel %vm1178_vm0, %v3030_v54, %v3012_v40 }
 0xa72   : > { %v3033_v10 = vsel %vm1181_vm1, %v3032_v22, %v3031_v59  ;;  %v3752_v59 = vld [vmem:[%s1002_s0] ss:$0 sm:$0xff]  ;;  %s4353_s0 = scalar_lea.vmem %s3329_s28, 128 }
 0xa73   : > { %v3035_v37 = vsel %vm1184_vm2, %v3034_v33, %v3033_v10  ;;  %3897 = vmatpush3.bf16.msra.mxu1 %v4104_v51  ;;  %p4354_p10 = scmp.ne.s32.totalorder %s3329_s28, %s4353_s0  ;;  %p4361_p3 = scmp.lt.s32.totalorder %s4359_s24, %s4353_s0 }
 0xa74   : > { %v3037_v4 = vsel %vm1187_vm3, %v3036_v16, %v3035_v37  ;;  %3898 = vmatprep.subr.bf16.mxu1 %v4458_v49 }
 0xa75   : > { %v3039_v8 = vsel %vm1190_vm4, %v3038_v34, %v3037_v4  ;;  %p4355_p0 = pnand %p4354_p10, %p4809_p7  ;;  %p4362_p5 = por %p4361_p3, %p4360_p2 }
 0xa76   : > { %v3041_v36 = vsel %vm1193_vm5, %v3040_v43, %v3039_v8  ;;  %v3753_v8 = vld [vmem:[%s1005_s4] ss:$0 sm:$0xff] }
 0xa77   : > { %v3043_v27 = vsel %vm1196_vm6, %v3042_v24, %v3041_v36  ;;  %p4356_p1 = pneg %p4355_p0 }
 0xa78   : > { %3045 = vadd.xlane.f32.xlu1 %v3043_v27 }
 0xa79   : > { %p4363_p8 = pnand %p4362_p5, %p4356_p1 }
 0xb01   : > { %v3046_v44 = vpop.xlane.xlu1 %3045 }
 0xb02   : > { %v3047_v19 = vmul.f32 0.0078125, %v3046_v44 }
 0xb04   : > { %v3049_v31 = vrot.slane %v3047_v19, 1  ;;  %v3050_v12 = vrot.slane %v3047_v19, 2  ;;  %v3051_v45 = vrot.slane %v3047_v19, 3  ;;  %v3052_v47 = vrot.slane %v3047_v19, 4 }
 0xb05   : > { %v3053_v6 = vrot.slane %v3047_v19, 5  ;;  %v3054_v52 = vrot.slane %v3047_v19, 6  ;;  %v3055_v39 = vrot.slane %v3047_v19, 7  ;;  %v5451_v55 = vsub.f32 %v3012_v40, %v3047_v19  ;;  %v4109_v40 = vld [vmem:[#allocation13 + $0x8] sm:$0xff]  }
 0xb06   : > { %v5453_v53 = vsub.f32 %v3013_v46, %v3049_v31  ;;  %v5455_v18 = vsub.f32 %v3014_v9, %v3050_v12  ;;  %v5457_v56 = vsub.f32 %v3015_v26, %v3051_v45  ;;  %v5459_v58 = vsub.f32 %v3016_v35, %v3052_v47  ;;  %v4105_v46 = vld [vmem:[#allocation13 + $0x28] sm:$0xff]   ;;  %v4106_v9 = vld [vmem:[#allocation13 + $0x20] sm:$0xff]   ;;  %v4107_v26 = vld [vmem:[#allocation13 + $0x18] sm:$0xff]  }
 0xb07   : > { %v5461_v30 = vsub.f32 %v3017_v15, %v3053_v6  ;;  %v5463_v38 = vsub.f32 %v3018_v28, %v3054_v52  ;;  %v5465_v62 = vsub.f32 %v3019_v13, %v3055_v39  ;;  %v3072_v25 = vmul.f32 %v5451_v55, %v5451_v55  ;;  %3899 = vmatpush3.bf16.msra.mxu1 %v4105_v46  ;;  %v4108_v35 = vld [vmem:[#allocation13 + $0x10] sm:$0xff]   ;;  %v4110_v15 = vld [vmem:[#allocation13] sm:$0xff]  }
 0xb08   : > { %v3073_v17 = vmul.f32 %v5453_v53, %v5453_v53  ;;  %v3074_v2 = vmul.f32 %v5455_v18, %v5455_v18  ;;  %v3075_v3 = vmul.f32 %v5457_v56, %v5457_v56  ;;  %v3076_v57 = vmul.f32 %v5459_v58, %v5459_v58  ;;  %3900 = vmatprep.subr.bf16.mxu1 %v4458_v49 }
 0xb09   : > { %v3077_v41 = vmul.f32 %v5461_v30, %v5461_v30  ;;  %v3078_v21 = vmul.f32 %v5463_v38, %v5463_v38  ;;  %v3079_v50 = vmul.f32 %v5465_v62, %v5465_v62 }
 0xb0a   : > { %v3088_v60 = vrot.slane %v3073_v17, 7  ;;  %v3090_v5 = vrot.slane %v3074_v2, 6  ;;  %v3092_v61 = vrot.slane %v3075_v3, 5  ;;  %v3094_v63 = vrot.slane %v3076_v57, 4 }
 0xb0b   : > { %v3096_v0 = vrot.slane %v3077_v41, 3  ;;  %v3098_v14 = vrot.slane %v3078_v21, 2  ;;  %v3100_v7 = vrot.slane %v3079_v50, 1  ;;  %3901 = vmatpush3.bf16.msra.mxu1 %v4106_v9 }
 0xb0c   : > { %v3089_v42 = vsel %vm1178_vm0, %v3088_v60, %v3072_v25  ;;  %3902 = vmatprep.subr.bf16.mxu1 %v4458_v49 }
 0xb0d   : > { %v3091_v29 = vsel %vm1181_vm1, %v3090_v5, %v3089_v42 }
 0xb0e   : > { %v3093_v48 = vsel %vm1184_vm2, %v3092_v61, %v3091_v29 }
 0xb0f   : > { %v3095_v11 = vsel %vm1187_vm3, %v3094_v63, %v3093_v48  ;;  %3903 = vmatpush3.bf16.msra.mxu1 %v4107_v26 }
 0xb10   : > { %v3097_v1 = vsel %vm1190_vm4, %v3096_v0, %v3095_v11  ;;  %3904 = vmatprep.subr.bf16.mxu1 %v4458_v49 }
 0xb11   : > { %v3099_v20 = vsel %vm1193_vm5, %v3098_v14, %v3097_v1 }
 0xb12   : > { %v3101_v23 = vsel %vm1196_vm6, %v3100_v7, %v3099_v20 }
 0xb13   : > { %3103 = vadd.xlane.f32.xlu0 %v3101_v23  ;;  %3905 = vmatpush3.bf16.msra.mxu1 %v4108_v35 }
 0xb14   : > { %3906 = vmatprep.subr.bf16.mxu1 %v4458_v49 }
 0xb17   : > { %3907 = vmatpush3.bf16.msra.mxu1 %v4109_v40 }
 0xb18   : > { %3908 = vmatprep.subr.bf16.mxu1 %v4458_v49 }
 0xb1b   : > { %3909 = vmatpush3.bf16.msra.mxu1 %v4110_v15 }
 0xb9c   : > { %v3104_v54 = vpop.xlane.xlu0 %3103 }
 0xb9d   : > { %v3105_v22 = vmul.f32 0.0078125, %v3104_v54 }
 0xb9f   : > { %v3106_v28 = vadd.f32 1e-12, %v3105_v22 }
 0xba1   : > { %4153 = vrsqrt.f32 %v3106_v28 }
 0xbae   : > { %v4154_v13 = vpop.eup %4153 }
 0xbaf   : > { %v3109_v33 = vrot.slane %v4154_v13, 1  ;;  %v3110_v10 = vrot.slane %v4154_v13, 2  ;;  %v3111_v16 = vrot.slane %v4154_v13, 3  ;;  %v3112_v37 = vrot.slane %v4154_v13, 4 }
 0xbb0   : > { %v3113_v49 = vrot.slane %v4154_v13, 5  ;;  %v3114_v34 = vrot.slane %v4154_v13, 6  ;;  %v3115_v4 = vrot.slane %v4154_v13, 7  ;;  %v3124_v43 = vmul.f32 %v4154_v13, %v5451_v55 }
 0xbb1   : > { %v3125_v24 = vmul.f32 %v3109_v33, %v5453_v53  ;;  %v3126_v36 = vmul.f32 %v3110_v10, %v5455_v18  ;;  %v3127_v27 = vmul.f32 %v3111_v16, %v5457_v56  ;;  %v3128_v44 = vmul.f32 %v3112_v37, %v5459_v58 }
 0xbb2   : > { %v3129_v19 = vmul.f32 %v3113_v49, %v5461_v30  ;;  %v3130_v31 = vmul.f32 %v3114_v34, %v5463_v38  ;;  %v3131_v12 = vmul.f32 %v3115_v4, %v5465_v62  ;;  %v3138_v45 = vmul.f32 %v3752_v59, %v3124_v43 }
 0xbb3   : > { %v3139_v47 = vmul.f32 %v3752_v59, %v3125_v24  ;;  %v3140_v6 = vmul.f32 %v3752_v59, %v3126_v36  ;;  %v3141_v52 = vmul.f32 %v3752_v59, %v3127_v27  ;;  %v3142_v39 = vmul.f32 %v3752_v59, %v3128_v44 }
 0xbb4   : > { %v3143_v55 = vmul.f32 %v3752_v59, %v3129_v19  ;;  %v3144_v17 = vmul.f32 %v3752_v59, %v3130_v31  ;;  %v3145_v53 = vmul.f32 %v3752_v59, %v3131_v12  ;;  %v3152_v2 = vadd.f32 %v3753_v8, %v3138_v45  ;;  %v3754_v59 = vld [vmem:[%s1008_s5] ss:$0 sm:$0xff] }
 0xbb5   : > { %v3153_v18 = vadd.f32 %v3753_v8, %v3139_v47  ;;  %v3154_v3 = vadd.f32 %v3753_v8, %v3140_v6  ;;  %v3155_v56 = vadd.f32 %v3753_v8, %v3141_v52  ;;  %v3156_v57 = vadd.f32 %v3753_v8, %v3142_v39 }
 0xbb6   : > { %v3157_v58 = vadd.f32 %v3753_v8, %v3143_v55  ;;  %v3158_v25 = vadd.f32 %v3753_v8, %v3144_v17  ;;  %v3159_v30 = vadd.f32 %v3753_v8, %v3145_v53  ;;  %v3160_v41 = vpack.c.bf16 %v3152_v2, %v3152_v2 }
 0xbb7   : > { %v3161_v38 = vpack.c.bf16 %v3153_v18, %v3153_v18  ;;  %v3162_v60 = vpack.c.bf16 %v3154_v3, %v3154_v3  ;;  %v3163_v62 = vpack.c.bf16 %v3155_v56, %v3155_v56  ;;  %v3164_v5 = vpack.c.bf16 %v3156_v57, %v3156_v57 }
 0xbb8   : > { %v3165_v21 = vpack.c.bf16 %v3157_v58, %v3157_v58  ;;  %v3166_v50 = vpack.c.bf16 %v3158_v25, %v3158_v25  ;;  %v3167_v42 = vpack.c.bf16 %v3159_v30, %v3159_v30  ;;  %v3199_v0 = vunpack.c.l.b16 %v3160_v41 }
 0xbb9   : > { %v3200_v61 = vunpack.c.l.b16 %v3161_v38  ;;  %v3201_v29 = vunpack.c.l.b16 %v3162_v60  ;;  %v3202_v63 = vunpack.c.l.b16 %v3163_v62  ;;  %v3203_v48 = vunpack.c.l.b16 %v3164_v5 }
 0xbba   : > { %v3204_v11 = vunpack.c.l.b16 %v3165_v21  ;;  %v3205_v7 = vunpack.c.l.b16 %v3166_v50  ;;  %v3206_v20 = vunpack.c.l.b16 %v3167_v42 }
 0xbbb   : > { %v3207_v14 = vrot.slane %v3200_v61, 7  ;;  %v3209_v1 = vrot.slane %v3201_v29, 6  ;;  %v3211_v32 = vrot.slane %v3202_v63, 5  ;;  %v3213_v46 = vrot.slane %v3203_v48, 4 }
 0xbbc   : > { %v3215_v26 = vrot.slane %v3204_v11, 3  ;;  %v3217_v40 = vrot.slane %v3205_v7, 2  ;;  %v3219_v54 = vrot.slane %v3206_v20, 1 }
 0xbbd   : > { %v3208_v23 = vsel %vm1178_vm0, %v3207_v14, %v3199_v0 }
 0xbbe   : > { %v3210_v51 = vsel %vm1181_vm1, %v3209_v1, %v3208_v23 }
 0xbbf   : > { %v3212_v9 = vsel %vm1184_vm2, %v3211_v32, %v3210_v51 }
 0xbc0   : > { %v3214_v35 = vsel %vm1187_vm3, %v3213_v46, %v3212_v9 }
 0xbc1   : > { %v3216_v15 = vsel %vm1190_vm4, %v3215_v26, %v3214_v35 }
 0xbc2   : > { %v3218_v22 = vsel %vm1193_vm5, %v3217_v40, %v3216_v15 }
 0xbc3   : > { %v3220_v28 = vsel %vm1196_vm6, %v3219_v54, %v3218_v22 }
 0xbc4   : > { %v3221_v13 = vpack.c.b16 %v3220_v28, %v3220_v28 }
 0xbc6   : > { %3911 = vmatmul.mubr.bf16.vlgmr.msra.gmra.mxu1 %v3221_v13 }
 0xc86   : > { %v3305_v33 = vpop.f32.mrf.mxu1 }
 0xc87   : > { %v3306_v10 = vadd.f32 %v3754_v59, %v3305_v33 }
 0xc88   : > { %v3912_v16 = vpop.f32.mrf.mxu1 }
 0xc89   : > { %4155 = vtanh.f32 %v3306_v10 }
 0xc8a   : > { %v3308_v37 = vpop.f32.mrf.mxu1 }
 0xc8c   : > { %v3913_v49 = vpop.f32.mrf.mxu1 }
 0xc96   : > { %v4156_v34 = vpop.eup %4155 }
 0xc97   : > { %3312 = vst [vmem:[%s960_s8] sm:$0xff] %v4156_v34 }
 0xc98   : > { %4366 = shalt.err (!%p4363_p8)
}
 0xc99   : > { %s4367_s17 = scalar_lea.hbm %s5529_s1, 128  ;;  %s4371_s29 = scalar_lea.hbm %s5651_s3, 256 }
 0xc9a   : > { %p4368_p12 = scmp.ne.s32.totalorder %s5529_s1, %s4367_s17  ;;  %p4372_p4 = scmp.lt.s32.totalorder %s5529_s1, %s5651_s3 }
 0xc9b   : > { %p4373_p6 = scmp.lt.s32.totalorder %s4371_s29, %s4367_s17 }
 0xc9c   : > { %p4369_p11 = pnand %p4368_p12, %p4809_p7 }
 0xc9d   : > { %p4374_p9 = por %p4373_p6, %p4372_p4 }
 0xc9e   : > { %p4370_p13 = pneg %p4369_p11 }
 0xca0   : > { %p4375_p10 = pnand %p4374_p9, %p4370_p13 }
 0xca2   : > { %4378 = shalt.err (!%p4375_p10)
}
 0xca3   : > { %3928 = dma.vmem_to_hbm [thread:$0]  (%p4809_p7), %s3329_s28, 128, %s5529_s1, %s3314_s27  }
 0xca4 PF: > { %s5652_s5 = sld [smem:[#allocation20_spill]]  ;;  %p5655_p1 = scmp.ge.s32.totalorder %s4445_s25, 2 }
 0xca5   : > { %s5653_s15 = sld [smem:[#allocation21_spill]] }
 0xcaa   : > { %s3340_s10 = sand.u32 1, %s5652_s5  }
 0xcab   : > { %p5654_p0 = scmp.ne.s32.totalorder %s5653_s15, 0  ;;  %s3341_s8 = scalar_lea.sflag [#allocation4], %s3340_s10 }
 0xcad   : > { %p3954_p2 = pnand %p5655_p1, %p5654_p0 }
 0xcaf   : > { %p3955_p3 = pneg %p3954_p2 }
 0xcb1   : > { %4420 = dma.done.wait (%p3955_p3), %s3341_s8, 128  }
 0xcb2   : > { %4422 = vsyncadd (%p3955_p3), %s3341_s8, 4294967168  ;;  %s39_s25 = sadd.s32 1, %s4445_s25   ;;  %s5656_s1 = smov %s4429_s22 }
 0xcb3   : > { %p36_p5 = scmp.ge.s32.totalorder %s39_s25, 4   ;;  %s5657_s22 = smov %s4433_s23 }
 0xcb4   : > { %s5658_s23 = smov %s4818_s7  ;;  %s5659_s24 = smov %s4441_s2 }
 0xcb5   : > { %s5660_s2 = smov %s5662_s20  ;;  %38 = sbr.rel (!%p36_p5) target bundleno = 27 (0x1b), region = 214 }
 0xcba   :  { %3346 = vsyncpa [#allocation3], 1 }
 0xcbb   :  { %3348 = vsyncpa [#allocation3 + $0x1], 1 }
 0xcbc   :  { %3349 = vsyncpa [#allocation6], 1 }
 0xcbd   :  { %3350 = vsyncpa [#allocation9], 1 }
 0xcbe   :  { %3351 = vsyncpa [#allocation12], 1 }
 0xcbf   :  { %3352 = vsyncpa [#allocation4], 1 }
 0xcc0   :  { %3354 = vsyncpa [#allocation4 + $0x1], 1 }

// kernel: tpu_custom_call.1
= control target key start
LH: loop header
LB: loop body
LE: loop exit
PB: predicated region body
PF: predicated region fallthrough
CT: control target
= control target key end

     0   :  { %s5728_s0 = inlined_call_operand.hbm [shape: bf16[2,8,8,128], index: 0, kind: input, shape index: {}]   ;;  %s5729_s1 = inlined_call_operand.vmem [shape: bf16[2,8,1,8], index: 1, kind: input, shape index: {}]   ;;  %s5730_s2 = inlined_call_operand.vmem [shape: f32[2,1,128], index: 2, kind: input, shape index: {}]   ;;  %s5731_s3 = inlined_call_operand.vmem [shape: f32[2,1,128], index: 3, kind: input, shape index: {}]   ;;  %s5732_s4 = inlined_call_operand.hbm [shape: bf16[2,128,256], index: 4, kind: input, shape index: {}]   ;;  %s5733_s5 = inlined_call_operand.vmem [shape: f32[2,1,256], index: 5, kind: input, shape index: {}]   ;;  %s5734_s6 = inlined_call_operand.hbm [shape: bf16[2,128,128], index: 6, kind: input, shape index: {}]   ;;  %s5735_s7 = inlined_call_operand.vmem [shape: f32[2,1,128], index: 7, kind: input, shape index: {}]   ;;  %s5736_s8 = inlined_call_operand.hbm [shape: bf16[2,128,128], index: 8, kind: input, shape index: {}]   ;;  %s5737_s9 = inlined_call_operand.vmem [shape: f32[2,1,128], index: 9, kind: input, shape index: {}]   ;;  %s5738_s10 = inlined_call_operand.vmem [shape: f32[2,1,128], index: 10, kind: input, shape index: {}]   ;;  %s5739_s11 = inlined_call_operand.vmem [shape: f32[2,1,128], index: 11, kind: input, shape index: {}]   ;;  %s5740_s12 = inlined_call_operand.hbm [shape: bf16[2,128,256], index: 12, kind: input, shape index: {}]   ;;  %s5741_s13 = inlined_call_operand.vmem [shape: f32[2,1,256], index: 13, kind: input, shape index: {}]   ;;  %s5742_s14 = inlined_call_operand.hbm [shape: bf16[2,256,128], index: 14, kind: input, shape index: {}]   ;;  %s5743_s15 = inlined_call_operand.vmem [shape: f32[2,1,128], index: 15, kind: input, shape index: {}]   ;;  %s5744_s16 = inlined_call_operand.vmem [shape: f32[2,1,128], index: 16, kind: input, shape index: {}]   ;;  %s5745_s17 = inlined_call_operand.vmem [shape: f32[2,1,128], index: 17, kind: input, shape index: {}]   ;;  %s5746_s18 = inlined_call_operand.hbm [shape: bf16[2,128,128], index: 18, kind: input, shape index: {}]   ;;  %s5747_s19 = inlined_call_operand.vmem [shape: f32[2,1,128], index: 19, kind: input, shape index: {}]   ;;  %s5748_s20 = inlined_call_operand.hbm [shape: f32[2,8,128], index: 20, kind: output, shape index: {}]  }
   0x1   :  { %5768 = sst [smem:[#allocation31_spill]] %s5728_s0 }
   0x2   :  { %5769 = sst [smem:[#allocation32_spill]] %s5729_s1 }
   0x3   :  { %5770 = sst [smem:[#allocation33_spill]] %s5730_s2 }
   0x4   :  { %5771 = sst [smem:[#allocation34_spill]] %s5731_s3 }
   0x5   :  { %5772 = sst [smem:[#allocation35_spill]] %s5732_s4 }
   0x6   :  { %5773 = sst [smem:[#allocation36_spill]] %s5733_s5 }
   0x7   :  { %5774 = sst [smem:[#allocation37_spill]] %s5735_s7 }
   0x8   :  { %5775 = sst [smem:[#allocation38_spill]] %s5736_s8 }
   0x9   :  { %5776 = sst [smem:[#allocation39_spill]] %s5737_s9 }
   0xa   :  { %5777 = sst [smem:[#allocation40_spill]] %s5738_s10 }
   0xb   :  { %5778 = sst [smem:[#allocation41_spill]] %s5739_s11 }
   0xc   :  { %5779 = sst [smem:[#allocation42_spill]] %s5741_s13 }
   0xd   :  { %5780 = sst [smem:[#allocation43_spill]] %s5742_s14 }
   0xe   :  { %5781 = sst [smem:[#allocation44_spill]] %s5743_s15 }
   0xf   :  { %5782 = sst [smem:[#allocation45_spill]] %s5744_s16 }
  0x10   :  { %5783 = sst [smem:[#allocation46_spill]] %s5745_s17 }
  0x11   :  { %5784 = sst [smem:[#allocation47_spill]] %s5747_s19 }
  0x12   :  { %5785 = sst [smem:[#allocation48_spill]] %s5748_s20 }
  0x13   :  { %25 = vsyncpa [#allocation3], 0 }
  0x14   :  { %27 = vsyncpa [#allocation3 + $0x1], 0 }
  0x15   :  { %28 = vsyncpa [#allocation6], 0 }
  0x16   :  { %30 = vsyncpa [#allocation6 + $0x1], 0 }
  0x17   :  { %31 = vsyncpa [#allocation9], 0 }
  0x18   :  { %33 = vsyncpa [#allocation9 + $0x1], 0 }
  0x19   :  { %34 = vsyncpa [#allocation12], 0 }
  0x1a   :  { %36 = vsyncpa [#allocation12 + $0x1], 0 }
  0x1b   :  { %37 = vsyncpa [#allocation4], 0 }
  0x1c   :  { %39 = vsyncpa [#allocation4 + $0x1], 0  ;;  %s4693_s1 = smov 0   ;;  %s4695_s22 = smov 0  }
  0x1d   :  { %s4697_s23 = smov 0   ;;  %s4699_s24 = smov 0  }
  0x1e   :  { %s4701_s2 = smov 0   ;;  %s4703_s25 = smov 0  }
  0x1f LB: > { %5786 = sst [smem:[#allocation20_spill]] %s4550_s1  ;;  %s4724_s3 = sadd.s32 4294967295, %s4570_s25   ;;  %s4570_s25 = sphi %s4703_s25, %s45_s25   ;;  %s4566_s2 = sphi %s4701_s2, %s5841_s2   ;;  %s4562_s24 = sphi %s4699_s24, %s5840_s24   ;;  %s4558_s23 = sphi %s4697_s23, %s5838_s23   ;;  %s4554_s22 = sphi %s4695_s22, %s5837_s22   ;;  %s4550_s1 = sphi %s4693_s1, %s5836_s1  }
  0x20   : > { %5787 = sst [smem:[#allocation21_spill]] %s4554_s22  ;;  %s3765_s26 = sadd.s32 4294967294, %s4570_s25  }
  0x21   : > { %5788 = sst [smem:[#allocation22_spill]] %s4558_s23  ;;  %s57_s27 = sadd.s32 1, %s4566_s2 }
  0x22   : > { %5789 = sst [smem:[#allocation23_spill]] %s4562_s24  ;;  %s66_s28 = sadd.s32 1, %s4558_s23 }
  0x23   : > { %5790 = sst [smem:[#allocation24_spill]] %s4570_s25  ;;  %p59_p0 = scmp.ge.s32.totalorder %s57_s27, 2 }
  0x24   : > { %5791 = sst [smem:[#allocation25_spill]] %s4724_s3  ;;  %p73_p1 = scmp.ne.s32.totalorder %s4558_s23, %s4554_s22 }
  0x25   : > { %p74_p2 = scmp.eq.s32.totalorder %s4570_s25, 0  ;;  %p79_p3 = scmp.ne.s32.totalorder %s4554_s22, %s4550_s1 }
  0x26   : > { %s5843_s27 = smov (%p59_p0, %s57_s27), 0  ;;  %p80_p5 = scmp.eq.s32.totalorder %s4724_s3, 0 }
  0x27   : > { %5792 = sst [smem:[#allocation26_spill]] %s5843_s27  ;;  %p4736_p4 = por %p74_p2, %p73_p1 }
  0x28   : > { %s61_s29 = ssub.s32 %s4566_s2, %s5843_s27  ;;  %p601_p6 = scmp.eq.s32.totalorder %s4724_s3, 1 }
  0x29   : > { %p64_p7 = scmp.eq.s32.totalorder %s61_s29, 0  ;;  %p4744_p8 = por %p80_p5, %p79_p3 }
  0x2a   : > { %p4748_p9 = por %p601_p6, %p73_p1  ;;  %p607_p10 = scmp.eq.s32.totalorder %s3765_s26, 1 }
  0x2b   : > { %s5794_s30 = scalar_select %p4744_p8, 1, 0 }
  0x2c   : > { %s5796_s0 = scalar_select %p4748_p9, 1, 0 }
  0x2d   : > { %5795 = sst [smem:[#allocation27_spill]] %s5794_s30  ;;  %p4755_p11 = por %p607_p10, %p79_p3 }
  0x2e   : > { %5797 = sst [smem:[#allocation28_spill]] %s5796_s0  ;;  %p3767_p12 = scmp.ge.s32.totalorder %s4570_s25, 2 }
  0x2f   : > { %s4753_s21 = scalar_select %p64_p7, %s4558_s23, %s66_s28  }
  0x30   : > { %s5799_s1 = scalar_select %p4755_p11, 1, 0 }
  0x31   : > { %5798 = sst [smem:[#allocation29_spill]] %s4753_s21  ;;  %p4088_p13 = scmp.lt.s32.totalorder %s4570_s25, 2 }
  0x32   : > { %5800 = sst [smem:[#allocation30_spill]] %s5799_s1  ;;  %s4762_s27 = sand.u32 1, %s4558_s23  }
  0x33   : > { %s4765_s29 = sand.u32 1, %s4570_s25   ;;  %s4768_s20 = sshll.u32 %s4762_s27, 7 }
  0x34   : > { %p4772_p0 = pnand %p4088_p13, %p4736_p4  ;;  %s4777_s28 = sshll.u32 %s4566_s2, 11 }
  0x35   : > { %s5802_s23 = sld [smem:[#allocation35_spill]]  ;;  %s678_s19 = scalar_lea.vmem [#allocation5], %s4768_s20 }
  0x36   : > { %s685_s17 = sshll.u32 %s678_s19, 4  ;;  %s5758_s16 = scalar_lea.sflag [#allocation6], %s4765_s29  ;;  %s686_s17 = int_to_ptr.vmem [resolvable:$true] %s685_s17 }
  0x37   : > { %p4787_p1 = pneg %p4772_p0  ;;  %s4295_s15 = scalar_lea.vmem %s686_s17, 2048 }
  0x38   : > { %p4296_p2 = scmp.ne.s32.totalorder %s686_s17, %s4295_s15  ;;  %s4572_s13 = smov [#allocation5]  }
  0x39   : > { %s4300_s11 = sshll.u32 %s4572_s13, 4  ;;  %s4301_s11 = int_to_ptr.vmem [resolvable:$false] %s4300_s11 }
  0x3a   : > { %p4298_p3 = pnand %p4296_p2, %p4787_p1  ;;  %s4302_s1 = scalar_lea.vmem %s4301_s11, 4096 }
  0x3b   : > { %s684_s0 = scalar_lea.hbm %s5802_s23, %s4777_s28  ;;  %p4303_p5 = scmp.lt.s32.totalorder %s686_s17, %s4301_s11 }
  0x3c   : > { %p4299_p4 = pneg %p4298_p3  ;;  %p4304_p6 = scmp.lt.s32.totalorder %s4302_s1, %s4295_s15 }
  0x3e   : > { %p4305_p7 = por %p4304_p6, %p4303_p5 }
  0x40   : > { %p4306_p10 = pnand %p4305_p7, %p4299_p4 }
  0x42   : > { %4309 = shalt.err (!%p4306_p10)
}
  0x43   : > { %s5756_s19 = smov 128   ;;  %s5757_s23 = smov 8  }
  0x44   : > { %4068 = dma.hbm_to_vmem [thread:$0]  (!%p4772_p0), %s684_s0, 2048, %s686_s17, %s5758_s16, %s5756_s19, %s5756_s19, %s5757_s23  }
  0x45   : > { %p3789_p13 = scmp.ge.s32.totalorder %s4570_s25, 1  ;;  %p860_p2 = scmp.lt.s32.totalorder %s4570_s25, 3 }
  0x46   : > { %s4807_s13 = sshll.u32 %s4762_s27, 6  ;;  %s4810_s15 = sshll.u32 %s4566_s2, 10 }
  0x47   : > { %p4802_p3 = pnand %p3789_p13, %p860_p2  ;;  %s5805_s8 = sld [smem:[#allocation38_spill]] }
  0x48   : > { %s733_s9 = scalar_lea.vmem [#allocation8], %s4807_s13  ;;  %s5763_s17 = scalar_lea.sflag [#allocation9], %s4765_s29 }
  0x49   : > { %s740_s7 = sshll.u32 %s733_s9, 4  ;;  %s4575_s19 = smov [#allocation8]   ;;  %s741_s7 = int_to_ptr.vmem [resolvable:$true] %s740_s7 }
  0x4a   : > { %s4323_s0 = scalar_lea.vmem %s741_s7, 1024  ;;  %s4328_s23 = sshll.u32 %s4575_s19, 4  ;;  %s4329_s23 = int_to_ptr.vmem [resolvable:$false] %s4328_s23 }
  0x4b   : > { %p4324_p4 = scmp.ne.s32.totalorder %s741_s7, %s4323_s0  ;;  %s4330_s16 = scalar_lea.vmem %s4329_s23, 2048 }
  0x4c   : > { %p4331_p7 = scmp.lt.s32.totalorder %s741_s7, %s4329_s23  ;;  %p4332_p10 = scmp.lt.s32.totalorder %s4330_s16, %s4323_s0 }
  0x4d   : > { %s739_s10 = scalar_lea.hbm %s5805_s8, %s4810_s15  ;;  %p4326_p5 = pnand %p4324_p4, %p4787_p1 }
  0x4e   : > { %p4333_p13 = por %p4332_p10, %p4331_p7 }
  0x4f   : > { %p4327_p6 = pneg %p4326_p5 }
  0x51   : > { %p4334_p2 = pnand %p4333_p13, %p4327_p6 }
  0x53   : > { %4337 = shalt.err (!%p4334_p2)
}
  0x54   : > { %s4576_s21 = smov 64   ;;  %s4577_s9 = smov 4  }
  0x55   : > { %4074 = dma.hbm_to_vmem [thread:$0]  (!%p4772_p0), %s739_s10, 1024, %s741_s7, %s5763_s17, %s4576_s21, %s4576_s21, %s4577_s9  }
  0x56   : > { %s5806_s14 = sld [smem:[#allocation43_spill]]  ;;  %s800_s1 = scalar_lea.vmem [#allocation11], %s4768_s20 }
  0x57   : > { %s807_s0 = sshll.u32 %s800_s1, 4  ;;  %s5767_s8 = scalar_lea.sflag [#allocation12], %s4765_s29  ;;  %s808_s0 = int_to_ptr.vmem [resolvable:$true] %s807_s0 }
  0x58   : > { %s4351_s25 = scalar_lea.vmem %s808_s0, 2048  ;;  %s4578_s5 = smov [#allocation11]  }
  0x59   : > { %p4352_p4 = scmp.ne.s32.totalorder %s808_s0, %s4351_s25  ;;  %s4356_s24 = sshll.u32 %s4578_s5, 4  ;;  %s4357_s24 = int_to_ptr.vmem [resolvable:$false] %s4356_s24 }
  0x5a   : > { %s4358_s3 = scalar_lea.vmem %s4357_s24, 4096  ;;  %p4359_p7 = scmp.lt.s32.totalorder %s808_s0, %s4357_s24 }
  0x5b   : > { %p4354_p5 = pnand %p4352_p4, %p4787_p1  ;;  %p4360_p10 = scmp.lt.s32.totalorder %s4358_s3, %s4351_s25 }
  0x5c   : > { %s806_s16 = scalar_lea.hbm %s5806_s14, %s4777_s28 }
  0x5d   : > { %p4355_p6 = pneg %p4354_p5  ;;  %p4361_p13 = por %p4360_p10, %p4359_p7 }
  0x5f   : > { %p4362_p2 = pnand %p4361_p13, %p4355_p6 }
  0x61   : > { %4365 = shalt.err (!%p4362_p2)
}
  0x62   : > { %4080 = dma.hbm_to_vmem [thread:$0]  (!%p4772_p0), %s806_s16, 2048, %s808_s0, %s5767_s8, %s4576_s21, %s4576_s21, %s4577_s9  }
  0x63   : > { %s3768_s5 = sshll.u32 %s4762_s27, 5  ;;  %s3899_s7 = sshll.u32 %s4566_s2, 9 }
  0x64   : > { %s5807_s25 = sld [smem:[#allocation31_spill]]  ;;  %s631_s19 = scalar_lea.vmem [#allocation2], %s3768_s5 }
  0x65   : > { %s640_s23 = sshll.u32 %s631_s19, 4  ;;  %s712_s14 = scalar_lea.hbm %s5734_s6, %s4810_s15  ;;  %s641_s23 = int_to_ptr.vmem [resolvable:$true] %s640_s23 }
  0x66   : > { %s628_s30 = scalar_lea.sflag [#allocation3], %s4762_s27  ;;  %s4379_s22 = scalar_lea.vmem %s641_s23, 512 }
  0x67   : > { %p4380_p4 = scmp.ne.s32.totalorder %s641_s23, %s4379_s22  ;;  %s4579_s16 = smov [#allocation2]  }
  0x68   : > { %s4384_s0 = sshll.u32 %s4579_s16, 4  ;;  %s4385_s0 = int_to_ptr.vmem [resolvable:$false] %s4384_s0 }
  0x69   : > { %p4382_p5 = pnand %p4380_p4, %p4787_p1  ;;  %s4386_s8 = scalar_lea.vmem %s4385_s0, 1024 }
  0x6a   : > { %s639_s3 = scalar_lea.hbm %s5807_s25, %s3899_s7  ;;  %p4387_p7 = scmp.lt.s32.totalorder %s641_s23, %s4385_s0 }
  0x6b   : > { %p4383_p6 = pneg %p4382_p5  ;;  %p4388_p10 = scmp.lt.s32.totalorder %s4386_s8, %s4379_s22 }
  0x6d   : > { %p4389_p13 = por %p4388_p10, %p4387_p7 }
  0x6f   : > { %p4390_p2 = pnand %p4389_p13, %p4383_p6 }
  0x71   : > { %4393 = shalt.err (!%p4390_p2)
}
  0x72   : > { %4065 = dma.hbm_to_vmem [thread:$0]  (!%p4772_p0), %s639_s3, 512, %s641_s23, %s628_s30, %s4576_s21, %s4576_s21, %s4577_s9  }
  0x73   : > { %s706_s27 = scalar_lea.vmem [#allocation7], %s4807_s13  ;;  %s778_s10 = scalar_lea.hbm %s5740_s12, %s4777_s28 }
  0x74   : > { %s713_s17 = sshll.u32 %s706_s27, 4  ;;  %s4580_s22 = smov [#allocation7]   ;;  %s714_s17 = int_to_ptr.vmem [resolvable:$true] %s713_s17 }
  0x75   : > { %s4407_s8 = scalar_lea.vmem %s714_s17, 1024  ;;  %s4412_s24 = sshll.u32 %s4580_s22, 4  ;;  %s4413_s24 = int_to_ptr.vmem [resolvable:$false] %s4412_s24 }
  0x76   : > { %p4408_p4 = scmp.ne.s32.totalorder %s714_s17, %s4407_s8  ;;  %s4414_s25 = scalar_lea.vmem %s4413_s24, 2048 }
  0x77   : > { %p4415_p7 = scmp.lt.s32.totalorder %s714_s17, %s4413_s24  ;;  %p4416_p10 = scmp.lt.s32.totalorder %s4414_s25, %s4407_s8 }
  0x78   : > { %p4410_p5 = pnand %p4408_p4, %p4787_p1 }
  0x79   : > { %p4417_p13 = por %p4416_p10, %p4415_p7 }
  0x7a   : > { %p4411_p6 = pneg %p4410_p5 }
  0x7c   : > { %p4418_p2 = pnand %p4417_p13, %p4411_p6 }
  0x7e   : > { %4421 = shalt.err (!%p4418_p2)
}
  0x7f   : > { %s5808_s30 = scalar_lea.sflag [#allocation6], %s4765_s29  ;;  %s772_s23 = scalar_lea.vmem [#allocation10], %s4768_s20 }
  0x80   : > { %4071 = dma.hbm_to_vmem [thread:$0]  (!%p4772_p0), %s712_s14, 1024, %s714_s17, %s5808_s30, %s4576_s21, %s4576_s21, %s4577_s9  }
  0x81   : > { %s779_s1 = sshll.u32 %s772_s23, 4  ;;  %s845_s27 = scalar_lea.hbm %s5746_s18, %s4810_s15  ;;  %s780_s1 = int_to_ptr.vmem [resolvable:$true] %s779_s1 }
  0x82   : > { %s4435_s5 = scalar_lea.vmem %s780_s1, 2048  ;;  %s4581_s7 = smov [#allocation10]  }
  0x83   : > { %p4436_p4 = scmp.ne.s32.totalorder %s780_s1, %s4435_s5  ;;  %s4440_s8 = sshll.u32 %s4581_s7, 4  ;;  %s4441_s8 = int_to_ptr.vmem [resolvable:$false] %s4440_s8 }
  0x84   : > { %s4442_s22 = scalar_lea.vmem %s4441_s8, 4096  ;;  %p4443_p7 = scmp.lt.s32.totalorder %s780_s1, %s4441_s8 }
  0x85   : > { %p4438_p5 = pnand %p4436_p4, %p4787_p1  ;;  %p4444_p10 = scmp.lt.s32.totalorder %s4442_s22, %s4435_s5 }
  0x87   : > { %p4439_p6 = pneg %p4438_p5  ;;  %p4445_p13 = por %p4444_p10, %p4443_p7 }
  0x89   : > { %p4446_p2 = pnand %p4445_p13, %p4439_p6 }
  0x8b   : > { %4449 = shalt.err (!%p4446_p2)
}
  0x8c   : > { %s5809_s14 = smov 8   ;;  %s5810_s20 = smov 128  }
  0x8d   : > { %s5811_s17 = scalar_lea.sflag [#allocation9], %s4765_s29  ;;  %s839_s30 = scalar_lea.vmem [#allocation13], %s4807_s13 }
  0x8e   : > { %4077 = dma.hbm_to_vmem [thread:$0]  (!%p4772_p0), %s778_s10, 2048, %s780_s1, %s5811_s17, %s5810_s20, %s5810_s20, %s5809_s14  }
  0x8f   : > { %s846_s3 = sshll.u32 %s839_s30, 4  ;;  %s4582_s23 = smov [#allocation13]   ;;  %s847_s3 = int_to_ptr.vmem [resolvable:$true] %s846_s3 }
  0x90   : > { %s4463_s19 = scalar_lea.vmem %s847_s3, 1024  ;;  %s4468_s16 = sshll.u32 %s4582_s23, 4  ;;  %s4469_s16 = int_to_ptr.vmem [resolvable:$false] %s4468_s16 }
  0x91   : > { %p4464_p4 = scmp.ne.s32.totalorder %s847_s3, %s4463_s19  ;;  %s4470_s0 = scalar_lea.vmem %s4469_s16, 2048 }
  0x92   : > { %p4471_p7 = scmp.lt.s32.totalorder %s847_s3, %s4469_s16  ;;  %p4472_p10 = scmp.lt.s32.totalorder %s4470_s0, %s4463_s19 }
  0x93   : > { %p4466_p5 = pnand %p4464_p4, %p4787_p1 }
  0x94   : > { %p4473_p13 = por %p4472_p10, %p4471_p7 }
  0x95   : > { %p4467_p6 = pneg %p4466_p5 }
  0x97   : > { %p4474_p2 = pnand %p4473_p13, %p4467_p6 }
  0x99   : > { %4477 = shalt.err (!%p4474_p2)
}
  0x9a   : > { %s5812_s28 = scalar_lea.sflag [#allocation12], %s4765_s29  ;;  %864 = sbr.rel (%p4802_p3) target bundleno = 3195 (0xc7b), region = 100 }
  0x9b   : > { %4083 = dma.hbm_to_vmem [thread:$0]  (!%p4772_p0), %s845_s27, 1024, %s847_s3, %s5812_s28, %s4576_s21, %s4576_s21, %s4577_s9  }
  0x9c   : > { %s5813_s10 = sld [smem:[#allocation21_spill]] (!%p4802_p3) }
  0xa2   : > { %s4915_s5 = sand.u32 1, %s5813_s10  }
  0xa3   : > { %s3790_s26 = sshll.u32 %s4915_s5, 5  ;;  %s867_s7 = scalar_lea.sflag [#allocation3], %s4915_s5 }
  0xa4   : > { %s870_s8 = scalar_lea.vmem [#allocation2], %s3790_s26 }
  0xa5   : > { %4529 = dma.done.wait (%p4744_p8), %s867_s7, 512  }
  0xa6   : > { %4531 = vsyncadd (%p4744_p8), %s867_s7, 4294966784  ;;  %s5815_s29 = sld [smem:[#allocation25_spill]]  ;;  %s3791_s11 = sshll.u32 %s4915_s5, 7 }
  0xa7   : > { %s4925_s9 = scalar_lea.vmem [#allocation5], %s3791_s11 }
  0xac   : > { %s875_s15 = sand.u32 1, %s5815_s29  }
  0xad   : > { %s876_s21 = scalar_lea.sflag [#allocation6], %s875_s15 }
  0xae   : > { %4533 = dma.done.wait (%p4744_p8), %s876_s21, 3072  }
  0xaf   : > { %4535 = vsyncadd (%p4744_p8), %s876_s21, 4294964224  ;;  %s4932_s27 = sshll.u32 %s4915_s5, 6  ;;  %s894_s14 = scalar_lea.sflag [#allocation9], %s875_s15 }
  0xb0   : > { %s4935_s22 = scalar_lea.vmem [#allocation7], %s4932_s27  ;;  %s4938_s20 = scalar_lea.vmem [#allocation8], %s4932_s27 }
  0xb1   : > { %4537 = dma.done.wait (%p4744_p8), %s894_s14, 3072  }
  0xb2   : > { %4539 = vsyncadd (%p4744_p8), %s894_s14, 4294964224  ;;  %s4944_s17 = scalar_lea.vmem [#allocation10], %s3791_s11  ;;  %s912_s24 = scalar_lea.sflag [#allocation12], %s875_s15 }
  0xb3   : > { %s4946_s25 = scalar_lea.vmem [#allocation11], %s3791_s11 }
  0xb4   : > { %4541 = dma.done.wait (%p4744_p8), %s912_s24, 3072  }
  0xb5   : > { %4543 = vsyncadd (%p4744_p8), %s912_s24, 4294964224  ;;  %v3919_v0 = vld [vmem:[%s870_s8] sm:$0xff]   ;;  %v3934_v1 = vld [vmem:[%s870_s8 + $0x8] sm:$0xff]   ;;  %vm1274_vm0 = vcmask 1041409   ;;  %vm1277_vm1 = vcmask 1042434   ;;  %vm1280_vm2 = vcmask 1043459  }
  0xb6   : > { %v3935_v2 = vld [vmem:[%s870_s8 + $0x10] sm:$0xff]   ;;  %v4952_v3 = vunpack.c.h.bf16 %v3919_v0  ;;  %v4954_v4 = vunpack.c.l.bf16 %v3919_v0  ;;  %v4956_v5 = vunpack.c.l.bf16 %v3934_v1  ;;  %v4958_v6 = vunpack.c.h.bf16 %v3934_v1  ;;  %v3936_v7 = vld [vmem:[%s870_s8 + $0x18] sm:$0xff]   ;;  %s5816_s30 = sld [smem:[#allocation23_spill]]  ;;  %s924_s24 = scalar_lea.vmem [#allocation13], %s4932_s27 }
  0xb7   : > { %v4960_v8 = vunpack.c.l.bf16 %v3935_v2  ;;  %v4962_v9 = vunpack.c.h.bf16 %v3935_v2  ;;  %v4964_v10 = vunpack.c.l.bf16 %v3936_v7  ;;  %v4968_v12 = vunpack.c.h.bf16 %v3936_v7  ;;  %s5817_s0 = sld [smem:[#allocation32_spill]] }
  0xb8   : > { %1142 = vadd.xlane.f32.xlu1 %v4952_v3  ;;  %v1273_v11 = vrot.slane %v4952_v3, 7  ;;  %v1276_v13 = vrot.slane %v4956_v5, 6  ;;  %v1279_v14 = vrot.slane %v4958_v6, 5  ;;  %vm1283_vm3 = vcmask 1044484   ;;  %s5818_s10 = sld [smem:[#allocation33_spill]] }
  0xb9   : > { %v1282_v15 = vrot.slane %v4960_v8, 4  ;;  %v1285_v17 = vrot.slane %v4962_v9, 3  ;;  %vm1286_vm4 = vcmask 1045509   ;;  %v1288_v19 = vrot.slane %v4964_v10, 2  ;;  %s5819_s8 = sld [smem:[#allocation34_spill]] }
  0xba   : > { %v1275_v16 = vsel %vm1274_vm0, %v1273_v11, %v4954_v4  ;;  %vm1289_vm5 = vcmask 1046534   ;;  %v1291_v21 = vrot.slane %v4968_v12, 1  ;;  %vm1292_vm6 = vcmask 1047559   ;;  %s5825_s21 = sld [smem:[#allocation42_spill]] }
  0xbb   : > { %v1278_v18 = vsel %vm1277_vm1, %v1276_v13, %v1275_v16  ;;  %vm4585_vm7 = vmmov 0   ;;  %vm2086_vm8 = vcmask 64512  }
  0xbc   : > { %1144 = vadd.xlane.f32.xlu1 %v4956_v5  ;;  %v1281_v20 = vsel %vm1280_vm2, %v1279_v14, %v1278_v18  ;;  %p1059_p8 = scmp.lt.s32.totalorder %s5816_s30, 1 }
  0xbd   : > { %v1284_v22 = vsel %vm1283_vm3, %v1282_v15, %v1281_v20 }
  0xbe   : > { %v1287_v23 = vsel %vm1286_vm4, %v1285_v17, %v1284_v22  ;;  %s5118_s3 = scalar_select %p1059_p8, %s5816_s30, 1 }
  0xbf   : > { %v1290_v24 = vsel %vm1289_vm5, %v1288_v19, %v1287_v23 }
  0xc0   : > { %1148 = vadd.xlane.f32.xlu1 %v4960_v8  ;;  %v1293_v25 = vsel %vm1292_vm6, %v1291_v21, %v1290_v24  ;;  %s3798_s19 = sshll.u32 %s5118_s3, 3  ;;  %s1069_s1 = scalar_lea.vmem %s5818_s10, %s5118_s3 }
  0xc1   : > { %1295 = vadd.xlane.f32.xlu0 %v1293_v25  ;;  %s5124_s28 = scalar_lea.vmem %s5817_s0, %s3798_s19  ;;  %s1072_s29 = scalar_lea.vmem %s5819_s8, %s5118_s3 }
  0xc2   : > { %s3799_s15 = sshll.u32 %s5118_s3, 1  ;;  %s5821_s19 = sld [smem:[#allocation37_spill]] }
  0xc3   : > { %s5822_s0 = sld [smem:[#allocation39_spill]] }
  0xc4   : > { %1152 = vadd.xlane.f32.xlu1 %v4964_v10  ;;  %s5823_s10 = sld [smem:[#allocation40_spill]] }
  0xc5   : > { %1140 = vadd.xlane.f32.xlu0 %v4954_v4  ;;  %s5824_s8 = sld [smem:[#allocation41_spill]] }
  0xc8   : > { %s1079_s23 = scalar_lea.vmem %s5821_s19, %s5118_s3 }
  0xc9   : > { %1146 = vadd.xlane.f32.xlu0 %v4958_v6 }
  0xcd   : > { %1150 = vadd.xlane.f32.xlu0 %v4962_v9 }
  0xd1   : > { %1154 = vadd.xlane.f32.xlu0 %v4968_v12 }
 0x141   : > { %v1143_v26 = vpop.xlane.xlu1 %1142 }
 0x142   : > { %v1158_v27 = vmul.f32 0.0078125, %v1143_v26 }
 0x144   : > { %v4992_v28 = vsub.f32 %v4952_v3, %v1158_v27 }
 0x145   : > { %v1145_v29 = vpop.xlane.xlu1 %1144 }
 0x146   : > { %v1159_v30 = vmul.f32 0.0078125, %v1145_v29  ;;  %v1174_v31 = vmul.f32 %v4992_v28, %v4992_v28  ;;  %v4148_v29 = vld [vmem:[%s4925_s9 + $0x74] ss:$8 sps:$4 sm:$0xff]  }
 0x147   : > { %1530 = vmatprep.subr.bf16.mxu0 %v4148_v29 }
 0x148   : > { %v4997_v32 = vsub.f32 %v4956_v5, %v1159_v30  ;;  %1183 = vadd.xlane.f32.xlu0 %v1174_v31  ;;  %v4150_v31 = vld [vmem:[%s4925_s9 + $0x70] ss:$8 sps:$4 sm:$0xff]  }
 0x149   : > { %v1149_v33 = vpop.xlane.xlu1 %1148  ;;  %1531 = vmatpush1.bf16.msra.mxu0 %v4150_v31 }
 0x14a   : > { %v1161_v34 = vmul.f32 0.0078125, %v1149_v33  ;;  %v1296_v35 = vpop.xlane.xlu0 %1295  ;;  %v1175_v36 = vmul.f32 %v4997_v32, %v4997_v32 }
 0x14b   : > { %v1297_v37 = vmul.f32 0.0078125, %v1296_v35 }
 0x14c   : > { %v5002_v38 = vsub.f32 %v4960_v8, %v1161_v34  ;;  %1185 = vadd.xlane.f32.xlu0 %v1175_v36  ;;  %v4151_v36 = vld [vmem:[%s4925_s9 + $0x64] ss:$8 sps:$4 sm:$0xff]  }
 0x14d   : > { %v1153_v39 = vpop.xlane.xlu1 %1152  ;;  %v1299_v40 = vrot.slane %v1297_v37, 1  ;;  %v1300_v41 = vrot.slane %v1297_v37, 2  ;;  %v1301_v42 = vrot.slane %v1297_v37, 3  ;;  %v1302_v43 = vrot.slane %v1297_v37, 4  ;;  %1532 = vmatprep.subr.bf16.mxu0 %v4151_v36 }
 0x14e   : > { %v1163_v44 = vmul.f32 0.0078125, %v1153_v39  ;;  %v1141_v45 = vpop.xlane.xlu0 %1140  ;;  %v1177_v46 = vmul.f32 %v5002_v38, %v5002_v38  ;;  %v1303_v47 = vrot.slane %v1297_v37, 5  ;;  %v1304_v48 = vrot.slane %v1297_v37, 6 }
 0x14f   : > { %v1157_v49 = vmul.f32 0.0078125, %v1141_v45  ;;  %v1305_v50 = vrot.slane %v1297_v37, 7  ;;  %v5007_v51 = vsub.f32 %v4954_v4, %v1297_v37  ;;  %v5010_v52 = vsub.f32 %v4952_v3, %v1299_v40  ;;  %v4153_v37 = vld [vmem:[%s4925_s9 + $0x60] ss:$8 sps:$4 sm:$0xff]   ;;  %v4162_v45 = vld [vmem:[%s4925_s9 + $0x30] ss:$8 sps:$4 sm:$0xff]  }
 0x150   : > { %v5013_v53 = vsub.f32 %v4964_v10, %v1163_v44  ;;  %1189 = vadd.xlane.f32.xlu0 %v1177_v46  ;;  %v5016_v54 = vsub.f32 %v4956_v5, %v1300_v41  ;;  %v5019_v55 = vsub.f32 %v4958_v6, %v1301_v42  ;;  %v5022_v56 = vsub.f32 %v4960_v8, %v1302_v43  ;;  %v4156_v41 = vld [vmem:[%s4925_s9 + $0x50] ss:$8 sps:$4 sm:$0xff]   ;;  %v4157_v42 = vld [vmem:[%s4925_s9 + $0x44] ss:$8 sps:$4 sm:$0xff]   ;;  %v4160_v44 = vld [vmem:[%s4925_s9 + $0x34] ss:$8 sps:$4 sm:$0xff]  }
 0x151   : > { %v5025_v57 = vsub.f32 %v4954_v4, %v1157_v49  ;;  %v5028_v58 = vsub.f32 %v4962_v9, %v1303_v47  ;;  %v5031_v59 = vsub.f32 %v4964_v10, %v1304_v48  ;;  %v5036_v62 = vsub.f32 %v4968_v12, %v1305_v50  ;;  %1533 = vmatpush1.bf16.msra.mxu0 %v4153_v37  ;;  %v4163_v46 = vld [vmem:[%s4925_s9 + $0x24] ss:$8 sps:$4 sm:$0xff]   ;;  %v4165_v47 = vld [vmem:[%s4925_s9 + $0x20] ss:$8 sps:$4 sm:$0xff]   ;;  %v4166_v48 = vld [vmem:[%s4935_s22 + $0x38] sm:$0xff]  }
 0x152   : > { %v1179_v60 = vmul.f32 %v5013_v53, %v5013_v53  ;;  %v1147_v61 = vpop.xlane.xlu0 %1146  ;;  %v1323_v63 = vmul.f32 %v5010_v52, %v5010_v52  ;;  %v1324_v0 = vmul.f32 %v5016_v54, %v5016_v54  ;;  %v1325_v2 = vmul.f32 %v5019_v55, %v5019_v55  ;;  %v4167_v50 = vld [vmem:[%s4925_s9 + $0x14] ss:$8 sps:$4 sm:$0xff]  }
 0x153   : > { %v1173_v1 = vmul.f32 %v5025_v57, %v5025_v57  ;;  %v1326_v3 = vmul.f32 %v5022_v56, %v5022_v56  ;;  %v1322_v4 = vmul.f32 %v5007_v51, %v5007_v51  ;;  %v1327_v5 = vmul.f32 %v5028_v58, %v5028_v58 }
 0x154   : > { %1193 = vadd.xlane.f32.xlu0 %v1179_v60  ;;  %v1338_v7 = vrot.slane %v1323_v63, 7  ;;  %v1160_v8 = vmul.f32 0.0078125, %v1147_v61  ;;  %v1328_v10 = vmul.f32 %v5031_v59, %v5031_v59  ;;  %v1340_v11 = vrot.slane %v1324_v0, 6  ;;  %v4169_v60 = vld [vmem:[%s4925_s9 + $0x10] ss:$8 sps:$4 sm:$0xff]  }
 0x155   : > { %1181 = vadd.xlane.f32.xlu1 %v1173_v1  ;;  %v1329_v13 = vmul.f32 %v5036_v62, %v5036_v62  ;;  %v1342_v15 = vrot.slane %v1325_v2, 5  ;;  %v1344_v18 = vrot.slane %v1326_v3, 4  ;;  %v1346_v20 = vrot.slane %v1327_v5, 3  ;;  %v4170_v61 = vld [vmem:[%s4935_s22 + $0x30] sm:$0xff]   ;;  %v4171_v63 = vld [vmem:[%s4925_s9 + $0x4] ss:$8 sps:$4 sm:$0xff]  }
 0x156   : > { %v1339_v14 = vsel %vm1274_vm0, %v1338_v7, %v1322_v4  ;;  %v1151_v16 = vpop.xlane.xlu0 %1150  ;;  %v5060_v21 = vsub.f32 %v4958_v6, %v1160_v8  ;;  %v1348_v23 = vrot.slane %v1328_v10, 2  ;;  %v4583_v49 = vmov 0.0   ;;  %v4173_v0 = vld [vmem:[%s4925_s9] ss:$8 sps:$4 sm:$0xff]   ;;  %v4176_v4 = vld [vmem:[%s4935_s22 + $0x18] sm:$0xff]   ;;  %v4177_v5 = vld [vmem:[%s4935_s22 + $0x10] sm:$0xff]  }
 0x157   : > { %v1341_v17 = vsel %vm1277_vm1, %v1340_v11, %v1339_v14  ;;  %v1162_v24 = vmul.f32 0.0078125, %v1151_v16  ;;  %v1350_v26 = vrot.slane %v1329_v13, 1  ;;  %3986 = vmatprep.subr.bf16.mxu1 %v4583_v49  ;;  %v4174_v1 = vld [vmem:[%s4935_s22 + $0x28] sm:$0xff]   ;;  %v4584_v2 = vmov 0   ;;  %v4175_v3 = vld [vmem:[%s4935_s22 + $0x20] sm:$0xff]   ;;  %4002 = vmatprep.mubr.msk.bf16.mxu1 %vm4585_vm7, %v4583_v49 }
 0x158   : > { %v1343_v19 = vsel %vm1280_vm2, %v1342_v15, %v1341_v17  ;;  %v1176_v34 = vmul.f32 %v5060_v21, %v5060_v21  ;;  %3987 = vmatpush3.bf16.msra.mxu1 %v4166_v48  ;;  %1562 = vmatprep.mubr.bf16.mxu0 %v4584_v2  ;;  %v4178_v7 = vld [vmem:[%s4935_s22 + $0x8] sm:$0xff]   ;;  %v4179_v8 = vld [vmem:[%s4935_s22] sm:$0xff]   ;;  %v1416_v10 = vlaneseq }
 0x159   : > { %v1345_v22 = vsel %vm1283_vm3, %v1344_v18, %v1343_v19  ;;  %v5069_v6 = vsub.f32 %v4962_v9, %v1162_v24  ;;  %v4154_v9 = vld [vmem:[%s4925_s9 + $0x54] ss:$8 sps:$4 sm:$0xff]   ;;  %3988 = vmatprep.subr.bf16.mxu1 %v4583_v49  ;;  %4146 = vset.pattern.permute.xlu0 %v4584_v2  ;;  %v1115_v11 = vld [vmem:[%s5124_s28 + $0x1] sm:$0x1]  ;;  %v1116_v14 = vld [vmem:[%s5124_s28 + $0x2] sm:$0x1] }
 0x15a   : > { %v1347_v25 = vsel %vm1286_vm4, %v1346_v20, %v1345_v22  ;;  %v1155_v27 = vpop.xlane.xlu0 %1154  ;;  %1534 = vmatprep.subr.bf16.mxu0 %v4154_v9  ;;  %4147 = vset.pattern.permute.xlu1 %v4584_v2  ;;  %v5128_v13 = vshrl.u32 %v1416_v10, 7  ;;  %v1123_v15 = vunpack.c.l.bf16 %v1115_v11  ;;  %v1114_v16 = vld [vmem:[%s5124_s28] sm:$0x1]  ;;  %v1124_v18 = vunpack.c.l.bf16 %v1116_v14  ;;  %v1117_v20 = vld [vmem:[%s5124_s28 + $0x3] sm:$0x1] }
 0x15b   : > { %v1349_v30 = vsel %vm1289_vm5, %v1348_v23, %v1347_v25  ;;  %v1164_v35 = vmul.f32 0.0078125, %v1155_v27  ;;  %v1178_v40 = vmul.f32 %v5069_v6, %v5069_v6  ;;  %1535 = vmatpush1.bf16.msra.mxu0 %v4156_v41  ;;  %v1122_v19 = vunpack.c.l.bf16 %v1114_v16 }
 0x15c   : > { %v1351_v33 = vsel %vm1292_vm6, %v1350_v26, %v1349_v30  ;;  %1536 = vmatprep.subr.bf16.mxu0 %v4157_v42  ;;  %3989 = vmatpush3.bf16.msra.mxu1 %v4170_v61  ;;  %v5133_v17 = vsub.s32 0, %v5128_v13  ;;  %v1125_v25 = vunpack.c.l.bf16 %v1117_v20  ;;  %v1119_v26 = vld [vmem:[%s5124_s28 + $0x5] sm:$0x1] }
 0x15d   : > { %1353 = vadd.xlane.f32.xlu1 %v1351_v33  ;;  %v5076_v39 = vsub.f32 %v4968_v12, %v1164_v35  ;;  %v4159_v12 = vld [vmem:[%s4925_s9 + $0x40] ss:$8 sps:$4 sm:$0xff]   ;;  %3990 = vmatprep.subr.bf16.mxu1 %v4583_v49  ;;  %v1127_v29 = vunpack.c.l.bf16 %v1119_v26  ;;  %s5820_s9 = sld [smem:[#allocation36_spill]] }
 0x15e   : > { %v1947_v22 = vrot.slane %v1123_v15, %v5133_v17  ;;  %v1943_v23 = vrot.slane %v1122_v19, %v5133_v17  ;;  %v1951_v24 = vrot.slane %v1124_v18, %v5133_v17  ;;  %v1955_v27 = vrot.slane %v1125_v25, %v5133_v17 }
 0x15f   : > { %v1180_v43 = vmul.f32 %v5076_v39, %v5076_v39  ;;  %1537 = vmatpush1.bf16.msra.mxu0 %v4159_v12  ;;  %v1963_v30 = vrot.slane %v1127_v29, %v5133_v17 }
 0x160   : > { %1538 = vmatprep.subr.bf16.mxu0 %v4160_v44  ;;  %3991 = vmatpush3.bf16.msra.mxu1 %v4174_v1 }
 0x161   : > { %1187 = vadd.xlane.f32.xlu1 %v1176_v34  ;;  %3992 = vmatprep.subr.bf16.mxu1 %v4583_v49 }
 0x163   : > { %1539 = vmatpush1.bf16.msra.mxu0 %v4162_v45  ;;  %s1076_s22 = scalar_lea.vmem %s5820_s9, %s3799_s15  ;;  %s1092_s9 = scalar_lea.vmem %s5825_s21, %s3799_s15 }
 0x164   : > { %1540 = vmatprep.subr.bf16.mxu0 %v4163_v46  ;;  %3993 = vmatpush3.bf16.msra.mxu1 %v4175_v3  ;;  %v5147_v3 = vld [vmem:[%s1069_s1] ss:$0 sm:$0xff]  ;;  %s1085_s1 = scalar_lea.vmem %s5823_s10, %s5118_s3 }
 0x165   : > { %1191 = vadd.xlane.f32.xlu1 %v1178_v40  ;;  %3994 = vmatprep.subr.bf16.mxu1 %v4583_v49 }
 0x167   : > { %1541 = vmatpush1.bf16.msra.mxu0 %v4165_v47 }
 0x168   : > { %1542 = vmatprep.subr.bf16.mxu0 %v4167_v50  ;;  %3995 = vmatpush3.bf16.msra.mxu1 %v4176_v4 }
 0x169   : > { %1195 = vadd.xlane.f32.xlu1 %v1180_v43  ;;  %3996 = vmatprep.subr.bf16.mxu1 %v4583_v49 }
 0x16a   : > { %1973 = vbcast.lane.b32.xlu0 %v1943_v23, 256 }
 0x16b   : > { %1543 = vmatpush1.bf16.msra.mxu0 %v4169_v60 }
 0x16c   : > { %1544 = vmatprep.subr.bf16.mxu0 %v4171_v63  ;;  %3997 = vmatpush3.bf16.msra.mxu1 %v4177_v5 }
 0x16d   : > { %3998 = vmatprep.subr.bf16.mxu1 %v4583_v49 }
 0x16f   : > { %1545 = vmatpush1.bf16.msra.mxu0 %v4173_v0 }
 0x170   : > { %4006 = vmatprep.subr.bf16.mxu0 %v4583_v49  ;;  %3999 = vmatpush3.bf16.msra.mxu1 %v4178_v7 }
 0x171   : > { %4000 = vmatprep.subr.bf16.mxu1 %v4583_v49 }
 0x174   : > { %4001 = vmatpush3.bf16.msra.mxu1 %v4179_v8 }
 0x17a   : > { %1976 = vbcast.lane.b32.xlu1 %v1947_v22, 256 }
 0x17e   : > { %1979 = vbcast.lane.b32.xlu1 %v1951_v24, 256 }
 0x182   : > { %1982 = vbcast.lane.b32.xlu1 %v1955_v27, 256 }
 0x186   : > { %1988 = vbcast.lane.b32.xlu1 %v1963_v30, 256 }
 0x1d1   : > { %v1184_v31 = vpop.xlane.xlu0 %1183 }
 0x1d2   : > { %v1198_v33 = vmul.f32 0.0078125, %v1184_v31 }
 0x1d4   : > { %v1206_v36 = vadd.f32 1e-12, %v1198_v33 }
 0x1d5   : > { %v1186_v34 = vpop.xlane.xlu0 %1185 }
 0x1d6   : > { %v1199_v35 = vmul.f32 0.0078125, %v1186_v34  ;;  %4236 = vrsqrt.f32 %v1206_v36 }
 0x1d8   : > { %v1207_v37 = vadd.f32 1e-12, %v1199_v35 }
 0x1d9   : > { %v1190_v40 = vpop.xlane.xlu0 %1189 }
 0x1da   : > { %4238 = vrsqrt.f32 %v1207_v37  ;;  %v1201_v42 = vmul.f32 0.0078125, %v1190_v40 }
 0x1dc   : > { %v1209_v12 = vadd.f32 1e-12, %v1201_v42 }
 0x1dd   : > { %v1194_v60 = vpop.xlane.xlu0 %1193 }
 0x1de   : > { %v1182_v9 = vpop.xlane.xlu1 %1181  ;;  %v1203_v4 = vmul.f32 0.0078125, %v1194_v60 }
 0x1df   : > { %v1197_v41 = vmul.f32 0.0078125, %v1182_v9 }
 0x1e0   : > { %v1211_v18 = vadd.f32 1e-12, %v1203_v4 }
 0x1e1   : > { %v1205_v43 = vadd.f32 1e-12, %v1197_v41 }
 0x1e3   : > { %4240 = vrsqrt.f32 %v1205_v43  ;;  %v4237_v47 = vpop.eup %4236 }
 0x1e4   : > { %4242 = vrsqrt.f32 %v1209_v12  ;;  %v1222_v0 = vmul.f32 %v4237_v47, %v4992_v28  ;;  %v5156_v28 = vld [vmem:[%s1072_s29] ss:$0 sm:$0xff]  ;;  %s1088_s29 = scalar_lea.vmem %s5824_s8, %s5118_s3  ;;  %s3797_s8 = sshll.u32 %s4915_s5, 3 }
 0x1e6   : > { %v1354_v44 = vpop.xlane.xlu1 %1353  ;;  %v1236_v15 = vmul.f32 %v5147_v3, %v1222_v0 }
 0x1e7   : > { %v1355_v45 = vmul.f32 0.0078125, %v1354_v44  ;;  %v4239_v61 = vpop.eup %4238 }
 0x1e8   : > { %v1223_v8 = vmul.f32 %v4239_v61, %v4997_v32  ;;  %v1250_v32 = vadd.f32 %v5156_v28, %v1236_v15 }
 0x1e9   : > { %v1356_v46 = vadd.f32 1e-12, %v1355_v45 }
 0x1ea   : > { %v1188_v48 = vpop.xlane.xlu1 %1187  ;;  %v1237_v22 = vmul.f32 %v5147_v3, %v1223_v8 }
 0x1eb   : > { %4244 = vrsqrt.f32 %v1356_v46  ;;  %v1200_v50 = vmul.f32 0.0078125, %v1188_v48 }
 0x1ec   : > { %v1251_v27 = vadd.f32 %v5156_v28, %v1237_v22 }
 0x1ed   : > { %v1208_v63 = vadd.f32 1e-12, %v1200_v50 }
 0x1ee   : > { %v1192_v1 = vpop.xlane.xlu1 %1191 }
 0x1ef   : > { %4246 = vrsqrt.f32 %v1208_v63  ;;  %v1202_v5 = vmul.f32 0.0078125, %v1192_v1 }
 0x1f0   : > { %v4241_v7 = vpop.eup %4240 }
 0x1f1   : > { %v1210_v11 = vadd.f32 1e-12, %v1202_v5  ;;  %v1221_v14 = vmul.f32 %v4241_v7, %v5025_v57  ;;  %v4243_v23 = vpop.eup %4242 }
 0x1f2   : > { %v1196_v16 = vpop.xlane.xlu1 %1195  ;;  %v1225_v29 = vmul.f32 %v4243_v23, %v5002_v38 }
 0x1f3   : > { %4248 = vrsqrt.f32 %v1210_v11  ;;  %v1204_v19 = vmul.f32 0.0078125, %v1196_v16  ;;  %v1235_v20 = vmul.f32 %v5147_v3, %v1221_v14 }
 0x1f4   : > { %4250 = vrsqrt.f32 %v1211_v18 }
 0x1f5   : > { %v1212_v24 = vadd.f32 1e-12, %v1204_v19  ;;  %v1249_v25 = vadd.f32 %v5156_v28, %v1235_v20 }
 0x1f7   : > { %v3906_v57 = vpack.c.bf16 %v1250_v32, %v1249_v25  ;;  %4252 = vrsqrt.f32 %v1212_v24 }
 0x1f8   : > { %v4245_v26 = vpop.eup %4244 }
 0x1f9   : > { %1563 = vmatmul.mubr.bf16.vlgmr.msra.gmra.mxu0 %v3906_v57  ;;  %v1359_v30 = vrot.slane %v4245_v26, 1  ;;  %v1360_v31 = vrot.slane %v4245_v26, 2  ;;  %v1361_v33 = vrot.slane %v4245_v26, 3  ;;  %v1362_v34 = vrot.slane %v4245_v26, 4 }
 0x1fa   : > { %1572 = vmatprep.mubr.bf16.mxu0 %v4584_v2  ;;  %v1363_v35 = vrot.slane %v4245_v26, 5  ;;  %v1364_v36 = vrot.slane %v4245_v26, 6  ;;  %v1365_v37 = vrot.slane %v4245_v26, 7  ;;  %v1374_v40 = vmul.f32 %v4245_v26, %v5007_v51 }
 0x1fb   : > { %v1375_v9 = vmul.f32 %v1359_v30, %v5010_v52  ;;  %v1376_v41 = vmul.f32 %v1360_v31, %v5016_v54  ;;  %v1377_v42 = vmul.f32 %v1361_v33, %v5019_v55  ;;  %v1378_v38 = vmul.f32 %v1362_v34, %v5022_v56 }
 0x1fc   : > { %v4247_v43 = vpop.eup %4246  ;;  %v1379_v12 = vmul.f32 %v1363_v35, %v5028_v58  ;;  %v1380_v44 = vmul.f32 %v1364_v36, %v5031_v59  ;;  %v1381_v45 = vmul.f32 %v1365_v37, %v5036_v62  ;;  %v1382_v46 = vmul.f32 %v5147_v3, %v1374_v40 }
 0x1fd   : > { %v1224_v47 = vmul.f32 %v4247_v43, %v5060_v21  ;;  %v1383_v51 = vmul.f32 %v5147_v3, %v1375_v9  ;;  %v1384_v52 = vmul.f32 %v5147_v3, %v1376_v41  ;;  %v1385_v54 = vmul.f32 %v5147_v3, %v1377_v42 }
 0x1fe   : > { %v1386_v55 = vmul.f32 %v5147_v3, %v1378_v38  ;;  %v1387_v56 = vmul.f32 %v5147_v3, %v1379_v12  ;;  %v1388_v58 = vmul.f32 %v5147_v3, %v1380_v44  ;;  %v1389_v59 = vmul.f32 %v5147_v3, %v1381_v45 }
 0x1ff   : > { %v1238_v62 = vmul.f32 %v5147_v3, %v1224_v47  ;;  %v5184_v48 = vadd.f32 %v5156_v28, %v1382_v46  ;;  %v5187_v21 = vadd.f32 %v5156_v28, %v1383_v51  ;;  %v5190_v50 = vadd.f32 %v5156_v28, %v1384_v52 }
 0x200   : > { %v4249_v60 = vpop.eup %4248  ;;  %v5193_v61 = vadd.f32 %v5156_v28, %v1385_v54  ;;  %v5196_v63 = vadd.f32 %v5156_v28, %v1386_v55  ;;  %v5199_v0 = vadd.f32 %v5156_v28, %v1387_v56  ;;  %v5202_v1 = vadd.f32 %v5156_v28, %v1388_v58 }
 0x201   : > { %v1252_v4 = vadd.f32 %v5156_v28, %v1238_v62  ;;  %v1226_v5 = vmul.f32 %v4249_v60, %v5069_v6  ;;  %v5207_v7 = vadd.f32 %v5156_v28, %v1389_v59  ;;  %v1651_v8 = vpack.c.bf16 %v5184_v48, %v5184_v48  ;;  %v4251_v22 = vpop.eup %4250 }
 0x202   : > { %v1652_v11 = vpack.c.bf16 %v5187_v21, %v5187_v21  ;;  %v1653_v14 = vpack.c.bf16 %v5190_v50, %v5190_v50  ;;  %v1654_v15 = vpack.c.bf16 %v5193_v61, %v5193_v61  ;;  %v1655_v16 = vpack.c.bf16 %v5196_v63, %v5196_v63 }
 0x203   : > { %v3907_v18 = vpack.c.bf16 %v1252_v4, %v1251_v27  ;;  %v1240_v6 = vmul.f32 %v5147_v3, %v1226_v5  ;;  %v1656_v19 = vpack.c.bf16 %v5199_v0, %v5199_v0  ;;  %v1657_v20 = vpack.c.bf16 %v5202_v1, %v5202_v1 }
 0x204   : > { %v1658_v23 = vpack.c.bf16 %v5207_v7, %v5207_v7  ;;  %v1691_v24 = vunpack.c.l.b16 %v1652_v11  ;;  %v1692_v25 = vunpack.c.l.b16 %v1653_v14  ;;  %v4253_v32 = vpop.eup %4252  ;;  %v1239_v57 = vmul.f32 %v5147_v3, %v1225_v29 }
 0x205   : > { %1573 = vmatmul.mubr.bf16.gmra.mxu0 %v3907_v18  ;;  %v1693_v26 = vunpack.c.l.b16 %v1654_v15  ;;  %v1694_v27 = vunpack.c.l.b16 %v1655_v16  ;;  %v1690_v30 = vunpack.c.l.b16 %v1651_v8  ;;  %v1695_v31 = vunpack.c.l.b16 %v1656_v19  ;;  %v1414_v19 = vld [vmem:[%s1076_s22] sm:$0x3]  ;;  %s5826_s22 = sld [smem:[#allocation44_spill]] }
 0x206   : > { %1582 = vmatprep.mubr.bf16.mxu0 %v4584_v2  ;;  %v1698_v33 = vrot.slane %v1691_v24, 7  ;;  %v1700_v34 = vrot.slane %v1692_v25, 6  ;;  %v1254_v35 = vadd.f32 %v5156_v28, %v1240_v6  ;;  %v1696_v36 = vunpack.c.l.b16 %v1657_v20 }
 0x207   : > { %v1697_v37 = vunpack.c.l.b16 %v1658_v23  ;;  %v1702_v9 = vrot.slane %v1693_v26, 5  ;;  %v1228_v41 = vmul.f32 %v4253_v32, %v5076_v39  ;;  %v1253_v42 = vadd.f32 %v5156_v28, %v1239_v57 }
 0x208   : > { %v1699_v40 = vsel %vm1274_vm0, %v1698_v33, %v1690_v30  ;;  %v1704_v38 = vrot.slane %v1694_v27, 4  ;;  %v1227_v43 = vmul.f32 %v4251_v22, %v5013_v53  ;;  %v1706_v44 = vrot.slane %v1695_v31, 3  ;;  %v3831_v30 = vld [vmem:[%s1079_s23] ss:$0 sm:$0xff]  ;;  %s5827_s23 = sld [smem:[#allocation45_spill]] }
 0x209   : > { %v1701_v29 = vsel %vm1277_vm1, %v1700_v34, %v1699_v40  ;;  %v3908_v45 = vpack.c.bf16 %v1254_v35, %v1253_v42  ;;  %v1708_v47 = vrot.slane %v1696_v36, 2  ;;  %v1242_v51 = vmul.f32 %v5147_v3, %v1228_v41 }
 0x20a   : > { %v1703_v12 = vsel %vm1280_vm2, %v1702_v9, %v1701_v29  ;;  %v1710_v39 = vrot.slane %v1697_v37, 1  ;;  %v1241_v55 = vmul.f32 %v5147_v3, %v1227_v43  ;;  %v1118_v3 = vld [vmem:[%s5124_s28 + $0x4] sm:$0x1]  ;;  %v4586_v16 = vmov 1966171168  }
 0x20b   : > { %v1705_v46 = vsel %vm1283_vm3, %v1704_v38, %v1703_v12  ;;  %v1256_v58 = vadd.f32 %v5156_v28, %v1242_v51  ;;  %v1126_v60 = vunpack.c.l.bf16 %v1118_v3  ;;  %v1805_v18 = vunpack.c.l.s4 %v4586_v16  ;;  %s1095_s14 = scalar_lea.vmem %s5826_s22, %s5118_s3 }
 0x20c   : > { %v1707_v52 = vsel %vm1286_vm4, %v1706_v44, %v1705_v46  ;;  %v1255_v59 = vadd.f32 %v5156_v28, %v1241_v55  ;;  %v1419_v24 = vrot.slane %v1414_v19, %v5133_v17 }
 0x20d   : > { %1583 = vmatmul.mubr.bf16.gmra.mxu0 %v3908_v45  ;;  %v1709_v54 = vsel %vm1289_vm5, %v1708_v47, %v1707_v52  ;;  %v1959_v4 = vrot.slane %v1126_v60, %v5133_v17  ;;  %v1806_v23 = vunpack.c.0.s8 %v1805_v18 }
 0x20e   : > { %v1711_v53 = vsel %vm1292_vm6, %v1710_v39, %v1709_v54  ;;  %1592 = vmatprep.mubr.bf16.mxu0 %v4584_v2  ;;  %v3909_v62 = vpack.c.bf16 %v1256_v58, %v1255_v59 }
 0x20f   : > { %v1712_v56 = vpack.c.b16 %v1711_v53, %v1711_v53  ;;  %1985 = vbcast.lane.b32.xlu0 %v1959_v4, 256  ;;  %v1809_v31 = vsub.s32 %v1806_v23, %v5128_v13 }
 0x211   : > { %4003 = vmatmul.mubr.bf16.vlgmr.msra.gmra.mxu1 %v1712_v56 }
 0x212   : > { %2888 = vmatprep.mubr.bf16.mxu1 %v4584_v2  ;;  %v5256_v2 = vsub.s32 1, %v5128_v13 }
 0x214   : > { %v1423_v20 = vrot.slane %v1414_v19, %v5256_v2 }
 0x215   : > { %1593 = vmatmul.mubr.bf16.gmra.mxu0 %v3909_v62 }
 0x216   : > { %4022 = vmatprep.mubr.msk.bf16.mxu0 %vm4585_vm7, %v4583_v49 }
 0x2b9   : > { %v1564_v5 = vpop.f32.mrf.mxu0 }
 0x2ba   : > { %v1565_v33 = vadd.f32 %v1564_v5, %v1419_v24 }
 0x2bb   : > { %v1566_v8 = vpop.f32.mrf.mxu0 }
 0x2bc   : > { %v1567_v32 = vadd.f32 %v1566_v8, %v1423_v20 }
 0x2bd   : > { %v1568_v11 = vpop.f32.mrf.mxu0 }
 0x2be   : > { %v1569_v34 = vadd.f32 %v1568_v11, %v1419_v24  ;;  %v5265_v9 = vpack.c.bf16 %v1567_v32, %v1565_v33 }
 0x2bf   : > { %v1570_v14 = vpop.f32.mrf.mxu0 }
 0x2c0   : > { %v1571_v57 = vadd.f32 %v1570_v14, %v1423_v20  ;;  %v1852_v53 = vunpack.c.l.bf16 %v5265_v9 }
 0x2c2   : > { %v5267_v41 = vpack.c.bf16 %v1571_v57, %v1569_v34 }
 0x2c4   : > { %v1853_v56 = vunpack.c.l.bf16 %v5267_v41 }
 0x2c5   : > { %v1574_v15 = vpop.f32.mrf.mxu0 }
 0x2c6   : > { %v1575_v35 = vadd.f32 %v1574_v15, %v1419_v24 }
 0x2c7   : > { %v1576_v28 = vpop.f32.mrf.mxu0 }
 0x2c8   : > { %v1577_v26 = vadd.f32 %v1576_v28, %v1423_v20 }
 0x2c9   : > { %v1578_v6 = vpop.f32.mrf.mxu0 }
 0x2ca   : > { %v5269_v42 = vpack.c.bf16 %v1577_v26, %v1575_v35  ;;  %v1579_v39 = vadd.f32 %v1578_v6, %v1419_v24 }
 0x2cb   : > { %v1580_v22 = vpop.f32.mrf.mxu0 }
 0x2cc   : > { %v1581_v44 = vadd.f32 %v1580_v22, %v1423_v20  ;;  %v1854_v58 = vunpack.c.l.bf16 %v5269_v42 }
 0x2cd   : > { %v1584_v25 = vpop.f32.mrf.mxu0 }
 0x2ce   : > { %v5275_v4 = vpack.c.bf16 %v1581_v44, %v1579_v39  ;;  %v1585_v15 = vadd.f32 %v1584_v25, %v1419_v24 }
 0x2cf   : > { %v1586_v27 = vpop.f32.mrf.mxu0 }
 0x2d0   : > { %v1587_v59 = vadd.f32 %v1586_v27, %v1423_v20  ;;  %v1855_v25 = vunpack.c.l.bf16 %v5275_v4 }
 0x2d1   : > { %v1796_v36 = vpop.f32.mrf.mxu1  ;;  %v1588_v37 = vpop.f32.mrf.mxu0 }
 0x2d2   : > { %v1797_v40 = vadd.f32 %v3831_v30, %v1796_v36  ;;  %v1589_v6 = vadd.f32 %v1588_v37, %v1419_v24  ;;  %v5279_v57 = vpack.c.bf16 %v1587_v59, %v1585_v15 }
 0x2d3   : > { %v4004_v29 = vpop.f32.mrf.mxu1  ;;  %v1590_v38 = vpop.f32.mrf.mxu0 }
 0x2d4   : > { %v1803_v43 = vcombine.high %v1797_v40, %v1797_v40  ;;  %v1810_v12 = vrot.slane %v1797_v40, %v1809_v31  ;;  %v1591_v5 = vadd.f32 %v1590_v38, %v1423_v20 }
 0x2d5   : > { %v1799_v45 = vpop.f32.mrf.mxu1  ;;  %v1594_v46 = vpop.f32.mrf.mxu0 }
 0x2d6   : > { %v1817_v47 = vrot.slane %v1803_v43, %v1809_v31  ;;  %v1818_v51 = vcombine.high %v1810_v12, %v1810_v12  ;;  %v1826_v52 = vrot.slane %v1810_v12, %v1809_v31  ;;  %v1595_v19 = vadd.f32 %v1594_v46, %v1419_v24 }
 0x2d7   : > { %v4005_v54 = vpop.f32.mrf.mxu1  ;;  %v1596_v55 = vpop.f32.mrf.mxu0  ;;  %v5281_v33 = vpack.c.bf16 %v1591_v5, %v1589_v6 }
 0x2d8   : > { %v1819_v62 = vcombine.high %v1817_v47, %v1817_v47  ;;  %v1863_v3 = vrot.slane %v1826_v52, %v5133_v17  ;;  %v1840_v60 = vrot.slane %v1818_v51, %v1809_v31  ;;  %v1597_v8 = vadd.f32 %v1596_v55, %v1423_v20  ;;  %v1121_v55 = vld [vmem:[%s5124_s28 + $0x7] sm:$0x1]  ;;  %v1974_v5 = vpop.permute.xlu0 %1973 }
 0x2d9   : > { %v1598_v11 = vpop.f32.mrf.mxu0  ;;  %v1848_v14 = vcombine.high %v1826_v52, %v1826_v52  ;;  %v1833_v18 = vrot.slane %v1817_v47, %v1809_v31  ;;  %v1857_v12 = vunpack.c.l.bf16 %v5281_v33 }
 0x2da   : > { %v1900_v28 = vmul.f32 %v1863_v3, %v1852_v53  ;;  %v1867_v16 = vrot.slane %v1840_v60, %v5133_v17  ;;  %v1850_v32 = vcombine.high %v1840_v60, %v1840_v60  ;;  %v1847_v30 = vrot.slane %v1819_v62, %v1809_v31  ;;  %v1120_v53 = vld [vmem:[%s5124_s28 + $0x6] sm:$0x1]  ;;  %v1977_v3 = vpop.permute.xlu1 %1976  ;;  %s1082_s28 = scalar_lea.vmem %s5822_s0, %s5118_s3 }
 0x2db   : > { %v1600_v22 = vpop.f32.mrf.mxu0  ;;  %v1871_v23 = vrot.slane %v1848_v14, %v5133_v17  ;;  %v5283_v34 = vpack.c.bf16 %v1597_v8, %v1595_v19  ;;  %v1599_v36 = vadd.f32 %v1598_v11, %v1419_v24  ;;  %v1879_v40 = vrot.slane %v1833_v18, %v5133_v17 }
 0x2dc   : > { %1908 = vadd.xlane.f32.xlu0 %v1900_v28  ;;  %v1601_v26 = vadd.f32 %v1600_v22, %v1423_v20  ;;  %v1901_v27 = vmul.f32 %v1867_v16, %v1853_v56  ;;  %v1875_v35 = vrot.slane %v1850_v32, %v5133_v17  ;;  %v1849_v29 = vcombine.high %v1833_v18, %v1833_v18  ;;  %v1986_v11 = vpop.permute.xlu0 %1985 }
 0x2dd   : > { %v1902_v37 = vmul.f32 %v1871_v23, %v1854_v58  ;;  %v1856_v31 = vunpack.c.l.bf16 %v5279_v57  ;;  %v1883_v43 = vrot.slane %v1847_v30, %v5133_v17  ;;  %v1858_v24 = vunpack.c.l.bf16 %v5283_v34 }
 0x2de   : > { %1910 = vadd.xlane.f32.xlu1 %v1901_v27  ;;  %v5288_v38 = vpack.c.bf16 %v1601_v26, %v1599_v36  ;;  %v1903_v20 = vmul.f32 %v1875_v35, %v1855_v25  ;;  %v1887_v45 = vrot.slane %v1849_v29, %v5133_v17  ;;  %v1851_v46 = vcombine.high %v1847_v30, %v1847_v30  ;;  %v1980_v60 = vpop.permute.xlu1 %1979 }
 0x2df   : > { %v1904_v44 = vmul.f32 %v1879_v40, %v1856_v31  ;;  %v1905_v47 = vmul.f32 %v1883_v43, %v1857_v12  ;;  %v1129_v56 = vunpack.c.l.bf16 %v1121_v55  ;;  %v1128_v58 = vunpack.c.l.bf16 %v1120_v53 }
 0x2e0   : > { %1912 = vadd.xlane.f32.xlu0 %v1902_v37  ;;  %v1859_v51 = vunpack.c.l.bf16 %v5288_v38  ;;  %v1906_v52 = vmul.f32 %v1887_v45, %v1858_v24  ;;  %v1891_v39 = vrot.slane %v1851_v46, %v5133_v17 }
 0x2e1   : > { %v1971_v59 = vrot.slane %v1129_v56, %v5133_v17  ;;  %v1967_v62 = vrot.slane %v1128_v58, %v5133_v17 }
 0x2e2   : > { %1914 = vadd.xlane.f32.xlu1 %v1903_v20  ;;  %v1907_v54 = vmul.f32 %v1891_v39, %v1859_v51  ;;  %v1983_v8 = vpop.permute.xlu1 %1982 }
 0x2e4   : > { %1916 = vadd.xlane.f32.xlu0 %v1904_v44 }
 0x2e6   : > { %1918 = vadd.xlane.f32.xlu1 %v1905_v47  ;;  %v1989_v14 = vpop.permute.xlu1 %1988  ;;  %v2045_v47 = vand.u32 127, %v1416_v10 }
 0x2e8   : > { %1920 = vadd.xlane.f32.xlu0 %v1906_v52  ;;  %v5327_v51 = vsub.s32 %v2045_v47, %v5128_v13 }
 0x2ea   : > { %1922 = vadd.xlane.f32.xlu1 %v1907_v54 }
 0x2fb   : > { %1994 = vbcast.lane.b32.xlu1 %v1971_v59, 256 }
 0x2fe   : > { %1991 = vbcast.lane.b32.xlu0 %v1967_v62, 256 }
 0x365   : > { %v1909_v15 = vpop.xlane.xlu0 %1908 }
 0x366   : > { %v1924_v28 = vmul.f32 0.088388346, %v1909_v15 }
 0x367   : > { %v1911_v16 = vpop.xlane.xlu1 %1910 }
 0x368   : > { %v5301_v18 = vadd.f32 %v1974_v5, %v1924_v28  ;;  %v1925_v6 = vmul.f32 0.088388346, %v1911_v16 }
 0x369   : > { %v1913_v19 = vpop.xlane.xlu0 %1912 }
 0x36a   : > { %v5303_v22 = vadd.f32 %v1977_v3, %v1925_v6  ;;  %v1926_v23 = vmul.f32 0.088388346, %v1913_v19  ;;  %2021 = vperm.xlu0 %4146, %v5301_v18  }
 0x36b   : > { %v1915_v32 = vpop.xlane.xlu1 %1914 }
 0x36c   : > { %v1927_v26 = vmul.f32 0.088388346, %v1915_v32  ;;  %2024 = vperm.xlu1 %4147, %v5303_v22   ;;  %v5307_v30 = vadd.f32 %v1980_v60, %v1926_v23 }
 0x36d   : > { %v1917_v27 = vpop.xlane.xlu0 %1916 }
 0x36e   : > { %v5309_v25 = vadd.f32 %v1983_v8, %v1927_v26  ;;  %v1928_v35 = vmul.f32 0.088388346, %v1917_v27  ;;  %v2101_v27 = vsub.s32 2, %v5128_v13 }
 0x36f   : > { %v1919_v36 = vpop.xlane.xlu1 %1918 }
 0x370   : > { %v1929_v37 = vmul.f32 0.088388346, %v1919_v36  ;;  %2030 = vperm.xlu0 %4146, %v5309_v25   ;;  %2027 = vperm.xlu1 %4147, %v5307_v30   ;;  %v5313_v29 = vadd.f32 %v1986_v11, %v1928_v35 }
 0x371   : > { %v1921_v40 = vpop.xlane.xlu0 %1920 }
 0x372   : > { %v5315_v20 = vadd.f32 %v1989_v14, %v1929_v37  ;;  %v1930_v43 = vmul.f32 0.088388346, %v1921_v40  ;;  %v2105_v40 = vsub.s32 3, %v5128_v13 }
 0x373   : > { %v1923_v31 = vpop.xlane.xlu1 %1922 }
 0x374   : > { %2036 = vperm.xlu0 %4146, %v5315_v20   ;;  %2033 = vperm.xlu1 %4147, %v5313_v29   ;;  %v1931_v44 = vmul.f32 0.088388346, %v1923_v31 }
 0x375   : > { %v1992_v12 = vpop.permute.xlu0 %1991 }
 0x376   : > { %v5319_v24 = vadd.f32 %v1992_v12, %v1930_v43 }
 0x377   : > { %v1995_v45 = vpop.permute.xlu1 %1994 }
 0x378   : > { %v5321_v46 = vadd.f32 %v1995_v45, %v1931_v44  ;;  %2039 = vperm.xlu1 %4147, %v5319_v24   ;;  %v2109_v45 = vsub.s32 4, %v5128_v13 }
 0x37a   : > { %2042 = vperm.xlu0 %4146, %v5321_v46  }
 0x3e5   : > { %v2022_v52 = vpop.permute.xlu0 %2021 }
 0x3e6   : > { %v2049_v55 = vrot.slane %v2022_v52, %v5327_v51 }
 0x3e7   : > { %v2025_v39 = vpop.permute.xlu1 %2024 }
 0x3e8   : > { %v2053_v54 = vrot.slane %v2025_v39, %v5327_v51 }
 0x3ea   : > { %v2078_v59 = vsel %vm1274_vm0, %v2053_v54, %v2049_v55  ;;  %v2113_v54 = vsub.s32 5, %v5128_v13 }
 0x3eb   : > { %v2028_v53 = vpop.permute.xlu1 %2027  ;;  %v2031_v56 = vpop.permute.xlu0 %2030 }
 0x3ec   : > { %v2057_v58 = vrot.slane %v2028_v53, %v5327_v51  ;;  %v2061_v62 = vrot.slane %v2031_v56, %v5327_v51 }
 0x3ee   : > { %v2079_v3 = vsel %vm1277_vm1, %v2057_v58, %v2078_v59  ;;  %v2121_v59 = vsub.s32 7, %v5128_v13 }
 0x3ef   : > { %v2034_v10 = vpop.permute.xlu1 %2033  ;;  %v2037_v60 = vpop.permute.xlu0 %2036  ;;  %v2080_v8 = vsel %vm1280_vm2, %v2061_v62, %v2079_v3 }
 0x3f0   : > { %v2065_v5 = vrot.slane %v2034_v10, %v5327_v51  ;;  %v2069_v11 = vrot.slane %v2037_v60, %v5327_v51 }
 0x3f2   : > { %v2081_v14 = vsel %vm1283_vm3, %v2065_v5, %v2080_v8 }
 0x3f3   : > { %v2040_v15 = vpop.permute.xlu1 %2039  ;;  %v2082_v16 = vsel %vm1286_vm4, %v2069_v11, %v2081_v14 }
 0x3f4   : > { %v2073_v28 = vrot.slane %v2040_v15, %v5327_v51 }
 0x3f5   : > { %v2043_v6 = vpop.permute.xlu0 %2042 }
 0x3f6   : > { %v2077_v19 = vrot.slane %v2043_v6, %v5327_v51  ;;  %v2083_v23 = vsel %vm1289_vm5, %v2073_v28, %v2082_v16 }
 0x3f8   : > { %v2084_v32 = vsel %vm1292_vm6, %v2077_v19, %v2083_v23 }
 0x3f9   : > { %v2087_v26 = vsel %vm2086_vm8, %v2084_v32, -inf }
 0x3fa   : > { %2088 = vmax.xlane.f32.xlu1 %v2087_v26 }
 0x483   : > { %v2089_v35 = vpop.xlane.xlu1 %2088 }
 0x484   : > { %v2094_v36 = vrot.slane %v2089_v35, %v5133_v17  ;;  %v2098_v37 = vrot.slane %v2089_v35, %v5256_v2  ;;  %v2102_v31 = vrot.slane %v2089_v35, %v2101_v27  ;;  %v2106_v47 = vrot.slane %v2089_v35, %v2105_v40 }
 0x485   : > { %v2110_v55 = vrot.slane %v2089_v35, %v2109_v45  ;;  %v2114_v56 = vrot.slane %v2089_v35, %v2113_v54  ;;  %v2122_v60 = vrot.slane %v2089_v35, %v2121_v59 }
 0x486   : > { %v2131_v43 = vsub.f32 %v5301_v18, %v2094_v36  ;;  %v2132_v12 = vsub.f32 %v5303_v22, %v2098_v37  ;;  %v2133_v52 = vsub.f32 %v5307_v30, %v2102_v31  ;;  %v2134_v53 = vsub.f32 %v5309_v25, %v2106_v47 }
 0x487   : > { %v2117_v22 = vsub.s32 6, %v5128_v13  ;;  %v2135_v58 = vsub.f32 %v5313_v29, %v2110_v55  ;;  %v2136_v3 = vsub.f32 %v5315_v20, %v2114_v56  ;;  %v2138_v11 = vsub.f32 %v5321_v46, %v2122_v60  ;;  %v4184_v13 = vld [vmem:[%s4938_s20 + $0x18] sm:$0xff]  }
 0x488   : > { %v2139_v44 = vmul.f32 1.442695, %v2131_v43  ;;  %v2141_v39 = vmul.f32 1.442695, %v2132_v12  ;;  %v2143_v18 = vmul.f32 1.442695, %v2133_v52 }
 0x489   : > { %v2145_v30 = vmul.f32 1.442695, %v2134_v53  ;;  %v2118_v62 = vrot.slane %v2089_v35, %v2117_v22  ;;  %v2147_v25 = vmul.f32 1.442695, %v2135_v58  ;;  %v2149_v29 = vmul.f32 1.442695, %v2136_v3 }
 0x48a   : > { %4254 = vpow2.f32 %v2139_v44  ;;  %v2153_v20 = vmul.f32 1.442695, %v2138_v11 }
 0x48b   : > { %4256 = vpow2.f32 %v2141_v39  ;;  %v2137_v5 = vsub.f32 %v5319_v24, %v2118_v62 }
 0x48c   : > { %4258 = vpow2.f32 %v2143_v18 }
 0x48d   : > { %4260 = vpow2.f32 %v2145_v30  ;;  %v2151_v14 = vmul.f32 1.442695, %v2137_v5 }
 0x48e   : > { %4262 = vpow2.f32 %v2147_v25 }
 0x48f   : > { %4264 = vpow2.f32 %v2149_v29 }
 0x490   : > { %4266 = vpow2.f32 %v2151_v14 }
 0x491   : > { %4268 = vpow2.f32 %v2153_v20 }
 0x497   : > { %v4255_v10 = vpop.eup %4254 }
 0x498   : > { %2164 = vperm.xlu0 %4146, %v4255_v10   ;;  %v4257_v8 = vpop.eup %4256 }
 0x499   : > { %v4259_v15 = vpop.eup %4258 }
 0x49a   : > { %v4261_v28 = vpop.eup %4260 }
 0x49b   : > { %v4263_v16 = vpop.eup %4262 }
 0x49c   : > { %2167 = vperm.xlu0 %4146, %v4257_v8   ;;  %v4265_v6 = vpop.eup %4264 }
 0x49d   : > { %v4267_v24 = vpop.eup %4266 }
 0x49e   : > { %v4269_v19 = vpop.eup %4268 }
 0x4a0   : > { %2170 = vperm.xlu0 %4146, %v4259_v15  }
 0x4a4   : > { %2173 = vperm.xlu0 %4146, %v4261_v28  }
 0x4a8   : > { %2176 = vperm.xlu0 %4146, %v4263_v16  }
 0x4ac   : > { %2179 = vperm.xlu0 %4146, %v4265_v6  }
 0x4b0   : > { %2182 = vperm.xlu0 %4146, %v4267_v24  }
 0x4b4   : > { %2185 = vperm.xlu0 %4146, %v4269_v19  }
 0x513   : > { %v2165_v23 = vpop.permute.xlu0 %2164 }
 0x514   : > { %v2190_v43 = vrot.slane %v2165_v23, %v5327_v51 }
 0x517   : > { %v2168_v32 = vpop.permute.xlu0 %2167 }
 0x518   : > { %v2194_v37 = vrot.slane %v2168_v32, %v5327_v51 }
 0x51a   : > { %v2219_v52 = vsel %vm1274_vm0, %v2194_v37, %v2190_v43  ;;  %v2280_v37 = vrot.slane %v5265_v9, 4 }
 0x51b   : > { %v2171_v46 = vpop.permute.xlu0 %2170 }
 0x51c   : > { %v2198_v31 = vrot.slane %v2171_v46, %v5327_v51  ;;  %v2296_v43 = vunpack.c.l.bf16 %v2280_v37 }
 0x51e   : > { %v2220_v55 = vsel %vm1277_vm1, %v2198_v31, %v2219_v52 }
 0x51f   : > { %v2174_v26 = vpop.permute.xlu0 %2173 }
 0x520   : > { %v2202_v12 = vrot.slane %v2174_v26, %v5327_v51 }
 0x522   : > { %v2221_v18 = vsel %vm1280_vm2, %v2202_v12, %v2220_v55  ;;  %v2281_v12 = vrot.slane %v5267_v41, 4 }
 0x523   : > { %v2177_v35 = vpop.permute.xlu0 %2176 }
 0x524   : > { %v2206_v44 = vrot.slane %v2177_v35, %v5327_v51 }
 0x526   : > { %v2222_v56 = vsel %vm1283_vm3, %v2206_v44, %v2221_v18  ;;  %v2297_v18 = vunpack.c.l.bf16 %v2281_v12 }
 0x527   : > { %v2180_v36 = vpop.permute.xlu0 %2179 }
 0x528   : > { %v2210_v39 = vrot.slane %v2180_v36, %v5327_v51  ;;  %v4180_v36 = vld [vmem:[%s4938_s20 + $0x38] sm:$0xff]  }
 0x529   : > { %4007 = vmatpush3.bf16.msra.mxu0 %v4180_v36 }
 0x52a   : > { %v2223_v30 = vsel %vm1286_vm4, %v2210_v39, %v2222_v56  ;;  %4008 = vmatprep.subr.bf16.mxu0 %v4583_v49  ;;  %v2282_v56 = vrot.slane %v5269_v42, 4  ;;  %v2285_v42 = vrot.slane %v5281_v33, 4 }
 0x52b   : > { %v2183_v47 = vpop.permute.xlu0 %2182 }
 0x52c   : > { %v2214_v53 = vrot.slane %v2183_v47, %v5327_v51  ;;  %v2298_v9 = vunpack.c.l.bf16 %v2282_v56 }
 0x52e   : > { %v2224_v3 = vsel %vm1289_vm5, %v2214_v53, %v2223_v30 }
 0x52f   : > { %v2186_v58 = vpop.permute.xlu0 %2185 }
 0x530   : > { %v2218_v62 = vrot.slane %v2186_v58, %v5327_v51 }
 0x532   : > { %v2225_v25 = vsel %vm1292_vm6, %v2218_v62, %v2224_v3 }
 0x533   : > { %v2227_v60 = vsel %vm2086_vm8, %v2225_v25, 0.0 }
 0x534   : > { %2228 = vadd.xlane.f32.xlu0 %v2227_v60 }
 0x5bd   : > { %v2229_v5 = vpop.xlane.xlu0 %2228 }
 0x5be   : > { %4270 = vrcp.f32 %v2229_v5  ;;  %v2283_v5 = vrot.slane %v5275_v4, 4  ;;  %v2286_v4 = vrot.slane %v5283_v34, 4 }
 0x5c0   : > { %v2302_v37 = vunpack.c.l.bf16 %v2286_v4 }
 0x5cb   : > { %v4271_v29 = vpop.eup %4270 }
 0x5cc   : > { %v2251_v11 = vrot.slane %v4271_v29, %v2109_v45  ;;  %v2235_v14 = vrot.slane %v4271_v29, %v5133_v17  ;;  %v2239_v51 = vrot.slane %v4271_v29, %v5256_v2  ;;  %v2243_v46 = vrot.slane %v4271_v29, %v2101_v27 }
 0x5cd   : > { %v2247_v35 = vrot.slane %v4271_v29, %v2105_v40  ;;  %v2263_v40 = vrot.slane %v4271_v29, %v2121_v59  ;;  %v4185_v59 = vld [vmem:[%s4938_s20 + $0x10] sm:$0xff]  }
 0x5ce   : > { %v2276_v20 = vmul.f32 %v4263_v16, %v2251_v11  ;;  %v2272_v23 = vmul.f32 %v4255_v10, %v2235_v14  ;;  %v2273_v32 = vmul.f32 %v4257_v8, %v2239_v51  ;;  %v2274_v26 = vmul.f32 %v4259_v15, %v2243_v46  ;;  %v4181_v15 = vld [vmem:[%s4938_s20 + $0x30] sm:$0xff]  }
 0x5cf   : > { %v2275_v45 = vmul.f32 %v4261_v28, %v2247_v35  ;;  %v2255_v10 = vrot.slane %v4271_v29, %v2113_v54  ;;  %v2259_v8 = vrot.slane %v4271_v29, %v2117_v22  ;;  %4009 = vmatpush3.bf16.msra.mxu0 %v4181_v15  ;;  %v2279_v54 = vmul.f32 %v4269_v19, %v2263_v40  ;;  %v4182_v22 = vld [vmem:[%s4938_s20 + $0x28] sm:$0xff]   ;;  %v4183_v28 = vld [vmem:[%s4938_s20 + $0x20] sm:$0xff]  }
 0x5d0   : > { %2326 = vperm.xlu0 %4146, %v2276_v20   ;;  %2306 = vperm.xlu1 %4147, %v2272_v23   ;;  %v2284_v19 = vrot.slane %v5279_v57, 4  ;;  %v2301_v40 = vunpack.c.l.bf16 %v2285_v42 }
 0x5d1   : > { %v2277_v16 = vmul.f32 %v4265_v6, %v2255_v10  ;;  %v2278_v27 = vmul.f32 %v4267_v24, %v2259_v8  ;;  %4010 = vmatprep.subr.bf16.mxu0 %v4583_v49  ;;  %v4186_v6 = vld [vmem:[%s4938_s20 + $0x8] sm:$0xff]   ;;  %v4187_v24 = vld [vmem:[%s4938_s20] sm:$0xff]   ;;  %s1098_s20 = scalar_lea.vmem %s5827_s23, %s5118_s3 }
 0x5d2   : > { %v2300_v31 = vunpack.c.l.bf16 %v2284_v19 }
 0x5d3   : > { %4011 = vmatpush3.bf16.msra.mxu0 %v4182_v22 }
 0x5d4   : > { %2311 = vperm.xlu1 %4147, %v2273_v32   ;;  %4012 = vmatprep.subr.bf16.mxu0 %v4583_v49  ;;  %v2299_v32 = vunpack.c.l.bf16 %v2283_v5 }
 0x5d7   : > { %4013 = vmatpush3.bf16.msra.mxu0 %v4183_v28 }
 0x5d8   : > { %2316 = vperm.xlu1 %4147, %v2274_v26   ;;  %4014 = vmatprep.subr.bf16.mxu0 %v4583_v49 }
 0x5db   : > { %4015 = vmatpush3.bf16.msra.mxu0 %v4184_v13 }
 0x5dc   : > { %2321 = vperm.xlu1 %4147, %v2275_v45   ;;  %4016 = vmatprep.subr.bf16.mxu0 %v4583_v49 }
 0x5df   : > { %4017 = vmatpush3.bf16.msra.mxu0 %v4185_v59 }
 0x5e0   : > { %2331 = vperm.xlu1 %4147, %v2277_v16   ;;  %4018 = vmatprep.subr.bf16.mxu0 %v4583_v49 }
 0x5e3   : > { %4019 = vmatpush3.bf16.msra.mxu0 %v4186_v6  ;;  %v2287_v6 = vrot.slane %v5288_v38, 4 }
 0x5e4   : > { %2336 = vperm.xlu1 %4147, %v2278_v27   ;;  %4020 = vmatprep.subr.bf16.mxu0 %v4583_v49 }
 0x5e7   : > { %4021 = vmatpush3.bf16.msra.mxu0 %v4187_v24 }
 0x5e8   : > { %2341 = vperm.xlu1 %4147, %v2279_v54  }
 0x64b   : > { %v2327_v44 = vpop.permute.xlu0 %2326  ;;  %v2307_v47 = vpop.permute.xlu1 %2306 }
 0x64c   : > { %v2348_v52 = vmul.f32 %v2327_v44, %v2300_v31  ;;  %v2344_v39 = vmul.f32 %v2307_v47, %v2296_v43 }
 0x64e   : > { %v2376_v55 = vrot.slane %v2348_v52, 4  ;;  %v2352_v53 = vrot.slane %v2344_v39, 4 }
 0x64f   : > { %v2312_v58 = vpop.permute.xlu1 %2311 }
 0x650   : > { %v2353_v30 = vadd.f32 %v2352_v53, %v2344_v39  ;;  %v2345_v62 = vmul.f32 %v2312_v58, %v2297_v18  ;;  %v2377_v3 = vadd.f32 %v2376_v55, %v2348_v52  ;;  %v2303_v53 = vunpack.c.l.bf16 %v2287_v6 }
 0x652   : > { %v2354_v57 = vrot.slane %v2353_v30, 2  ;;  %v2358_v25 = vrot.slane %v2345_v62, 4  ;;  %v2378_v14 = vrot.slane %v2377_v3, 2 }
 0x653   : > { %v2317_v60 = vpop.permute.xlu1 %2316 }
 0x654   : > { %v2355_v41 = vadd.f32 %v2354_v57, %v2353_v30  ;;  %v2359_v29 = vadd.f32 %v2358_v25, %v2345_v62  ;;  %v2346_v11 = vmul.f32 %v2317_v60, %v2298_v9  ;;  %v2379_v16 = vadd.f32 %v2378_v14, %v2377_v3 }
 0x656   : > { %v2356_v20 = vrot.slane %v2355_v41, 1  ;;  %v2360_v23 = vrot.slane %v2359_v29, 2  ;;  %v2364_v51 = vrot.slane %v2346_v11, 4  ;;  %v2380_v33 = vrot.slane %v2379_v16, 1 }
 0x657   : > { %v2322_v46 = vpop.permute.xlu1 %2321 }
 0x658   : > { %v2357_v26 = vadd.f32 %v2356_v20, %v2355_v41  ;;  %v2361_v35 = vadd.f32 %v2360_v23, %v2359_v29  ;;  %v2365_v45 = vadd.f32 %v2364_v51, %v2346_v11  ;;  %v2347_v10 = vmul.f32 %v2322_v46, %v2299_v32 }
 0x659   : > { %v2381_v18 = vadd.f32 %v2380_v33, %v2379_v16 }
 0x65a   : > { %v2362_v8 = vrot.slane %v2361_v35, 1  ;;  %v2366_v36 = vrot.slane %v2365_v45, 2  ;;  %v2370_v27 = vrot.slane %v2347_v10, 4  ;;  %v2400_v54 = vpack.c.bf16 %v2357_v26, %v2357_v26 }
 0x65b   : > { %v2332_v15 = vpop.permute.xlu1 %2331  ;;  %v2404_v41 = vpack.c.bf16 %v2381_v18, %v2381_v18 }
 0x65c   : > { %v2363_v22 = vadd.f32 %v2362_v8, %v2361_v35  ;;  %v2367_v28 = vadd.f32 %v2366_v36, %v2365_v45  ;;  %v2371_v13 = vadd.f32 %v2370_v27, %v2347_v10  ;;  %v2349_v59 = vmul.f32 %v2332_v15, %v2301_v40 }
 0x65d   : > { %v2439_v44 = vunpack.c.l.b16 %v2400_v54  ;;  %v2443_v26 = vunpack.c.l.b16 %v2404_v41 }
 0x65e   : > { %v2401_v24 = vpack.c.bf16 %v2363_v22, %v2363_v22  ;;  %v2368_v19 = vrot.slane %v2367_v28, 1  ;;  %v2372_v31 = vrot.slane %v2371_v13, 2  ;;  %v2382_v43 = vrot.slane %v2349_v59, 4 }
 0x65f   : > { %v2337_v12 = vpop.permute.xlu1 %2336 }
 0x660   : > { %v2440_v47 = vunpack.c.l.b16 %v2401_v24  ;;  %v2369_v34 = vadd.f32 %v2368_v19, %v2367_v28  ;;  %v2350_v52 = vmul.f32 %v2337_v12, %v2302_v37  ;;  %v2373_v39 = vadd.f32 %v2372_v31, %v2371_v13  ;;  %v3840_v19 = vld [vmem:[%s1082_s28] ss:$0 sm:$0xff]  ;;  %s5828_s28 = sld [smem:[#allocation46_spill]] }
 0x661   : > { %v2383_v55 = vadd.f32 %v2382_v43, %v2349_v59 }
 0x662   : > { %v2447_v56 = vsel %vm1274_vm0, %v2440_v47, %v2439_v44  ;;  %v2402_v58 = vpack.c.bf16 %v2369_v34, %v2369_v34  ;;  %v2388_v30 = vrot.slane %v2350_v52, 4  ;;  %v2374_v38 = vrot.slane %v2373_v39, 1 }
 0x663   : > { %v2384_v62 = vrot.slane %v2383_v55, 2  ;;  %v2342_v3 = vpop.permute.xlu1 %2341 }
 0x664   : > { %v2441_v57 = vunpack.c.l.b16 %v2402_v58  ;;  %v2389_v25 = vadd.f32 %v2388_v30, %v2350_v52  ;;  %v2351_v9 = vmul.f32 %v2342_v3, %v2303_v53  ;;  %v2375_v60 = vadd.f32 %v2374_v38, %v2373_v39 }
 0x665   : > { %v2385_v5 = vadd.f32 %v2384_v62, %v2383_v55 }
 0x666   : > { %v2448_v29 = vsel %vm1277_vm1, %v2441_v57, %v2447_v56  ;;  %v2390_v11 = vrot.slane %v2389_v25, 2  ;;  %v2394_v14 = vrot.slane %v2351_v9, 4  ;;  %v2403_v20 = vpack.c.bf16 %v2375_v60, %v2375_v60  ;;  %s1101_s13 = scalar_lea.vmem %s5828_s28, %s5118_s3 }
 0x667   : > { %v2386_v23 = vrot.slane %v2385_v5, 1 }
 0x668   : > { %v2391_v51 = vadd.f32 %v2390_v11, %v2389_v25  ;;  %v2395_v32 = vadd.f32 %v2394_v14, %v2351_v9  ;;  %v2442_v46 = vunpack.c.l.b16 %v2403_v20 }
 0x669   : > { %v2387_v42 = vadd.f32 %v2386_v23, %v2385_v5 }
 0x66a   : > { %v2392_v35 = vrot.slane %v2391_v51, 1  ;;  %v2396_v45 = vrot.slane %v2395_v32, 2  ;;  %v2449_v10 = vsel %vm1280_vm2, %v2442_v46, %v2448_v29 }
 0x66b   : > { %v2405_v16 = vpack.c.bf16 %v2387_v42, %v2387_v42  ;;  %v2450_v8 = vsel %vm1283_vm3, %v2443_v26, %v2449_v10 }
 0x66c   : > { %v2393_v36 = vadd.f32 %v2392_v35, %v2391_v51  ;;  %v2397_v4 = vadd.f32 %v2396_v45, %v2395_v32 }
 0x66d   : > { %v2444_v27 = vunpack.c.l.b16 %v2405_v16 }
 0x66e   : > { %v2406_v40 = vpack.c.bf16 %v2393_v36, %v2393_v36  ;;  %v2398_v15 = vrot.slane %v2397_v4, 1 }
 0x66f   : > { %v2451_v54 = vsel %vm1286_vm4, %v2444_v27, %v2450_v8 }
 0x670   : > { %v2445_v22 = vunpack.c.l.b16 %v2406_v40  ;;  %v2399_v28 = vadd.f32 %v2398_v15, %v2397_v4 }
 0x672   : > { %v2452_v13 = vsel %vm1289_vm5, %v2445_v22, %v2451_v54  ;;  %v2407_v59 = vpack.c.bf16 %v2399_v28, %v2399_v28 }
 0x674   : > { %v2446_v6 = vunpack.c.l.b16 %v2407_v59 }
 0x676   : > { %v2453_v33 = vsel %vm1292_vm6, %v2446_v6, %v2452_v13 }
 0x677   : > { %v2454_v24 = vpack.c.b16 %v2453_v33, %v2453_v33 }
 0x679   : > { %4023 = vmatmul.mubr.bf16.vlgmr.msra.gmra.mxu0 %v2454_v24 }
 0x739   : > { %v2538_v37 = vpop.f32.mrf.mxu0 }
 0x73a   : > { %v2539_v31 = vadd.f32 %v3840_v19, %v2538_v37 }
 0x73b   : > { %v4024_v43 = vpop.f32.mrf.mxu0 }
 0x73c   : > { %v2545_v12 = vrot.slane %v2539_v31, 1  ;;  %v2546_v44 = vrot.slane %v2539_v31, 2  ;;  %v2547_v47 = vrot.slane %v2539_v31, 3  ;;  %v2548_v34 = vrot.slane %v2539_v31, 4 }
 0x73d   : > { %v2541_v52 = vpop.f32.mrf.mxu0  ;;  %v2549_v39 = vrot.slane %v2539_v31, 5  ;;  %v2550_v55 = vrot.slane %v2539_v31, 6  ;;  %v2551_v53 = vrot.slane %v2539_v31, 7  ;;  %v2560_v62 = vadd.f32 %v2539_v31, %v5184_v48 }
 0x73e   : > { %v2561_v18 = vadd.f32 %v2545_v12, %v5187_v21  ;;  %v2562_v56 = vadd.f32 %v2546_v44, %v5190_v50  ;;  %v2563_v58 = vadd.f32 %v2547_v47, %v5193_v61  ;;  %v2564_v38 = vadd.f32 %v2548_v34, %v5196_v63 }
 0x73f   : > { %v4025_v30 = vpop.f32.mrf.mxu0  ;;  %v2565_v3 = vadd.f32 %v2549_v39, %v5199_v0  ;;  %v2566_v9 = vadd.f32 %v2550_v55, %v5202_v1  ;;  %v2567_v60 = vadd.f32 %v2551_v53, %v5207_v7 }
 0x740   : > { %v2578_v57 = vrot.slane %v2561_v18, 7  ;;  %v2580_v25 = vrot.slane %v2562_v56, 6  ;;  %v2582_v21 = vrot.slane %v2563_v58, 5  ;;  %v2584_v41 = vrot.slane %v2564_v38, 4  ;;  %v4193_v30 = vld [vmem:[%s4944_s17 + $0x64] ss:$8 sps:$4 sm:$0xff]  }
 0x741   : > { %v2586_v29 = vrot.slane %v2565_v3, 3  ;;  %v2588_v48 = vrot.slane %v2566_v9, 2  ;;  %v2590_v11 = vrot.slane %v2567_v60, 1 }
 0x742   : > { %v2579_v5 = vsel %vm1274_vm0, %v2578_v57, %v2560_v62  ;;  %v4199_v57 = vld [vmem:[%s4944_s17 + $0x44] ss:$8 sps:$4 sm:$0xff]  }
 0x743   : > { %v2581_v50 = vsel %vm1277_vm1, %v2580_v25, %v2579_v5  ;;  %v4197_v25 = vld [vmem:[%s4944_s17 + $0x40] ss:$8 sps:$4 sm:$0xff]   ;;  %v4205_v5 = vld [vmem:[%s4944_s17 + $0x24] ss:$8 sps:$4 sm:$0xff]  }
 0x744   : > { %v2583_v61 = vsel %vm1280_vm2, %v2582_v21, %v2581_v50  ;;  %v4203_v21 = vld [vmem:[%s4944_s17 + $0x20] ss:$8 sps:$4 sm:$0xff]   ;;  %v4208_v50 = vld [vmem:[%s4944_s17 + $0x14] ss:$8 sps:$4 sm:$0xff]  }
 0x745   : > { %v2585_v63 = vsel %vm1283_vm3, %v2584_v41, %v2583_v61  ;;  %v4206_v41 = vld [vmem:[%s4944_s17 + $0x10] ss:$8 sps:$4 sm:$0xff]   ;;  %v4211_v61 = vld [vmem:[%s4944_s17 + $0x4] ss:$8 sps:$4 sm:$0xff]  }
 0x746   : > { %v2587_v0 = vsel %vm1286_vm4, %v2586_v29, %v2585_v63  ;;  %v4209_v29 = vld [vmem:[%s4944_s17] ss:$8 sps:$4 sm:$0xff]  }
 0x747   : > { %v2589_v14 = vsel %vm1289_vm5, %v2588_v48, %v2587_v0 }
 0x748   : > { %v2591_v1 = vsel %vm1292_vm6, %v2590_v11, %v2589_v14  ;;  %v3849_v14 = vld [vmem:[%s1085_s1] ss:$0 sm:$0xff]  ;;  %s5829_s1 = sld [smem:[#allocation47_spill]] }
 0x749   : > { %2593 = vadd.xlane.f32.xlu1 %v2591_v1 }
 0x74e   : > { %s1104_s26 = scalar_lea.vmem %s5829_s1, %s5118_s3  ;;  %s3410_s3 = scalar_lea.sflag [#allocation4], %s4915_s5 }
 0x7d2   : > { %v2594_v7 = vpop.xlane.xlu1 %2593 }
 0x7d3   : > { %v2595_v20 = vmul.f32 0.0078125, %v2594_v7 }
 0x7d5   : > { %v2597_v23 = vrot.slane %v2595_v20, 1  ;;  %v2598_v51 = vrot.slane %v2595_v20, 2  ;;  %v2599_v32 = vrot.slane %v2595_v20, 3  ;;  %v2600_v46 = vrot.slane %v2595_v20, 4 }
 0x7d6   : > { %v2601_v42 = vrot.slane %v2595_v20, 5  ;;  %v2602_v26 = vrot.slane %v2595_v20, 6  ;;  %v2603_v35 = vrot.slane %v2595_v20, 7  ;;  %v5452_v45 = vsub.f32 %v2560_v62, %v2595_v20  ;;  %v4196_v62 = vld [vmem:[%s4944_s17 + $0x54] ss:$8 sps:$4 sm:$0xff]  }
 0x7d7   : > { %v5454_v10 = vsub.f32 %v2561_v18, %v2597_v23  ;;  %v5456_v16 = vsub.f32 %v2562_v56, %v2598_v51  ;;  %v5458_v8 = vsub.f32 %v2563_v58, %v2599_v32  ;;  %v5460_v36 = vsub.f32 %v2564_v38, %v2600_v46  ;;  %v4188_v56 = vld [vmem:[%s4944_s17 + $0x70] ss:$8 sps:$4 sm:$0xff]   ;;  %v4190_v58 = vld [vmem:[%s4944_s17 + $0x74] ss:$8 sps:$4 sm:$0xff]   ;;  %v4191_v38 = vld [vmem:[%s4944_s17 + $0x60] ss:$8 sps:$4 sm:$0xff]  }
 0x7d8   : > { %v5462_v4 = vsub.f32 %v2565_v3, %v2601_v42  ;;  %v5464_v27 = vsub.f32 %v2566_v9, %v2602_v26  ;;  %v5466_v40 = vsub.f32 %v2567_v60, %v2603_v35  ;;  %v2620_v13 = vmul.f32 %v5452_v45, %v5452_v45  ;;  %2856 = vmatprep.subr.bf16.mxu1 %v4190_v58  ;;  %v4194_v3 = vld [vmem:[%s4944_s17 + $0x50] ss:$8 sps:$4 sm:$0xff]   ;;  %v4202_v9 = vld [vmem:[%s4944_s17 + $0x34] ss:$8 sps:$4 sm:$0xff]   ;;  %v3850_v26 = vld [vmem:[%s1088_s29] ss:$0 sm:$0xff] }
 0x7d9   : > { %v2621_v15 = vmul.f32 %v5454_v10, %v5454_v10  ;;  %v2622_v54 = vmul.f32 %v5456_v16, %v5456_v16  ;;  %v2623_v22 = vmul.f32 %v5458_v8, %v5458_v8  ;;  %v2624_v28 = vmul.f32 %v5460_v36, %v5460_v36  ;;  %2857 = vmatpush1.bf16.msra.mxu1 %v4188_v56  ;;  %v4200_v60 = vld [vmem:[%s4944_s17 + $0x30] ss:$8 sps:$4 sm:$0xff]   ;;  %s3896_s29 = sshll.u32 %s5816_s30, 7  ;;  %s1056_s17 = scalar_lea.vmem [#allocation14], %s3797_s8 }
 0x7da   : > { %v2625_v59 = vmul.f32 %v5462_v4, %v5462_v4  ;;  %v2626_v24 = vmul.f32 %v5464_v27, %v5464_v27  ;;  %v2627_v19 = vmul.f32 %v5466_v40, %v5466_v40  ;;  %2858 = vmatprep.subr.bf16.mxu1 %v4193_v30  ;;  %s3424_s11 = sshll.u32 %s1056_s17, 4  ;;  %s3425_s11 = int_to_ptr.vmem [resolvable:$true] %s3424_s11 }
 0x7db   : > { %v2636_v6 = vrot.slane %v2621_v15, 7  ;;  %v2638_v33 = vrot.slane %v2622_v54, 6  ;;  %v2640_v31 = vrot.slane %v2623_v22, 5  ;;  %v2642_v12 = vrot.slane %v2624_v28, 4 }
 0x7dc   : > { %v2644_v47 = vrot.slane %v2625_v59, 3  ;;  %v2646_v52 = vrot.slane %v2626_v24, 2  ;;  %v2648_v55 = vrot.slane %v2627_v19, 1 }
 0x7dd   : > { %v2637_v37 = vsel %vm1274_vm0, %v2636_v6, %v2620_v13  ;;  %2859 = vmatpush1.bf16.msra.mxu1 %v4191_v38 }
 0x7de   : > { %v2639_v43 = vsel %vm1277_vm1, %v2638_v33, %v2637_v37  ;;  %2860 = vmatprep.subr.bf16.mxu1 %v4196_v62 }
 0x7df   : > { %v2641_v44 = vsel %vm1280_vm2, %v2640_v31, %v2639_v43 }
 0x7e0   : > { %v2643_v34 = vsel %vm1283_vm3, %v2642_v12, %v2641_v44 }
 0x7e1   : > { %v2645_v39 = vsel %vm1286_vm4, %v2644_v47, %v2643_v34  ;;  %2861 = vmatpush1.bf16.msra.mxu1 %v4194_v3 }
 0x7e2   : > { %v2647_v53 = vsel %vm1289_vm5, %v2646_v52, %v2645_v39  ;;  %2862 = vmatprep.subr.bf16.mxu1 %v4199_v57 }
 0x7e3   : > { %v2649_v18 = vsel %vm1292_vm6, %v2648_v55, %v2647_v53 }
 0x7e4   : > { %2651 = vadd.xlane.f32.xlu0 %v2649_v18 }
 0x7e5   : > { %2863 = vmatpush1.bf16.msra.mxu1 %v4197_v25 }
 0x7e6   : > { %2864 = vmatprep.subr.bf16.mxu1 %v4202_v9 }
 0x7e9   : > { %2865 = vmatpush1.bf16.msra.mxu1 %v4200_v60 }
 0x7ea   : > { %2866 = vmatprep.subr.bf16.mxu1 %v4205_v5 }
 0x7ed   : > { %2867 = vmatpush1.bf16.msra.mxu1 %v4203_v21 }
 0x7ee   : > { %2868 = vmatprep.subr.bf16.mxu1 %v4208_v50 }
 0x7f1   : > { %2869 = vmatpush1.bf16.msra.mxu1 %v4206_v41 }
 0x7f2   : > { %2870 = vmatprep.subr.bf16.mxu1 %v4211_v61 }
 0x7f5   : > { %2871 = vmatpush1.bf16.msra.mxu1 %v4209_v29 }
 0x7f6   : > { %4026 = vmatprep.subr.bf16.mxu1 %v4583_v49 }
 0x86d   : > { %v2652_v63 = vpop.xlane.xlu0 %2651 }
 0x86e   : > { %v2653_v48 = vmul.f32 0.0078125, %v2652_v63 }
 0x870   : > { %v2654_v0 = vadd.f32 1e-12, %v2653_v48 }
 0x872   : > { %4272 = vrsqrt.f32 %v2654_v0 }
 0x87f   : > { %v4273_v11 = vpop.eup %4272 }
 0x880   : > { %v2657_v1 = vrot.slane %v4273_v11, 1  ;;  %v2658_v7 = vrot.slane %v4273_v11, 2  ;;  %v2659_v20 = vrot.slane %v4273_v11, 3  ;;  %v2660_v23 = vrot.slane %v4273_v11, 4 }
 0x881   : > { %v2661_v51 = vrot.slane %v4273_v11, 5  ;;  %v2662_v32 = vrot.slane %v4273_v11, 6  ;;  %v2663_v46 = vrot.slane %v4273_v11, 7  ;;  %v2672_v42 = vmul.f32 %v4273_v11, %v5452_v45 }
 0x882   : > { %v2673_v35 = vmul.f32 %v2657_v1, %v5454_v10  ;;  %v2674_v15 = vmul.f32 %v2658_v7, %v5456_v16  ;;  %v2675_v54 = vmul.f32 %v2659_v20, %v5458_v8  ;;  %v2676_v22 = vmul.f32 %v2660_v23, %v5460_v36  ;;  %v4212_v20 = vld [vmem:[%s4946_s25 + $0x78] sm:$0xff]  }
 0x883   : > { %v2677_v28 = vmul.f32 %v2661_v51, %v5462_v4  ;;  %v2678_v13 = vmul.f32 %v2662_v32, %v5464_v27  ;;  %v2679_v59 = vmul.f32 %v2663_v46, %v5466_v40  ;;  %v2686_v6 = vmul.f32 %v3849_v14, %v2672_v42  ;;  %v4213_v23 = vld [vmem:[%s4946_s25 + $0x38] sm:$0xff]   ;;  %3955 = vmatprep.subr.bf16.mxu0 %v4212_v20  ;;  %v4214_v51 = vld [vmem:[%s4946_s25 + $0x70] sm:$0xff]   ;;  %v4216_v46 = vld [vmem:[%s4946_s25 + $0x68] sm:$0xff]  }
 0x884   : > { %v2687_v33 = vmul.f32 %v3849_v14, %v2673_v35  ;;  %v2688_v24 = vmul.f32 %v3849_v14, %v2674_v15  ;;  %v2689_v19 = vmul.f32 %v3849_v14, %v2675_v54  ;;  %v2690_v45 = vmul.f32 %v3849_v14, %v2676_v22  ;;  %3956 = vmatpush3.bf16.msra.mxu0 %v4213_v23  ;;  %v4215_v32 = vld [vmem:[%s4946_s25 + $0x30] sm:$0xff]   ;;  %v4217_v42 = vld [vmem:[%s4946_s25 + $0x28] sm:$0xff]   ;;  %v4219_v35 = vld [vmem:[%s4946_s25 + $0x20] sm:$0xff]  }
 0x885   : > { %v2691_v37 = vmul.f32 %v3849_v14, %v2677_v28  ;;  %v2692_v31 = vmul.f32 %v3849_v14, %v2678_v13  ;;  %v2693_v10 = vmul.f32 %v3849_v14, %v2679_v59  ;;  %v5524_v43 = vadd.f32 %v3850_v26, %v2686_v6  ;;  %3957 = vmatprep.subr.bf16.mxu0 %v4214_v51  ;;  %v4220_v15 = vld [vmem:[%s4946_s25 + $0x58] sm:$0xff]   ;;  %v4222_v22 = vld [vmem:[%s4946_s25 + $0x50] sm:$0xff]   ;;  %v4224_v13 = vld [vmem:[%s4946_s25 + $0x48] sm:$0xff]  }
 0x886   : > { %v5526_v16 = vadd.f32 %v3850_v26, %v2687_v33  ;;  %v5528_v8 = vadd.f32 %v3850_v26, %v2688_v24  ;;  %v5530_v36 = vadd.f32 %v3850_v26, %v2689_v19  ;;  %v5532_v4 = vadd.f32 %v3850_v26, %v2690_v45  ;;  %v4221_v54 = vld [vmem:[%s4946_s25 + $0x18] sm:$0xff]   ;;  %v4223_v28 = vld [vmem:[%s4946_s25 + $0x10] sm:$0xff]   ;;  %v4225_v59 = vld [vmem:[%s4946_s25 + $0x8] sm:$0xff]  }
 0x887   : > { %v5534_v27 = vadd.f32 %v3850_v26, %v2691_v37  ;;  %v5536_v40 = vadd.f32 %v3850_v26, %v2692_v31  ;;  %v5538_v12 = vadd.f32 %v3850_v26, %v2693_v10  ;;  %v2708_v44 = vpack.c.bf16 %v5524_v43, %v5524_v43  ;;  %v4218_v26 = vld [vmem:[%s4946_s25 + $0x60] sm:$0xff]  }
 0x888   : > { %v2709_v47 = vpack.c.bf16 %v5526_v16, %v5526_v16  ;;  %v2710_v34 = vpack.c.bf16 %v5528_v8, %v5528_v8  ;;  %v2711_v52 = vpack.c.bf16 %v5530_v36, %v5530_v36  ;;  %v2712_v39 = vpack.c.bf16 %v5532_v4, %v5532_v4  ;;  %3958 = vmatpush3.bf16.msra.mxu0 %v4215_v32  ;;  %v4226_v6 = vld [vmem:[%s4946_s25 + $0x40] sm:$0xff]  }
 0x889   : > { %v2713_v55 = vpack.c.bf16 %v5534_v27, %v5534_v27  ;;  %v2714_v53 = vpack.c.bf16 %v5536_v40, %v5536_v40  ;;  %v2715_v18 = vpack.c.bf16 %v5538_v12, %v5538_v12  ;;  %v2752_v62 = vunpack.c.l.b16 %v2708_v44  ;;  %3959 = vmatprep.subr.bf16.mxu0 %v4216_v46  ;;  %v4227_v33 = vld [vmem:[%s4946_s25] sm:$0xff]   ;;  %s5831_s25 = sld [smem:[#allocation48_spill]] }
 0x88a   : > { %v2753_v56 = vunpack.c.l.b16 %v2709_v47  ;;  %v2754_v58 = vunpack.c.l.b16 %v2710_v34  ;;  %v2755_v30 = vunpack.c.l.b16 %v2711_v52  ;;  %v2756_v38 = vunpack.c.l.b16 %v2712_v39  ;;  %v2732_v24 = vld [vmem:[%s1092_s9] sm:$0x3] }
 0x88b   : > { %v2757_v3 = vunpack.c.l.b16 %v2713_v55  ;;  %v2758_v9 = vunpack.c.l.b16 %v2714_v53  ;;  %v2759_v60 = vunpack.c.l.b16 %v2715_v18  ;;  %v2737_v19 = vrot.slane %v2732_v24, %v5133_v17 }
 0x88c   : > { %v2760_v57 = vrot.slane %v2753_v56, 7  ;;  %v2762_v25 = vrot.slane %v2754_v58, 6  ;;  %v2764_v21 = vrot.slane %v2755_v30, 5  ;;  %v2766_v41 = vrot.slane %v2756_v38, 4  ;;  %3960 = vmatpush3.bf16.msra.mxu0 %v4217_v42 }
 0x88d   : > { %v2768_v29 = vrot.slane %v2757_v3, 3  ;;  %v2770_v48 = vrot.slane %v2758_v9, 2  ;;  %v2772_v11 = vrot.slane %v2759_v60, 1  ;;  %3961 = vmatprep.subr.bf16.mxu0 %v4218_v26  ;;  %v2741_v45 = vrot.slane %v2732_v24, %v5256_v2 }
 0x88e   : > { %v2761_v5 = vsel %vm1274_vm0, %v2760_v57, %v2752_v62 }
 0x88f   : > { %v2763_v50 = vsel %vm1277_vm1, %v2762_v25, %v2761_v5  ;;  %s5832_s15 = smov %s5831_s25  ;;  %s5686_s22 = scalar_lea.hbm %s5831_s25, %s3896_s29 }
 0x890   : > { %v2765_v61 = vsel %vm1280_vm2, %v2764_v21, %v2763_v50  ;;  %3962 = vmatpush3.bf16.msra.mxu0 %v4219_v35 }
 0x891   : > { %v2767_v63 = vsel %vm1283_vm3, %v2766_v41, %v2765_v61  ;;  %3963 = vmatprep.subr.bf16.mxu0 %v4220_v15  ;;  %v3867_v61 = vld [vmem:[%s1095_s14] ss:$0 sm:$0xff]  ;;  %s4478_s14 = scalar_lea.vmem %s3425_s11, 128 }
 0x892   : > { %v2769_v0 = vsel %vm1286_vm4, %v2768_v29, %v2767_v63  ;;  %p4479_p0 = scmp.ne.s32.totalorder %s3425_s11, %s4478_s14 }
 0x893   : > { %v2771_v14 = vsel %vm1289_vm5, %v2770_v48, %v2769_v0 }
 0x894   : > { %v2773_v1 = vsel %vm1292_vm6, %v2772_v11, %v2771_v14  ;;  %3964 = vmatpush3.bf16.msra.mxu0 %v4221_v54  ;;  %p4480_p1 = pnand %p4479_p0, %p4748_p9 }
 0x895   : > { %v2774_v7 = vpack.c.b16 %v2773_v1, %v2773_v1  ;;  %3965 = vmatprep.subr.bf16.mxu0 %v4222_v22 }
 0x896   : > { %p4481_p3 = pneg %p4480_p1 }
 0x897   : > { %2889 = vmatmul.mubr.bf16.vlgmr.msra.gmra.mxu1 %v2774_v7 }
 0x898   : > { %4042 = vmatprep.mubr.msk.bf16.mxu1 %vm4585_vm7, %v4583_v49  ;;  %3966 = vmatpush3.bf16.msra.mxu0 %v4223_v28 }
 0x899   : > { %3967 = vmatprep.subr.bf16.mxu0 %v4224_v13 }
 0x89c   : > { %3968 = vmatpush3.bf16.msra.mxu0 %v4225_v59 }
 0x89d   : > { %3969 = vmatprep.subr.bf16.mxu0 %v4226_v6 }
 0x8a0   : > { %3970 = vmatpush3.bf16.msra.mxu0 %v4227_v33 }
 0x957   : > { %v2890_v37 = vpop.f32.mrf.mxu1 }
 0x958   : > { %v2891_v31 = vadd.f32 %v2890_v37, %v2737_v19 }
 0x959   : > { %v2892_v10 = vpop.f32.mrf.mxu1 }
 0x95a   : > { %v2899_v44 = vmul.f32 0.044715, %v2891_v31  ;;  %v2893_v47 = vadd.f32 %v2892_v10, %v2741_v45  ;;  %v2897_v57 = vmul.f32 0.5, %v2891_v31 }
 0x95b   : > { %v2894_v34 = vpop.f32.mrf.mxu1 }
 0x95c   : > { %v2901_v52 = vmul.f32 %v2899_v44, %v2891_v31  ;;  %v2900_v39 = vmul.f32 0.044715, %v2893_v47  ;;  %v2898_v25 = vmul.f32 0.5, %v2893_v47 }
 0x95d   : > { %v2895_v55 = vpop.f32.mrf.mxu1 }
 0x95e   : > { %v2903_v53 = vmul.f32 %v2901_v52, %v2891_v31  ;;  %v2902_v18 = vmul.f32 %v2900_v39, %v2893_v47 }
 0x960   : > { %v2905_v56 = vadd.f32 %v2903_v53, %v2891_v31  ;;  %v2904_v58 = vmul.f32 %v2902_v18, %v2893_v47 }
 0x962   : > { %v2907_v30 = vmul.f32 0.7978846, %v2905_v56  ;;  %v2906_v38 = vadd.f32 %v2904_v58, %v2893_v47 }
 0x964   : > { %v2908_v62 = vmul.f32 0.7978846, %v2906_v38  ;;  %4274 = vtanh.f32 %v2907_v30 }
 0x966   : > { %4276 = vtanh.f32 %v2908_v62 }
 0x971   : > { %v4275_v17 = vpop.eup %4274 }
 0x972   : > { %v2911_v2 = vadd.f32 1.0, %v4275_v17 }
 0x973   : > { %v4277_v3 = vpop.eup %4276 }
 0x974   : > { %v2912_v9 = vadd.f32 1.0, %v4277_v3  ;;  %v2913_v60 = vmul.f32 %v2911_v2, %v2897_v57 }
 0x976   : > { %v2914_v5 = vmul.f32 %v2912_v9, %v2898_v25  ;;  %v2915_v50 = vpack.c.bf16 %v2913_v60, %v2913_v60 }
 0x978   : > { %v2916_v21 = vpack.c.bf16 %v2914_v5, %v2914_v5 }
 0x97a   : > { %3084 = vmatprep.mubr.bf16.mxu0 %v2916_v21 }
 0x97b   : > { %3085 = vmatmul.mubr.bf16.vlgmr.msra.gmra.mxu0 %v2915_v50 }
 0xa3b   : > { %v3971_v41 = vpop.f32.mrf.mxu0 }
 0xa3d   : > { %v3972_v29 = vpop.f32.mrf.mxu0 }
 0xa3e   : > { %v3973_v63 = vadd.f32 %v3972_v29, %v3971_v41 }
 0xa3f   : > { %v3974_v48 = vpop.f32.mrf.mxu0 }
 0xa40   : > { %v3087_v0 = vadd.f32 %v3973_v63, %v3867_v61 }
 0xa41   : > { %v3975_v11 = vpop.f32.mrf.mxu0 }
 0xa42   : > { %v3093_v14 = vrot.slane %v3087_v0, 1  ;;  %v3094_v1 = vrot.slane %v3087_v0, 2  ;;  %v3095_v7 = vrot.slane %v3087_v0, 3  ;;  %v3096_v20 = vrot.slane %v3087_v0, 4 }
 0xa43   : > { %v3097_v23 = vrot.slane %v3087_v0, 5  ;;  %v3098_v51 = vrot.slane %v3087_v0, 6  ;;  %v3099_v32 = vrot.slane %v3087_v0, 7  ;;  %v3108_v15 = vadd.f32 %v3087_v0, %v5524_v43 }
 0xa44   : > { %v3109_v46 = vadd.f32 %v3093_v14, %v5526_v16  ;;  %v3110_v42 = vadd.f32 %v3094_v1, %v5528_v8  ;;  %v3111_v26 = vadd.f32 %v3095_v7, %v5530_v36  ;;  %v3112_v35 = vadd.f32 %v3096_v20, %v5532_v4 }
 0xa45   : > { %v3113_v54 = vadd.f32 %v3097_v23, %v5534_v27  ;;  %v3114_v13 = vadd.f32 %v3098_v51, %v5536_v40  ;;  %v3115_v59 = vadd.f32 %v3099_v32, %v5538_v12  ;;  %v4228_v51 = vld [vmem:[%s924_s24 + $0x38] sm:$0xff]   ;;  %v4229_v32 = vld [vmem:[%s924_s24 + $0x30] sm:$0xff]  }
 0xa46   : > { %v3126_v22 = vrot.slane %v3109_v46, 7  ;;  %v3128_v28 = vrot.slane %v3110_v42, 6  ;;  %v3130_v33 = vrot.slane %v3111_v26, 5  ;;  %v3132_v8 = vrot.slane %v3112_v35, 4  ;;  %4027 = vmatpush3.bf16.msra.mxu1 %v4228_v51 }
 0xa47   : > { %v3134_v24 = vrot.slane %v3113_v54, 3  ;;  %v3136_v43 = vrot.slane %v3114_v13, 2  ;;  %v3138_v19 = vrot.slane %v3115_v59, 1  ;;  %4028 = vmatprep.subr.bf16.mxu1 %v4583_v49 }
 0xa48   : > { %v3127_v6 = vsel %vm1274_vm0, %v3126_v22, %v3108_v15 }
 0xa49   : > { %v3129_v16 = vsel %vm1277_vm1, %v3128_v28, %v3127_v6  ;;  %v3884_v6 = vld [vmem:[%s1098_s20] ss:$0 sm:$0xff] }
 0xa4a   : > { %v3131_v36 = vsel %vm1280_vm2, %v3130_v33, %v3129_v16  ;;  %4029 = vmatpush3.bf16.msra.mxu1 %v4229_v32 }
 0xa4b   : > { %v3133_v4 = vsel %vm1283_vm3, %v3132_v8, %v3131_v36  ;;  %4030 = vmatprep.subr.bf16.mxu1 %v4583_v49 }
 0xa4c   : > { %v3135_v27 = vsel %vm1286_vm4, %v3134_v24, %v3133_v4 }
 0xa4d   : > { %v3137_v45 = vsel %vm1289_vm5, %v3136_v43, %v3135_v27  ;;  %v3885_v27 = vld [vmem:[%s1101_s13] ss:$0 sm:$0xff] }
 0xa4e   : > { %v3139_v40 = vsel %vm1292_vm6, %v3138_v19, %v3137_v45 }
 0xa4f   : > { %3141 = vadd.xlane.f32.xlu1 %v3139_v40 }
 0xad8   : > { %v3142_v12 = vpop.xlane.xlu1 %3141 }
 0xad9   : > { %v3143_v37 = vmul.f32 0.0078125, %v3142_v12 }
 0xadb   : > { %v3145_v31 = vrot.slane %v3143_v37, 1  ;;  %v3146_v10 = vrot.slane %v3143_v37, 2  ;;  %v3147_v44 = vrot.slane %v3143_v37, 3  ;;  %v3148_v47 = vrot.slane %v3143_v37, 4 }
 0xadc   : > { %v3149_v34 = vrot.slane %v3143_v37, 5  ;;  %v3150_v52 = vrot.slane %v3143_v37, 6  ;;  %v3151_v39 = vrot.slane %v3143_v37, 7  ;;  %v5607_v55 = vsub.f32 %v3108_v15, %v3143_v37  ;;  %v4234_v15 = vld [vmem:[%s924_s24 + $0x8] sm:$0xff]  }
 0xadd   : > { %v5609_v53 = vsub.f32 %v3109_v46, %v3145_v31  ;;  %v5611_v18 = vsub.f32 %v3110_v42, %v3146_v10  ;;  %v5613_v56 = vsub.f32 %v3111_v26, %v3147_v44  ;;  %v5615_v58 = vsub.f32 %v3112_v35, %v3148_v47  ;;  %v4230_v46 = vld [vmem:[%s924_s24 + $0x28] sm:$0xff]   ;;  %v4231_v42 = vld [vmem:[%s924_s24 + $0x20] sm:$0xff]   ;;  %v4232_v26 = vld [vmem:[%s924_s24 + $0x18] sm:$0xff]  }
 0xade   : > { %v5617_v30 = vsub.f32 %v3113_v54, %v3149_v34  ;;  %v5619_v38 = vsub.f32 %v3114_v13, %v3150_v52  ;;  %v5621_v62 = vsub.f32 %v3115_v59, %v3151_v39  ;;  %v3168_v25 = vmul.f32 %v5607_v55, %v5607_v55  ;;  %4031 = vmatpush3.bf16.msra.mxu1 %v4230_v46  ;;  %v4233_v35 = vld [vmem:[%s924_s24 + $0x10] sm:$0xff]   ;;  %v4235_v54 = vld [vmem:[%s924_s24] sm:$0xff]   ;;  %s4587_s24 = smov [#allocation14]  }
 0xadf   : > { %v3169_v17 = vmul.f32 %v5609_v53, %v5609_v53  ;;  %v3170_v2 = vmul.f32 %v5611_v18, %v5611_v18  ;;  %v3171_v3 = vmul.f32 %v5613_v56, %v5613_v56  ;;  %v3172_v57 = vmul.f32 %v5615_v58, %v5615_v58  ;;  %4032 = vmatprep.subr.bf16.mxu1 %v4583_v49  ;;  %s4482_s27 = sshll.u32 %s4587_s24, 4  ;;  %s4483_s27 = int_to_ptr.vmem [resolvable:$false] %s4482_s27 }
 0xae0   : > { %v3173_v9 = vmul.f32 %v5617_v30, %v5617_v30  ;;  %v3174_v21 = vmul.f32 %v5619_v38, %v5619_v38  ;;  %v3175_v50 = vmul.f32 %v5621_v62, %v5621_v62  ;;  %s4484_s30 = scalar_lea.vmem %s4483_s27, 256  ;;  %p4485_p4 = scmp.lt.s32.totalorder %s3425_s11, %s4483_s27 }
 0xae1   : > { %v3184_v60 = vrot.slane %v3169_v17, 7  ;;  %v3186_v5 = vrot.slane %v3170_v2, 6  ;;  %v3188_v61 = vrot.slane %v3171_v3, 5  ;;  %v3190_v63 = vrot.slane %v3172_v57, 4  ;;  %p4486_p5 = scmp.lt.s32.totalorder %s4484_s30, %s4478_s14 }
 0xae2   : > { %v3192_v0 = vrot.slane %v3173_v9, 3  ;;  %v3194_v14 = vrot.slane %v3174_v21, 2  ;;  %v3196_v7 = vrot.slane %v3175_v50, 1  ;;  %4033 = vmatpush3.bf16.msra.mxu1 %v4231_v42 }
 0xae3   : > { %v3185_v41 = vsel %vm1274_vm0, %v3184_v60, %v3168_v25  ;;  %4034 = vmatprep.subr.bf16.mxu1 %v4583_v49  ;;  %p4487_p6 = por %p4486_p5, %p4485_p4 }
 0xae4   : > { %v3187_v29 = vsel %vm1277_vm1, %v3186_v5, %v3185_v41 }
 0xae5   : > { %v3189_v48 = vsel %vm1280_vm2, %v3188_v61, %v3187_v29  ;;  %p4488_p7 = pnand %p4487_p6, %p4481_p3 }
 0xae6   : > { %v3191_v11 = vsel %vm1283_vm3, %v3190_v63, %v3189_v48  ;;  %4035 = vmatpush3.bf16.msra.mxu1 %v4232_v26 }
 0xae7   : > { %v3193_v1 = vsel %vm1286_vm4, %v3192_v0, %v3191_v11  ;;  %4036 = vmatprep.subr.bf16.mxu1 %v4583_v49 }
 0xae8   : > { %v3195_v20 = vsel %vm1289_vm5, %v3194_v14, %v3193_v1 }
 0xae9   : > { %v3197_v23 = vsel %vm1292_vm6, %v3196_v7, %v3195_v20 }
 0xaea   : > { %3199 = vadd.xlane.f32.xlu0 %v3197_v23  ;;  %4037 = vmatpush3.bf16.msra.mxu1 %v4233_v35 }
 0xaeb   : > { %4038 = vmatprep.subr.bf16.mxu1 %v4583_v49 }
 0xaee   : > { %4039 = vmatpush3.bf16.msra.mxu1 %v4234_v15 }
 0xaef   : > { %4040 = vmatprep.subr.bf16.mxu1 %v4583_v49 }
 0xaf2   : > { %4041 = vmatpush3.bf16.msra.mxu1 %v4235_v54 }
 0xb73   : > { %v3200_v22 = vpop.xlane.xlu0 %3199 }
 0xb74   : > { %v3201_v28 = vmul.f32 0.0078125, %v3200_v22 }
 0xb76   : > { %v3202_v13 = vadd.f32 1e-12, %v3201_v28 }
 0xb78   : > { %4278 = vrsqrt.f32 %v3202_v13 }
 0xb85   : > { %v4279_v59 = vpop.eup %4278 }
 0xb86   : > { %v3205_v33 = vrot.slane %v4279_v59, 1  ;;  %v3206_v16 = vrot.slane %v4279_v59, 2  ;;  %v3207_v8 = vrot.slane %v4279_v59, 3  ;;  %v3208_v36 = vrot.slane %v4279_v59, 4 }
 0xb87   : > { %v3209_v49 = vrot.slane %v4279_v59, 5  ;;  %v3210_v24 = vrot.slane %v4279_v59, 6  ;;  %v3211_v4 = vrot.slane %v4279_v59, 7  ;;  %v3220_v43 = vmul.f32 %v4279_v59, %v5607_v55 }
 0xb88   : > { %v3221_v19 = vmul.f32 %v3205_v33, %v5609_v53  ;;  %v3222_v45 = vmul.f32 %v3206_v16, %v5611_v18  ;;  %v3223_v40 = vmul.f32 %v3207_v8, %v5613_v56  ;;  %v3224_v12 = vmul.f32 %v3208_v36, %v5615_v58 }
 0xb89   : > { %v3225_v37 = vmul.f32 %v3209_v49, %v5617_v30  ;;  %v3226_v31 = vmul.f32 %v3210_v24, %v5619_v38  ;;  %v3227_v10 = vmul.f32 %v3211_v4, %v5621_v62  ;;  %v3234_v44 = vmul.f32 %v3884_v6, %v3220_v43 }
 0xb8a   : > { %v3235_v47 = vmul.f32 %v3884_v6, %v3221_v19  ;;  %v3236_v34 = vmul.f32 %v3884_v6, %v3222_v45  ;;  %v3237_v52 = vmul.f32 %v3884_v6, %v3223_v40  ;;  %v3238_v39 = vmul.f32 %v3884_v6, %v3224_v12 }
 0xb8b   : > { %v3239_v55 = vmul.f32 %v3884_v6, %v3225_v37  ;;  %v3240_v17 = vmul.f32 %v3884_v6, %v3226_v31  ;;  %v3241_v53 = vmul.f32 %v3884_v6, %v3227_v10  ;;  %v3248_v2 = vadd.f32 %v3885_v27, %v3234_v44  ;;  %v3886_v6 = vld [vmem:[%s1104_s26] ss:$0 sm:$0xff] }
 0xb8c   : > { %v3249_v18 = vadd.f32 %v3885_v27, %v3235_v47  ;;  %v3250_v3 = vadd.f32 %v3885_v27, %v3236_v34  ;;  %v3251_v56 = vadd.f32 %v3885_v27, %v3237_v52  ;;  %v3252_v57 = vadd.f32 %v3885_v27, %v3238_v39 }
 0xb8d   : > { %v3253_v58 = vadd.f32 %v3885_v27, %v3239_v55  ;;  %v3254_v25 = vadd.f32 %v3885_v27, %v3240_v17  ;;  %v3255_v30 = vadd.f32 %v3885_v27, %v3241_v53  ;;  %v3256_v9 = vpack.c.bf16 %v3248_v2, %v3248_v2 }
 0xb8e   : > { %v3257_v38 = vpack.c.bf16 %v3249_v18, %v3249_v18  ;;  %v3258_v60 = vpack.c.bf16 %v3250_v3, %v3250_v3  ;;  %v3259_v62 = vpack.c.bf16 %v3251_v56, %v3251_v56  ;;  %v3260_v5 = vpack.c.bf16 %v3252_v57, %v3252_v57 }
 0xb8f   : > { %v3261_v21 = vpack.c.bf16 %v3253_v58, %v3253_v58  ;;  %v3262_v50 = vpack.c.bf16 %v3254_v25, %v3254_v25  ;;  %v3263_v41 = vpack.c.bf16 %v3255_v30, %v3255_v30  ;;  %v3295_v0 = vunpack.c.l.b16 %v3256_v9 }
 0xb90   : > { %v3296_v61 = vunpack.c.l.b16 %v3257_v38  ;;  %v3297_v29 = vunpack.c.l.b16 %v3258_v60  ;;  %v3298_v63 = vunpack.c.l.b16 %v3259_v62  ;;  %v3299_v48 = vunpack.c.l.b16 %v3260_v5 }
 0xb91   : > { %v3300_v11 = vunpack.c.l.b16 %v3261_v21  ;;  %v3301_v7 = vunpack.c.l.b16 %v3262_v50  ;;  %v3302_v20 = vunpack.c.l.b16 %v3263_v41 }
 0xb92   : > { %v3303_v14 = vrot.slane %v3296_v61, 7  ;;  %v3305_v1 = vrot.slane %v3297_v29, 6  ;;  %v3307_v51 = vrot.slane %v3298_v63, 5  ;;  %v3309_v46 = vrot.slane %v3299_v48, 4 }
 0xb93   : > { %v3311_v26 = vrot.slane %v3300_v11, 3  ;;  %v3313_v15 = vrot.slane %v3301_v7, 2  ;;  %v3315_v22 = vrot.slane %v3302_v20, 1 }
 0xb94   : > { %v3304_v23 = vsel %vm1274_vm0, %v3303_v14, %v3295_v0 }
 0xb95   : > { %v3306_v32 = vsel %vm1277_vm1, %v3305_v1, %v3304_v23 }
 0xb96   : > { %v3308_v42 = vsel %vm1280_vm2, %v3307_v51, %v3306_v32 }
 0xb97   : > { %v3310_v35 = vsel %vm1283_vm3, %v3309_v46, %v3308_v42 }
 0xb98   : > { %v3312_v54 = vsel %vm1286_vm4, %v3311_v26, %v3310_v35 }
 0xb99   : > { %v3314_v28 = vsel %vm1289_vm5, %v3313_v15, %v3312_v54 }
 0xb9a   : > { %v3316_v13 = vsel %vm1292_vm6, %v3315_v22, %v3314_v28 }
 0xb9b   : > { %v3317_v59 = vpack.c.b16 %v3316_v13, %v3316_v13 }
 0xb9d   : > { %4043 = vmatmul.mubr.bf16.vlgmr.msra.gmra.mxu1 %v3317_v59 }
 0xc5d   : > { %v3401_v33 = vpop.f32.mrf.mxu1 }
 0xc5e   : > { %v3402_v16 = vadd.f32 %v3886_v6, %v3401_v33 }
 0xc5f   : > { %v4044_v8 = vpop.f32.mrf.mxu1 }
 0xc60   : > { %4280 = vtanh.f32 %v3402_v16 }
 0xc61   : > { %v3404_v36 = vpop.f32.mrf.mxu1 }
 0xc63   : > { %v4045_v49 = vpop.f32.mrf.mxu1 }
 0xc6d   : > { %v4281_v24 = vpop.eup %4280 }
 0xc6e   : > { %3408 = vst [vmem:[%s1056_s17] sm:$0xff] %v4281_v24 }
 0xc6f   : > { %4491 = shalt.err (!%p4488_p7)
}
 0xc70   : > { %s4492_s19 = scalar_lea.hbm %s5686_s22, 128  ;;  %s4496_s20 = scalar_lea.hbm %s5832_s15, 256 }
 0xc71   : > { %p4493_p10 = scmp.ne.s32.totalorder %s5686_s22, %s4492_s19  ;;  %p4497_p8 = scmp.lt.s32.totalorder %s5686_s22, %s5832_s15 }
 0xc72   : > { %p4498_p0 = scmp.lt.s32.totalorder %s4496_s20, %s4492_s19 }
 0xc73   : > { %p4494_p13 = pnand %p4493_p10, %p4748_p9 }
 0xc74   : > { %p4499_p1 = por %p4498_p0, %p4497_p8 }
 0xc75   : > { %p4495_p2 = pneg %p4494_p13 }
 0xc77   : > { %p4500_p3 = pnand %p4499_p1, %p4495_p2 }
 0xc79   : > { %4503 = shalt.err (!%p4500_p3)
}
 0xc7a   : > { %4060 = dma.vmem_to_hbm [thread:$0]  (%p4748_p9), %s3425_s11, 128, %s5686_s22, %s3410_s3  }
 0xc7b PF: > { %s5833_s28 = sld [smem:[#allocation20_spill]]  ;;  %p4085_p4 = pnand %p3767_p12, %p4755_p11 }
 0xc7c   : > { %s5835_s4 = sld [smem:[#allocation24_spill]] }
 0xc7d   : > { %p4086_p5 = pneg %p4085_p4 }
 0xc81   : > { %s3436_s10 = sand.u32 1, %s5833_s28  }
 0xc82   : > { %s3437_s1 = scalar_lea.sflag [#allocation4], %s3436_s10 }
 0xc83   : > { %4545 = dma.done.wait (%p4086_p5), %s3437_s1, 128  }
 0xc84   : > { %4547 = vsyncadd (%p4086_p5), %s3437_s1, 4294967168  ;;  %s45_s25 = sadd.s32 1, %s5835_s4   ;;  %s5836_s1 = sld [smem:[#allocation21_spill]] }
 0xc85   : > { %p42_p6 = scmp.ge.s32.totalorder %s45_s25, 4   ;;  %s5837_s22 = sld [smem:[#allocation22_spill]] }
 0xc86   : > { %s5838_s23 = sld [smem:[#allocation29_spill]]  ;;  %s5840_s24 = smov %s4566_s2 }
 0xc87   : > { %s5839_s26 = sld [smem:[#allocation26_spill]] }
 0xc89   :  { %44 = sbr.rel (!%p42_p6) target bundleno = 31 (0x1f), region = 256 }
 0xc8d   : > { %s5841_s2 = smov %s5839_s26 }
 0xc8e   :  { %3442 = vsyncpa [#allocation3], 1 }
 0xc8f   :  { %3444 = vsyncpa [#allocation3 + $0x1], 1 }
 0xc90   :  { %3445 = vsyncpa [#allocation6], 1 }
 0xc91   :  { %3447 = vsyncpa [#allocation6 + $0x1], 1 }
 0xc92   :  { %3448 = vsyncpa [#allocation9], 1 }
 0xc93   :  { %3450 = vsyncpa [#allocation9 + $0x1], 1 }
 0xc94   :  { %3451 = vsyncpa [#allocation12], 1 }
 0xc95   :  { %3453 = vsyncpa [#allocation12 + $0x1], 1 }
 0xc96   :  { %3454 = vsyncpa [#allocation4], 1 }
 0xc97   :  { %3456 = vsyncpa [#allocation4 + $0x1], 1 }

</bundles_post_ra>
